<compile_context>
chip_gen: v7x
topology: tpu7x:2x2x1
jax: 0.10.0
libtpu: 0.0.40
codegen_flags: <defaults>
</compile_context>

<pallas_src>
import functools

import jax
import jax.numpy as jnp
from jax.experimental import pallas as pl
from jax.experimental.pallas import tpu as pltpu


# ----------------------------------------------------------------------------
# Fused Pallas kernel: whole Repr_Net forward for one batch group.
# ----------------------------------------------------------------------------
def _repr_net_kernel(x_ref, w_ref, b_ref, m_ref, o_ref, *, width):
    """Channel-major fused forward.

    x_ref : (1, C, M)     input activations, M = bg*H*W lanes (lane-dense)
    w_ref : (S, C, 9*C)   per-stage im2col weights, BN scale folded in
    b_ref : (S, C, 1)     folded eval-mode BN bias
    m_ref : (9, 1, M)     per-tap 0/1 boundary masks ('SAME' zero padding)
    o_ref : (1, C, M)     output
    """
    c = x_ref.shape[1]
    m = x_ref.shape[2]
    n_stage = w_ref.shape[0]
    n_blocks = (n_stage - 1) // 2

    def shift_lanes(a, off):
        # result[:, i] = a[:, i + off], zero-filled at the array ends.
        if off == 0:
            return a
        if off > 0:
            return jnp.concatenate(
                [a[:, off:], jnp.zeros((c, off), jnp.float32)], axis=1)
        return jnp.concatenate(
            [jnp.zeros((c, -off), jnp.float32), a[:, :m + off]], axis=1)

    def stage(s, act, residual=None):
        # im2col: 9 shifted+masked (C, M) slabs stacked along sublanes -> (9C, M),
        # then ONE MXU matmul (C, 9C) @ (9C, M) for the whole 3x3 conv.
        slabs = []
        for dy in range(3):
            for dx in range(3):
                off = (dy - 1) * width + (dx - 1)
                sl = shift_lanes(act, off)
                if off != 0:
                    sl = sl * m_ref[dy * 3 + dx]          # boundary mask (0/1)
                slabs.append(sl)
        patch = jnp.concatenate(slabs, axis=0)            # (9C, M)
        y = jnp.dot(w_ref[s], patch, preferred_element_type=jnp.float32)
        y = y + b_ref[s]                                  # folded BN bias
        if residual is not None:
            y = y + residual                              # skip connection
        return jnp.maximum(y, 0.0)                        # ReLU

    act = stage(0, x_ref[0])                              # ConvBlock
    for blk in range(n_blocks):                           # ResidualBlocks
        mid = stage(1 + 2 * blk, act)
        act = stage(2 + 2 * blk, mid, residual=act)
    o_ref[0] = act


# ----------------------------------------------------------------------------
# Parameter construction (deterministic, synthetic) + BN folding + packing.
# ----------------------------------------------------------------------------
def _make_conv_bn_params(key, cin, cout, eps=1e-5):
    kw, kb, kg, kbeta, km, kv = jax.random.split(key, 6)
    w = jax.random.normal(kw, (3, 3, cin, cout), jnp.float32) * 0.1   # HWIO
    conv_b = jax.random.normal(kb, (cout,), jnp.float32) * 0.1
    gamma = 1.0 + 0.1 * jax.random.normal(kg, (cout,), jnp.float32)
    beta = 0.1 * jax.random.normal(kbeta, (cout,), jnp.float32)
    run_mean = 0.1 * jax.random.normal(km, (cout,), jnp.float32)
    run_var = jax.random.uniform(kv, (cout,), jnp.float32, 0.5, 1.5)
    # Eval-mode BN folded onto the conv output:
    #   BN(conv(x, w) + b) = conv(x, w * scale) + ((b - mean) * scale + beta)
    scale = gamma / jnp.sqrt(run_var + eps)
    bias = (conv_b - run_mean) * scale + beta
    return {"w": w, "scale": scale, "bias": bias}


def make_repr_net_params(key, start_channels=17, res_channels=32, num_res_blocks=3):
    keys = jax.random.split(key, 1 + 2 * num_res_blocks)
    params = {"conv_block": _make_conv_bn_params(keys[0], start_channels, res_channels)}
    params["res_blocks"] = []
    for i in range(num_res_blocks):
        params["res_blocks"].append({
            "conv1": _make_conv_bn_params(keys[1 + 2 * i], res_channels, res_channels),
            "conv2": _make_conv_bn_params(keys[2 + 2 * i], res_channels, res_channels),
        })
    return params


def _pack_stage_params(params):
    """Pack all 7 conv stages into (S, C, 9C) im2col weights + (S, C, 1) bias.

    BN scale is folded into the weights (host side); Cin of the first stage is
    zero-padded to C so every stage has a uniform (C, 9C) weight matrix.
    Column order is (dy*3 + dx)*C + cin, matching the kernel's patch layout.
    """
    stages = [params["conv_block"]]
    for blk in params["res_blocks"]:
        stages.append(blk["conv1"])
        stages.append(blk["conv2"])
    c = stages[0]["w"].shape[-1]
    w_list, b_list = [], []
    for p in stages:
        wk = p["w"]                                        # (3, 3, ci, c) HWIO
        ci = wk.shape[2]
        if ci < c:
            wk = jnp.pad(wk, ((0, 0), (0, 0), (0, c - ci), (0, 0)))
        wk = wk * p["scale"][None, None, None, :]          # fold BN scale
        w_list.append(jnp.transpose(wk, (3, 0, 1, 2)).reshape(c, 9 * c))
        b_list.append(p["bias"].reshape(c, 1))
    return (jnp.stack(w_list).astype(jnp.float32),
            jnp.stack(b_list).astype(jnp.float32))


def _make_tap_masks(h, w, bg):
    """(9, 1, bg*h*w) 0/1 masks: tap (dy,dx) valid iff (h+dy, w+dx) in-image."""
    hh, ww = jnp.meshgrid(jnp.arange(h), jnp.arange(w), indexing="ij")
    rows = []
    for dy in (-1, 0, 1):
        for dx in (-1, 0, 1):
            valid = ((hh + dy >= 0) & (hh + dy < h) &
                     (ww + dx >= 0) & (ww + dx < w))
            rows.append(valid.reshape(-1))
    m = jnp.stack(rows).astype(jnp.float32)                # (9, H*W)
    m = jnp.tile(m, (1, bg))                               # (9, bg*H*W)
    return m.reshape(9, 1, bg * h * w)


def _tensorcores_per_chip():
    try:
        kind = jax.devices()[0].device_kind.lower()
    except Exception:
        return 1
    return 2 if ("v7" in kind or "7x" in kind) else 1


# ----------------------------------------------------------------------------
# Repr_Net forward (NCHW in / NCHW out, matching the PyTorch module).
# ----------------------------------------------------------------------------
def repr_net_forward(params, x_nchw):
    w_all, b_all = _pack_stage_params(params)
    s_total, c, _ = w_all.shape
    batch, cin, h, w = x_nchw.shape

    x = x_nchw.astype(jnp.float32)
    if cin < c:                                            # pad channels once
        x = jnp.pad(x, ((0, 0), (0, c - cin), (0, 0), (0, 0)))

    # Batch grouping: fuse the whole batch into a single grid step on
    # 1-TensorCore chips (v5e/v6e), one element per grid step on v7x (2 TCs).
    bg = 1 if (_tensorcores_per_chip() > 1 and batch > 1) else batch
    g = batch // bg
    mg = bg * h * w

    # Channel-major, lane-dense layout: (G, C, bg*H*W); NCHW is already
    # channel-major per element, so this is just a cheap host-side reshape.
    xg = (x.reshape(g, bg, c, h * w)
           .transpose(0, 2, 1, 3)
           .reshape(g, c, mg))
    masks = _make_tap_masks(h, w, bg)

    kernel = functools.partial(_repr_net_kernel, width=w)
    out = pl.pallas_call(
        kernel,
        out_shape=jax.ShapeDtypeStruct((g, c, mg), jnp.float32),
        grid=(g,),
        in_specs=[
            pl.BlockSpec((1, c, mg), lambda i: (i, 0, 0)),         # this group
            pl.BlockSpec((s_total, c, 9 * c), lambda i: (0, 0, 0)),  # weights, resident
            pl.BlockSpec((s_total, c, 1), lambda i: (0, 0, 0)),      # folded BN bias
            pl.BlockSpec((9, 1, mg), lambda i: (0, 0, 0)),           # tap masks
        ],
        out_specs=pl.BlockSpec((1, c, mg), lambda i: (i, 0, 0)),
        compiler_params=pltpu.CompilerParams(dimension_semantics=("parallel",)),
    )(xg, w_all, b_all, masks)

    return (out.reshape(g, c, bg, h * w)
               .transpose(0, 2, 1, 3)
               .reshape(batch, c, h, w))                  # NCHW


# ----------------------------------------------------------------------------
# Pure-JAX reference (for a silent correctness check).  Uses the same folded
# weights so MXU operand handling is shared with the kernel.
# ----------------------------------------------------------------------------
def repr_net_reference(params, x_nchw):
    x = jnp.transpose(x_nchw, (0, 2, 3, 1)).astype(jnp.float32)   # NHWC

    def stage(inp, p, residual):
        wf = p["w"] * p["scale"][None, None, None, :]
        y = jax.lax.conv_general_dilated(
            inp, wf, window_strides=(1, 1), padding="SAME",
            dimension_numbers=("NHWC", "HWIO", "NHWC"))
        y = y + p["bias"] + residual
        return jnp.maximum(y, 0.0)

    out = stage(x, params["conv_block"], 0.0)
    for blk in params["res_blocks"]:
        mid = stage(out, blk["conv1"], 0.0)
        out = stage(mid, blk["conv2"], out)
    return jnp.transpose(out, (0, 3, 1, 2))                       # NCHW


if __name__ == "__main__":
    key = jax.random.PRNGKey(0)
    k_params, k_x = jax.random.split(key)

    B, C_IN, H, W = 2, 17, 8, 8          # small game-board-like input
    C_RES, N_BLOCKS = 32, 3

    params = make_repr_net_params(k_params, C_IN, C_RES, N_BLOCKS)
    x = jax.random.normal(k_x, (B, C_IN, H, W), jnp.float32)       # NCHW

    out = jax.block_until_ready(repr_net_forward(params, x))
    ref = jax.block_until_ready(repr_net_reference(params, x))

    assert out.shape == (B, C_RES, H, W), out.shape
    max_err = float(jnp.max(jnp.abs(out - ref)))
    assert jnp.allclose(out, ref, atol=5e-4, rtol=5e-4), f"mismatch vs reference (max abs err {max_err})"

    print("KERNEL_OK")
</pallas_src>

<mosaic_0001>
module attributes {stable_mosaic.version = 11 : i64} {
  func.func @_repr_net_kernel(%arg0: i32, %arg1: memref<1x32x128xf32, #tpu.memory_space<vmem>>, %arg2: memref<7x32x288xf32, #tpu.memory_space<vmem>>, %arg3: memref<7x32x1xf32, #tpu.memory_space<vmem>>, %arg4: memref<9x1x128xf32, #tpu.memory_space<vmem>>, %arg5: memref<1x32x128xf32, #tpu.memory_space<vmem>>) attributes {dimension_semantics = [#tpu.dimension_semantics<parallel>], iteration_bounds = array<i64: 1>, scalar_prefetch = 0 : i64, scratch_operands = 0 : i64, tpu.core_type = #tpu.core_type<tc>, window_params = [{transform_indices = @transform_0, window_bounds = array<i64: 1, 32, 128>}, {pipeline_mode = #tpu.pipeline_mode<synchronous>, transform_indices = @transform_1, window_bounds = array<i64: 7, 32, 288>}, {pipeline_mode = #tpu.pipeline_mode<synchronous>, transform_indices = @transform_2, window_bounds = array<i64: 7, 32, 1>}, {pipeline_mode = #tpu.pipeline_mode<synchronous>, transform_indices = @transform_3, window_bounds = array<i64: 9, 1, 128>}, {transform_indices = @transform_4, window_bounds = array<i64: 1, 32, 128>}]} {
    %c0 = arith.constant 0 : index
    %c0_0 = arith.constant 0 : index
    %c0_1 = arith.constant 0 : index
    %0 = vector.load %arg1[%c0, %c0_0, %c0_1] : memref<1x32x128xf32, #tpu.memory_space<vmem>>, vector<1x32x128xf32>
    %1 = vector.shape_cast %0 : vector<1x32x128xf32> to vector<32x128xf32>
    %cst = arith.constant 0.000000e+00 : f32
    %2 = vector.broadcast %cst : f32 to vector<32x9xf32>
    %3 = vector.extract_strided_slice %1 {offsets = [0, 0], sizes = [32, 119], strides = [1, 1]} : vector<32x128xf32> to vector<32x119xf32>
    %4 = tpu.concatenate %2, %3 in 1 : vector<32x9xf32>, vector<32x119xf32> -> vector<32x128xf32>
    %c0_2 = arith.constant 0 : index
    %c0_3 = arith.constant 0 : index
    %c0_4 = arith.constant 0 : index
    %5 = vector.load %arg4[%c0_2, %c0_3, %c0_4] : memref<9x1x128xf32, #tpu.memory_space<vmem>>, vector<1x1x128xf32>
    %6 = vector.shape_cast %5 : vector<1x1x128xf32> to vector<1x128xf32>
    %7 = vector.broadcast %6 : vector<1x128xf32> to vector<32x128xf32>
    %8 = arith.mulf %4, %7 : vector<32x128xf32>
    %cst_5 = arith.constant 0.000000e+00 : f32
    %9 = vector.broadcast %cst_5 : f32 to vector<32x8xf32>
    %10 = vector.extract_strided_slice %1 {offsets = [0, 0], sizes = [32, 120], strides = [1, 1]} : vector<32x128xf32> to vector<32x120xf32>
    %11 = tpu.concatenate %9, %10 in 1 : vector<32x8xf32>, vector<32x120xf32> -> vector<32x128xf32>
    %c1 = arith.constant 1 : index
    %c0_6 = arith.constant 0 : index
    %c0_7 = arith.constant 0 : index
    %12 = vector.load %arg4[%c1, %c0_6, %c0_7] : memref<9x1x128xf32, #tpu.memory_space<vmem>>, vector<1x1x128xf32>
    %13 = vector.shape_cast %12 : vector<1x1x128xf32> to vector<1x128xf32>
    %14 = vector.broadcast %13 : vector<1x128xf32> to vector<32x128xf32>
    %15 = arith.mulf %11, %14 : vector<32x128xf32>
    %cst_8 = arith.constant 0.000000e+00 : f32
    %16 = vector.broadcast %cst_8 : f32 to vector<32x7xf32>
    %17 = vector.extract_strided_slice %1 {offsets = [0, 0], sizes = [32, 121], strides = [1, 1]} : vector<32x128xf32> to vector<32x121xf32>
    %18 = tpu.concatenate %16, %17 in 1 : vector<32x7xf32>, vector<32x121xf32> -> vector<32x128xf32>
    %c2 = arith.constant 2 : index
    %c0_9 = arith.constant 0 : index
    %c0_10 = arith.constant 0 : index
    %19 = vector.load %arg4[%c2, %c0_9, %c0_10] : memref<9x1x128xf32, #tpu.memory_space<vmem>>, vector<1x1x128xf32>
    %20 = vector.shape_cast %19 : vector<1x1x128xf32> to vector<1x128xf32>
    %21 = vector.broadcast %20 : vector<1x128xf32> to vector<32x128xf32>
    %22 = arith.mulf %18, %21 : vector<32x128xf32>
    %cst_11 = arith.constant 0.000000e+00 : f32
    %23 = vector.broadcast %cst_11 : f32 to vector<32x1xf32>
    %24 = vector.extract_strided_slice %1 {offsets = [0, 0], sizes = [32, 127], strides = [1, 1]} : vector<32x128xf32> to vector<32x127xf32>
    %25 = tpu.concatenate %23, %24 in 1 : vector<32x1xf32>, vector<32x127xf32> -> vector<32x128xf32>
    %c3 = arith.constant 3 : index
    %c0_12 = arith.constant 0 : index
    %c0_13 = arith.constant 0 : index
    %26 = vector.load %arg4[%c3, %c0_12, %c0_13] : memref<9x1x128xf32, #tpu.memory_space<vmem>>, vector<1x1x128xf32>
    %27 = vector.shape_cast %26 : vector<1x1x128xf32> to vector<1x128xf32>
    %28 = vector.broadcast %27 : vector<1x128xf32> to vector<32x128xf32>
    %29 = arith.mulf %25, %28 : vector<32x128xf32>
    %30 = vector.extract_strided_slice %1 {offsets = [0, 1], sizes = [32, 127], strides = [1, 1]} : vector<32x128xf32> to vector<32x127xf32>
    %cst_14 = arith.constant 0.000000e+00 : f32
    %31 = vector.broadcast %cst_14 : f32 to vector<32x1xf32>
    %32 = tpu.concatenate %30, %31 in 1 : vector<32x127xf32>, vector<32x1xf32> -> vector<32x128xf32>
    %c5 = arith.constant 5 : index
    %c0_15 = arith.constant 0 : index
    %c0_16 = arith.constant 0 : index
    %33 = vector.load %arg4[%c5, %c0_15, %c0_16] : memref<9x1x128xf32, #tpu.memory_space<vmem>>, vector<1x1x128xf32>
    %34 = vector.shape_cast %33 : vector<1x1x128xf32> to vector<1x128xf32>
    %35 = vector.broadcast %34 : vector<1x128xf32> to vector<32x128xf32>
    %36 = arith.mulf %32, %35 : vector<32x128xf32>
    %37 = vector.extract_strided_slice %1 {offsets = [0, 7], sizes = [32, 121], strides = [1, 1]} : vector<32x128xf32> to vector<32x121xf32>
    %cst_17 = arith.constant 0.000000e+00 : f32
    %38 = vector.broadcast %cst_17 : f32 to vector<32x7xf32>
    %39 = tpu.concatenate %37, %38 in 1 : vector<32x121xf32>, vector<32x7xf32> -> vector<32x128xf32>
    %c6 = arith.constant 6 : index
    %c0_18 = arith.constant 0 : index
    %c0_19 = arith.constant 0 : index
    %40 = vector.load %arg4[%c6, %c0_18, %c0_19] : memref<9x1x128xf32, #tpu.memory_space<vmem>>, vector<1x1x128xf32>
    %41 = vector.shape_cast %40 : vector<1x1x128xf32> to vector<1x128xf32>
    %42 = vector.broadcast %41 : vector<1x128xf32> to vector<32x128xf32>
    %43 = arith.mulf %39, %42 : vector<32x128xf32>
    %44 = vector.extract_strided_slice %1 {offsets = [0, 8], sizes = [32, 120], strides = [1, 1]} : vector<32x128xf32> to vector<32x120xf32>
    %cst_20 = arith.constant 0.000000e+00 : f32
    %45 = vector.broadcast %cst_20 : f32 to vector<32x8xf32>
    %46 = tpu.concatenate %44, %45 in 1 : vector<32x120xf32>, vector<32x8xf32> -> vector<32x128xf32>
    %c7 = arith.constant 7 : index
    %c0_21 = arith.constant 0 : index
    %c0_22 = arith.constant 0 : index
    %47 = vector.load %arg4[%c7, %c0_21, %c0_22] : memref<9x1x128xf32, #tpu.memory_space<vmem>>, vector<1x1x128xf32>
    %48 = vector.shape_cast %47 : vector<1x1x128xf32> to vector<1x128xf32>
    %49 = vector.broadcast %48 : vector<1x128xf32> to vector<32x128xf32>
    %50 = arith.mulf %46, %49 : vector<32x128xf32>
    %51 = vector.extract_strided_slice %1 {offsets = [0, 9], sizes = [32, 119], strides = [1, 1]} : vector<32x128xf32> to vector<32x119xf32>
    %cst_23 = arith.constant 0.000000e+00 : f32
    %52 = vector.broadcast %cst_23 : f32 to vector<32x9xf32>
    %53 = tpu.concatenate %51, %52 in 1 : vector<32x119xf32>, vector<32x9xf32> -> vector<32x128xf32>
    %c8 = arith.constant 8 : index
    %c0_24 = arith.constant 0 : index
    %c0_25 = arith.constant 0 : index
    %54 = vector.load %arg4[%c8, %c0_24, %c0_25] : memref<9x1x128xf32, #tpu.memory_space<vmem>>, vector<1x1x128xf32>
    %55 = vector.shape_cast %54 : vector<1x1x128xf32> to vector<1x128xf32>
    %56 = vector.broadcast %55 : vector<1x128xf32> to vector<32x128xf32>
    %57 = arith.mulf %53, %56 : vector<32x128xf32>
    %58 = tpu.concatenate %8, %15, %22, %29, %1, %36, %43, %50, %57 in 0 : vector<32x128xf32>, vector<32x128xf32>, vector<32x128xf32>, vector<32x128xf32>, vector<32x128xf32>, vector<32x128xf32>, vector<32x128xf32>, vector<32x128xf32>, vector<32x128xf32> -> vector<288x128xf32>
    %c0_26 = arith.constant 0 : index
    %c0_27 = arith.constant 0 : index
    %c0_28 = arith.constant 0 : index
    %59 = vector.load %arg2[%c0_26, %c0_27, %c0_28] : memref<7x32x288xf32, #tpu.memory_space<vmem>>, vector<1x32x288xf32>
    %60 = vector.shape_cast %59 : vector<1x32x288xf32> to vector<32x288xf32>
    %cst_29 = arith.constant dense<0.000000e+00> : vector<32x128xf32>
    %61 = tpu.matmul %60, %58, %cst_29 {dimension_numbers = #tpu.dot_dimension_numbers<[1], [0], [0], [1], [0, 0, 1, 1], [], []>} : vector<32x288xf32>, vector<288x128xf32>, vector<32x128xf32> -> vector<32x128xf32>
    %c0_30 = arith.constant 0 : index
    %c0_31 = arith.constant 0 : index
    %c0_32 = arith.constant 0 : index
    %62 = vector.load %arg3[%c0_30, %c0_31, %c0_32] : memref<7x32x1xf32, #tpu.memory_space<vmem>>, vector<1x32x1xf32>
    %63 = vector.shape_cast %62 : vector<1x32x1xf32> to vector<32x1xf32>
    %64 = vector.broadcast %63 : vector<32x1xf32> to vector<32x128xf32>
    %65 = arith.addf %61, %64 : vector<32x128xf32>
    %cst_33 = arith.constant 0.000000e+00 : f32
    %66 = vector.broadcast %cst_33 : f32 to vector<32x128xf32>
    %67 = arith.maximumf %65, %66 : vector<32x128xf32>
    %cst_34 = arith.constant 0.000000e+00 : f32
    %68 = vector.broadcast %cst_34 : f32 to vector<32x9xf32>
    %69 = vector.extract_strided_slice %67 {offsets = [0, 0], sizes = [32, 119], strides = [1, 1]} : vector<32x128xf32> to vector<32x119xf32>
    %70 = tpu.concatenate %68, %69 in 1 : vector<32x9xf32>, vector<32x119xf32> -> vector<32x128xf32>
    %c0_35 = arith.constant 0 : index
    %c0_36 = arith.constant 0 : index
    %c0_37 = arith.constant 0 : index
    %71 = vector.load %arg4[%c0_35, %c0_36, %c0_37] : memref<9x1x128xf32, #tpu.memory_space<vmem>>, vector<1x1x128xf32>
    %72 = vector.shape_cast %71 : vector<1x1x128xf32> to vector<1x128xf32>
    %73 = vector.broadcast %72 : vector<1x128xf32> to vector<32x128xf32>
    %74 = arith.mulf %70, %73 : vector<32x128xf32>
    %cst_38 = arith.constant 0.000000e+00 : f32
    %75 = vector.broadcast %cst_38 : f32 to vector<32x8xf32>
    %76 = vector.extract_strided_slice %67 {offsets = [0, 0], sizes = [32, 120], strides = [1, 1]} : vector<32x128xf32> to vector<32x120xf32>
    %77 = tpu.concatenate %75, %76 in 1 : vector<32x8xf32>, vector<32x120xf32> -> vector<32x128xf32>
    %c1_39 = arith.constant 1 : index
    %c0_40 = arith.constant 0 : index
    %c0_41 = arith.constant 0 : index
    %78 = vector.load %arg4[%c1_39, %c0_40, %c0_41] : memref<9x1x128xf32, #tpu.memory_space<vmem>>, vector<1x1x128xf32>
    %79 = vector.shape_cast %78 : vector<1x1x128xf32> to vector<1x128xf32>
    %80 = vector.broadcast %79 : vector<1x128xf32> to vector<32x128xf32>
    %81 = arith.mulf %77, %80 : vector<32x128xf32>
    %cst_42 = arith.constant 0.000000e+00 : f32
    %82 = vector.broadcast %cst_42 : f32 to vector<32x7xf32>
    %83 = vector.extract_strided_slice %67 {offsets = [0, 0], sizes = [32, 121], strides = [1, 1]} : vector<32x128xf32> to vector<32x121xf32>
    %84 = tpu.concatenate %82, %83 in 1 : vector<32x7xf32>, vector<32x121xf32> -> vector<32x128xf32>
    %c2_43 = arith.constant 2 : index
    %c0_44 = arith.constant 0 : index
    %c0_45 = arith.constant 0 : index
    %85 = vector.load %arg4[%c2_43, %c0_44, %c0_45] : memref<9x1x128xf32, #tpu.memory_space<vmem>>, vector<1x1x128xf32>
    %86 = vector.shape_cast %85 : vector<1x1x128xf32> to vector<1x128xf32>
    %87 = vector.broadcast %86 : vector<1x128xf32> to vector<32x128xf32>
    %88 = arith.mulf %84, %87 : vector<32x128xf32>
    %cst_46 = arith.constant 0.000000e+00 : f32
    %89 = vector.broadcast %cst_46 : f32 to vector<32x1xf32>
    %90 = vector.extract_strided_slice %67 {offsets = [0, 0], sizes = [32, 127], strides = [1, 1]} : vector<32x128xf32> to vector<32x127xf32>
    %91 = tpu.concatenate %89, %90 in 1 : vector<32x1xf32>, vector<32x127xf32> -> vector<32x128xf32>
    %c3_47 = arith.constant 3 : index
    %c0_48 = arith.constant 0 : index
    %c0_49 = arith.constant 0 : index
    %92 = vector.load %arg4[%c3_47, %c0_48, %c0_49] : memref<9x1x128xf32, #tpu.memory_space<vmem>>, vector<1x1x128xf32>
    %93 = vector.shape_cast %92 : vector<1x1x128xf32> to vector<1x128xf32>
    %94 = vector.broadcast %93 : vector<1x128xf32> to vector<32x128xf32>
    %95 = arith.mulf %91, %94 : vector<32x128xf32>
    %96 = vector.extract_strided_slice %67 {offsets = [0, 1], sizes = [32, 127], strides = [1, 1]} : vector<32x128xf32> to vector<32x127xf32>
    %cst_50 = arith.constant 0.000000e+00 : f32
    %97 = vector.broadcast %cst_50 : f32 to vector<32x1xf32>
    %98 = tpu.concatenate %96, %97 in 1 : vector<32x127xf32>, vector<32x1xf32> -> vector<32x128xf32>
    %c5_51 = arith.constant 5 : index
    %c0_52 = arith.constant 0 : index
    %c0_53 = arith.constant 0 : index
    %99 = vector.load %arg4[%c5_51, %c0_52, %c0_53] : memref<9x1x128xf32, #tpu.memory_space<vmem>>, vector<1x1x128xf32>
    %100 = vector.shape_cast %99 : vector<1x1x128xf32> to vector<1x128xf32>
    %101 = vector.broadcast %100 : vector<1x128xf32> to vector<32x128xf32>
    %102 = arith.mulf %98, %101 : vector<32x128xf32>
    %103 = vector.extract_strided_slice %67 {offsets = [0, 7], sizes = [32, 121], strides = [1, 1]} : vector<32x128xf32> to vector<32x121xf32>
    %cst_54 = arith.constant 0.000000e+00 : f32
    %104 = vector.broadcast %cst_54 : f32 to vector<32x7xf32>
    %105 = tpu.concatenate %103, %104 in 1 : vector<32x121xf32>, vector<32x7xf32> -> vector<32x128xf32>
    %c6_55 = arith.constant 6 : index
    %c0_56 = arith.constant 0 : index
    %c0_57 = arith.constant 0 : index
    %106 = vector.load %arg4[%c6_55, %c0_56, %c0_57] : memref<9x1x128xf32, #tpu.memory_space<vmem>>, vector<1x1x128xf32>
    %107 = vector.shape_cast %106 : vector<1x1x128xf32> to vector<1x128xf32>
    %108 = vector.broadcast %107 : vector<1x128xf32> to vector<32x128xf32>
    %109 = arith.mulf %105, %108 : vector<32x128xf32>
    %110 = vector.extract_strided_slice %67 {offsets = [0, 8], sizes = [32, 120], strides = [1, 1]} : vector<32x128xf32> to vector<32x120xf32>
    %cst_58 = arith.constant 0.000000e+00 : f32
    %111 = vector.broadcast %cst_58 : f32 to vector<32x8xf32>
    %112 = tpu.concatenate %110, %111 in 1 : vector<32x120xf32>, vector<32x8xf32> -> vector<32x128xf32>
    %c7_59 = arith.constant 7 : index
    %c0_60 = arith.constant 0 : index
    %c0_61 = arith.constant 0 : index
    %113 = vector.load %arg4[%c7_59, %c0_60, %c0_61] : memref<9x1x128xf32, #tpu.memory_space<vmem>>, vector<1x1x128xf32>
    %114 = vector.shape_cast %113 : vector<1x1x128xf32> to vector<1x128xf32>
    %115 = vector.broadcast %114 : vector<1x128xf32> to vector<32x128xf32>
    %116 = arith.mulf %112, %115 : vector<32x128xf32>
    %117 = vector.extract_strided_slice %67 {offsets = [0, 9], sizes = [32, 119], strides = [1, 1]} : vector<32x128xf32> to vector<32x119xf32>
    %cst_62 = arith.constant 0.000000e+00 : f32
    %118 = vector.broadcast %cst_62 : f32 to vector<32x9xf32>
    %119 = tpu.concatenate %117, %118 in 1 : vector<32x119xf32>, vector<32x9xf32> -> vector<32x128xf32>
    %c8_63 = arith.constant 8 : index
    %c0_64 = arith.constant 0 : index
    %c0_65 = arith.constant 0 : index
    %120 = vector.load %arg4[%c8_63, %c0_64, %c0_65] : memref<9x1x128xf32, #tpu.memory_space<vmem>>, vector<1x1x128xf32>
    %121 = vector.shape_cast %120 : vector<1x1x128xf32> to vector<1x128xf32>
    %122 = vector.broadcast %121 : vector<1x128xf32> to vector<32x128xf32>
    %123 = arith.mulf %119, %122 : vector<32x128xf32>
    %124 = tpu.concatenate %74, %81, %88, %95, %67, %102, %109, %116, %123 in 0 : vector<32x128xf32>, vector<32x128xf32>, vector<32x128xf32>, vector<32x128xf32>, vector<32x128xf32>, vector<32x128xf32>, vector<32x128xf32>, vector<32x128xf32>, vector<32x128xf32> -> vector<288x128xf32>
    %c1_66 = arith.constant 1 : index
    %c0_67 = arith.constant 0 : index
    %c0_68 = arith.constant 0 : index
    %125 = vector.load %arg2[%c1_66, %c0_67, %c0_68] : memref<7x32x288xf32, #tpu.memory_space<vmem>>, vector<1x32x288xf32>
    %126 = vector.shape_cast %125 : vector<1x32x288xf32> to vector<32x288xf32>
    %cst_69 = arith.constant dense<0.000000e+00> : vector<32x128xf32>
    %127 = tpu.matmul %126, %124, %cst_69 {dimension_numbers = #tpu.dot_dimension_numbers<[1], [0], [0], [1], [0, 0, 1, 1], [], []>} : vector<32x288xf32>, vector<288x128xf32>, vector<32x128xf32> -> vector<32x128xf32>
    %c1_70 = arith.constant 1 : index
    %c0_71 = arith.constant 0 : index
    %c0_72 = arith.constant 0 : index
    %128 = vector.load %arg3[%c1_70, %c0_71, %c0_72] : memref<7x32x1xf32, #tpu.memory_space<vmem>>, vector<1x32x1xf32>
    %129 = vector.shape_cast %128 : vector<1x32x1xf32> to vector<32x1xf32>
    %130 = vector.broadcast %129 : vector<32x1xf32> to vector<32x128xf32>
    %131 = arith.addf %127, %130 : vector<32x128xf32>
    %cst_73 = arith.constant 0.000000e+00 : f32
    %132 = vector.broadcast %cst_73 : f32 to vector<32x128xf32>
    %133 = arith.maximumf %131, %132 : vector<32x128xf32>
    %cst_74 = arith.constant 0.000000e+00 : f32
    %134 = vector.broadcast %cst_74 : f32 to vector<32x9xf32>
    %135 = vector.extract_strided_slice %133 {offsets = [0, 0], sizes = [32, 119], strides = [1, 1]} : vector<32x128xf32> to vector<32x119xf32>
    %136 = tpu.concatenate %134, %135 in 1 : vector<32x9xf32>, vector<32x119xf32> -> vector<32x128xf32>
    %c0_75 = arith.constant 0 : index
    %c0_76 = arith.constant 0 : index
    %c0_77 = arith.constant 0 : index
    %137 = vector.load %arg4[%c0_75, %c0_76, %c0_77] : memref<9x1x128xf32, #tpu.memory_space<vmem>>, vector<1x1x128xf32>
    %138 = vector.shape_cast %137 : vector<1x1x128xf32> to vector<1x128xf32>
    %139 = vector.broadcast %138 : vector<1x128xf32> to vector<32x128xf32>
    %140 = arith.mulf %136, %139 : vector<32x128xf32>
    %cst_78 = arith.constant 0.000000e+00 : f32
    %141 = vector.broadcast %cst_78 : f32 to vector<32x8xf32>
    %142 = vector.extract_strided_slice %133 {offsets = [0, 0], sizes = [32, 120], strides = [1, 1]} : vector<32x128xf32> to vector<32x120xf32>
    %143 = tpu.concatenate %141, %142 in 1 : vector<32x8xf32>, vector<32x120xf32> -> vector<32x128xf32>
    %c1_79 = arith.constant 1 : index
    %c0_80 = arith.constant 0 : index
    %c0_81 = arith.constant 0 : index
    %144 = vector.load %arg4[%c1_79, %c0_80, %c0_81] : memref<9x1x128xf32, #tpu.memory_space<vmem>>, vector<1x1x128xf32>
    %145 = vector.shape_cast %144 : vector<1x1x128xf32> to vector<1x128xf32>
    %146 = vector.broadcast %145 : vector<1x128xf32> to vector<32x128xf32>
    %147 = arith.mulf %143, %146 : vector<32x128xf32>
    %cst_82 = arith.constant 0.000000e+00 : f32
    %148 = vector.broadcast %cst_82 : f32 to vector<32x7xf32>
    %149 = vector.extract_strided_slice %133 {offsets = [0, 0], sizes = [32, 121], strides = [1, 1]} : vector<32x128xf32> to vector<32x121xf32>
    %150 = tpu.concatenate %148, %149 in 1 : vector<32x7xf32>, vector<32x121xf32> -> vector<32x128xf32>
    %c2_83 = arith.constant 2 : index
    %c0_84 = arith.constant 0 : index
    %c0_85 = arith.constant 0 : index
    %151 = vector.load %arg4[%c2_83, %c0_84, %c0_85] : memref<9x1x128xf32, #tpu.memory_space<vmem>>, vector<1x1x128xf32>
    %152 = vector.shape_cast %151 : vector<1x1x128xf32> to vector<1x128xf32>
    %153 = vector.broadcast %152 : vector<1x128xf32> to vector<32x128xf32>
    %154 = arith.mulf %150, %153 : vector<32x128xf32>
    %cst_86 = arith.constant 0.000000e+00 : f32
    %155 = vector.broadcast %cst_86 : f32 to vector<32x1xf32>
    %156 = vector.extract_strided_slice %133 {offsets = [0, 0], sizes = [32, 127], strides = [1, 1]} : vector<32x128xf32> to vector<32x127xf32>
    %157 = tpu.concatenate %155, %156 in 1 : vector<32x1xf32>, vector<32x127xf32> -> vector<32x128xf32>
    %c3_87 = arith.constant 3 : index
    %c0_88 = arith.constant 0 : index
    %c0_89 = arith.constant 0 : index
    %158 = vector.load %arg4[%c3_87, %c0_88, %c0_89] : memref<9x1x128xf32, #tpu.memory_space<vmem>>, vector<1x1x128xf32>
    %159 = vector.shape_cast %158 : vector<1x1x128xf32> to vector<1x128xf32>
    %160 = vector.broadcast %159 : vector<1x128xf32> to vector<32x128xf32>
    %161 = arith.mulf %157, %160 : vector<32x128xf32>
    %162 = vector.extract_strided_slice %133 {offsets = [0, 1], sizes = [32, 127], strides = [1, 1]} : vector<32x128xf32> to vector<32x127xf32>
    %cst_90 = arith.constant 0.000000e+00 : f32
    %163 = vector.broadcast %cst_90 : f32 to vector<32x1xf32>
    %164 = tpu.concatenate %162, %163 in 1 : vector<32x127xf32>, vector<32x1xf32> -> vector<32x128xf32>
    %c5_91 = arith.constant 5 : index
    %c0_92 = arith.constant 0 : index
    %c0_93 = arith.constant 0 : index
    %165 = vector.load %arg4[%c5_91, %c0_92, %c0_93] : memref<9x1x128xf32, #tpu.memory_space<vmem>>, vector<1x1x128xf32>
    %166 = vector.shape_cast %165 : vector<1x1x128xf32> to vector<1x128xf32>
    %167 = vector.broadcast %166 : vector<1x128xf32> to vector<32x128xf32>
    %168 = arith.mulf %164, %167 : vector<32x128xf32>
    %169 = vector.extract_strided_slice %133 {offsets = [0, 7], sizes = [32, 121], strides = [1, 1]} : vector<32x128xf32> to vector<32x121xf32>
    %cst_94 = arith.constant 0.000000e+00 : f32
    %170 = vector.broadcast %cst_94 : f32 to vector<32x7xf32>
    %171 = tpu.concatenate %169, %170 in 1 : vector<32x121xf32>, vector<32x7xf32> -> vector<32x128xf32>
    %c6_95 = arith.constant 6 : index
    %c0_96 = arith.constant 0 : index
    %c0_97 = arith.constant 0 : index
    %172 = vector.load %arg4[%c6_95, %c0_96, %c0_97] : memref<9x1x128xf32, #tpu.memory_space<vmem>>, vector<1x1x128xf32>
    %173 = vector.shape_cast %172 : vector<1x1x128xf32> to vector<1x128xf32>
    %174 = vector.broadcast %173 : vector<1x128xf32> to vector<32x128xf32>
    %175 = arith.mulf %171, %174 : vector<32x128xf32>
    %176 = vector.extract_strided_slice %133 {offsets = [0, 8], sizes = [32, 120], strides = [1, 1]} : vector<32x128xf32> to vector<32x120xf32>
    %cst_98 = arith.constant 0.000000e+00 : f32
    %177 = vector.broadcast %cst_98 : f32 to vector<32x8xf32>
    %178 = tpu.concatenate %176, %177 in 1 : vector<32x120xf32>, vector<32x8xf32> -> vector<32x128xf32>
    %c7_99 = arith.constant 7 : index
    %c0_100 = arith.constant 0 : index
    %c0_101 = arith.constant 0 : index
    %179 = vector.load %arg4[%c7_99, %c0_100, %c0_101] : memref<9x1x128xf32, #tpu.memory_space<vmem>>, vector<1x1x128xf32>
    %180 = vector.shape_cast %179 : vector<1x1x128xf32> to vector<1x128xf32>
    %181 = vector.broadcast %180 : vector<1x128xf32> to vector<32x128xf32>
    %182 = arith.mulf %178, %181 : vector<32x128xf32>
    %183 = vector.extract_strided_slice %133 {offsets = [0, 9], sizes = [32, 119], strides = [1, 1]} : vector<32x128xf32> to vector<32x119xf32>
    %cst_102 = arith.constant 0.000000e+00 : f32
    %184 = vector.broadcast %cst_102 : f32 to vector<32x9xf32>
    %185 = tpu.concatenate %183, %184 in 1 : vector<32x119xf32>, vector<32x9xf32> -> vector<32x128xf32>
    %c8_103 = arith.constant 8 : index
    %c0_104 = arith.constant 0 : index
    %c0_105 = arith.constant 0 : index
    %186 = vector.load %arg4[%c8_103, %c0_104, %c0_105] : memref<9x1x128xf32, #tpu.memory_space<vmem>>, vector<1x1x128xf32>
    %187 = vector.shape_cast %186 : vector<1x1x128xf32> to vector<1x128xf32>
    %188 = vector.broadcast %187 : vector<1x128xf32> to vector<32x128xf32>
    %189 = arith.mulf %185, %188 : vector<32x128xf32>
    %190 = tpu.concatenate %140, %147, %154, %161, %133, %168, %175, %182, %189 in 0 : vector<32x128xf32>, vector<32x128xf32>, vector<32x128xf32>, vector<32x128xf32>, vector<32x128xf32>, vector<32x128xf32>, vector<32x128xf32>, vector<32x128xf32>, vector<32x128xf32> -> vector<288x128xf32>
    %c2_106 = arith.constant 2 : index
    %c0_107 = arith.constant 0 : index
    %c0_108 = arith.constant 0 : index
    %191 = vector.load %arg2[%c2_106, %c0_107, %c0_108] : memref<7x32x288xf32, #tpu.memory_space<vmem>>, vector<1x32x288xf32>
    %192 = vector.shape_cast %191 : vector<1x32x288xf32> to vector<32x288xf32>
    %cst_109 = arith.constant dense<0.000000e+00> : vector<32x128xf32>
    %193 = tpu.matmul %192, %190, %cst_109 {dimension_numbers = #tpu.dot_dimension_numbers<[1], [0], [0], [1], [0, 0, 1, 1], [], []>} : vector<32x288xf32>, vector<288x128xf32>, vector<32x128xf32> -> vector<32x128xf32>
    %c2_110 = arith.constant 2 : index
    %c0_111 = arith.constant 0 : index
    %c0_112 = arith.constant 0 : index
    %194 = vector.load %arg3[%c2_110, %c0_111, %c0_112] : memref<7x32x1xf32, #tpu.memory_space<vmem>>, vector<1x32x1xf32>
    %195 = vector.shape_cast %194 : vector<1x32x1xf32> to vector<32x1xf32>
    %196 = vector.broadcast %195 : vector<32x1xf32> to vector<32x128xf32>
    %197 = arith.addf %193, %196 : vector<32x128xf32>
    %198 = arith.addf %197, %67 : vector<32x128xf32>
    %cst_113 = arith.constant 0.000000e+00 : f32
    %199 = vector.broadcast %cst_113 : f32 to vector<32x128xf32>
    %200 = arith.maximumf %198, %199 : vector<32x128xf32>
    %cst_114 = arith.constant 0.000000e+00 : f32
    %201 = vector.broadcast %cst_114 : f32 to vector<32x9xf32>
    %202 = vector.extract_strided_slice %200 {offsets = [0, 0], sizes = [32, 119], strides = [1, 1]} : vector<32x128xf32> to vector<32x119xf32>
    %203 = tpu.concatenate %201, %202 in 1 : vector<32x9xf32>, vector<32x119xf32> -> vector<32x128xf32>
    %c0_115 = arith.constant 0 : index
    %c0_116 = arith.constant 0 : index
    %c0_117 = arith.constant 0 : index
    %204 = vector.load %arg4[%c0_115, %c0_116, %c0_117] : memref<9x1x128xf32, #tpu.memory_space<vmem>>, vector<1x1x128xf32>
    %205 = vector.shape_cast %204 : vector<1x1x128xf32> to vector<1x128xf32>
    %206 = vector.broadcast %205 : vector<1x128xf32> to vector<32x128xf32>
    %207 = arith.mulf %203, %206 : vector<32x128xf32>
    %cst_118 = arith.constant 0.000000e+00 : f32
    %208 = vector.broadcast %cst_118 : f32 to vector<32x8xf32>
    %209 = vector.extract_strided_slice %200 {offsets = [0, 0], sizes = [32, 120], strides = [1, 1]} : vector<32x128xf32> to vector<32x120xf32>
    %210 = tpu.concatenate %208, %209 in 1 : vector<32x8xf32>, vector<32x120xf32> -> vector<32x128xf32>
    %c1_119 = arith.constant 1 : index
    %c0_120 = arith.constant 0 : index
    %c0_121 = arith.constant 0 : index
    %211 = vector.load %arg4[%c1_119, %c0_120, %c0_121] : memref<9x1x128xf32, #tpu.memory_space<vmem>>, vector<1x1x128xf32>
    %212 = vector.shape_cast %211 : vector<1x1x128xf32> to vector<1x128xf32>
    %213 = vector.broadcast %212 : vector<1x128xf32> to vector<32x128xf32>
    %214 = arith.mulf %210, %213 : vector<32x128xf32>
    %cst_122 = arith.constant 0.000000e+00 : f32
    %215 = vector.broadcast %cst_122 : f32 to vector<32x7xf32>
    %216 = vector.extract_strided_slice %200 {offsets = [0, 0], sizes = [32, 121], strides = [1, 1]} : vector<32x128xf32> to vector<32x121xf32>
    %217 = tpu.concatenate %215, %216 in 1 : vector<32x7xf32>, vector<32x121xf32> -> vector<32x128xf32>
    %c2_123 = arith.constant 2 : index
    %c0_124 = arith.constant 0 : index
    %c0_125 = arith.constant 0 : index
    %218 = vector.load %arg4[%c2_123, %c0_124, %c0_125] : memref<9x1x128xf32, #tpu.memory_space<vmem>>, vector<1x1x128xf32>
    %219 = vector.shape_cast %218 : vector<1x1x128xf32> to vector<1x128xf32>
    %220 = vector.broadcast %219 : vector<1x128xf32> to vector<32x128xf32>
    %221 = arith.mulf %217, %220 : vector<32x128xf32>
    %cst_126 = arith.constant 0.000000e+00 : f32
    %222 = vector.broadcast %cst_126 : f32 to vector<32x1xf32>
    %223 = vector.extract_strided_slice %200 {offsets = [0, 0], sizes = [32, 127], strides = [1, 1]} : vector<32x128xf32> to vector<32x127xf32>
    %224 = tpu.concatenate %222, %223 in 1 : vector<32x1xf32>, vector<32x127xf32> -> vector<32x128xf32>
    %c3_127 = arith.constant 3 : index
    %c0_128 = arith.constant 0 : index
    %c0_129 = arith.constant 0 : index
    %225 = vector.load %arg4[%c3_127, %c0_128, %c0_129] : memref<9x1x128xf32, #tpu.memory_space<vmem>>, vector<1x1x128xf32>
    %226 = vector.shape_cast %225 : vector<1x1x128xf32> to vector<1x128xf32>
    %227 = vector.broadcast %226 : vector<1x128xf32> to vector<32x128xf32>
    %228 = arith.mulf %224, %227 : vector<32x128xf32>
    %229 = vector.extract_strided_slice %200 {offsets = [0, 1], sizes = [32, 127], strides = [1, 1]} : vector<32x128xf32> to vector<32x127xf32>
    %cst_130 = arith.constant 0.000000e+00 : f32
    %230 = vector.broadcast %cst_130 : f32 to vector<32x1xf32>
    %231 = tpu.concatenate %229, %230 in 1 : vector<32x127xf32>, vector<32x1xf32> -> vector<32x128xf32>
    %c5_131 = arith.constant 5 : index
    %c0_132 = arith.constant 0 : index
    %c0_133 = arith.constant 0 : index
    %232 = vector.load %arg4[%c5_131, %c0_132, %c0_133] : memref<9x1x128xf32, #tpu.memory_space<vmem>>, vector<1x1x128xf32>
    %233 = vector.shape_cast %232 : vector<1x1x128xf32> to vector<1x128xf32>
    %234 = vector.broadcast %233 : vector<1x128xf32> to vector<32x128xf32>
    %235 = arith.mulf %231, %234 : vector<32x128xf32>
    %236 = vector.extract_strided_slice %200 {offsets = [0, 7], sizes = [32, 121], strides = [1, 1]} : vector<32x128xf32> to vector<32x121xf32>
    %cst_134 = arith.constant 0.000000e+00 : f32
    %237 = vector.broadcast %cst_134 : f32 to vector<32x7xf32>
    %238 = tpu.concatenate %236, %237 in 1 : vector<32x121xf32>, vector<32x7xf32> -> vector<32x128xf32>
    %c6_135 = arith.constant 6 : index
    %c0_136 = arith.constant 0 : index
    %c0_137 = arith.constant 0 : index
    %239 = vector.load %arg4[%c6_135, %c0_136, %c0_137] : memref<9x1x128xf32, #tpu.memory_space<vmem>>, vector<1x1x128xf32>
    %240 = vector.shape_cast %239 : vector<1x1x128xf32> to vector<1x128xf32>
    %241 = vector.broadcast %240 : vector<1x128xf32> to vector<32x128xf32>
    %242 = arith.mulf %238, %241 : vector<32x128xf32>
    %243 = vector.extract_strided_slice %200 {offsets = [0, 8], sizes = [32, 120], strides = [1, 1]} : vector<32x128xf32> to vector<32x120xf32>
    %cst_138 = arith.constant 0.000000e+00 : f32
    %244 = vector.broadcast %cst_138 : f32 to vector<32x8xf32>
    %245 = tpu.concatenate %243, %244 in 1 : vector<32x120xf32>, vector<32x8xf32> -> vector<32x128xf32>
    %c7_139 = arith.constant 7 : index
    %c0_140 = arith.constant 0 : index
    %c0_141 = arith.constant 0 : index
    %246 = vector.load %arg4[%c7_139, %c0_140, %c0_141] : memref<9x1x128xf32, #tpu.memory_space<vmem>>, vector<1x1x128xf32>
    %247 = vector.shape_cast %246 : vector<1x1x128xf32> to vector<1x128xf32>
    %248 = vector.broadcast %247 : vector<1x128xf32> to vector<32x128xf32>
    %249 = arith.mulf %245, %248 : vector<32x128xf32>
    %250 = vector.extract_strided_slice %200 {offsets = [0, 9], sizes = [32, 119], strides = [1, 1]} : vector<32x128xf32> to vector<32x119xf32>
    %cst_142 = arith.constant 0.000000e+00 : f32
    %251 = vector.broadcast %cst_142 : f32 to vector<32x9xf32>
    %252 = tpu.concatenate %250, %251 in 1 : vector<32x119xf32>, vector<32x9xf32> -> vector<32x128xf32>
    %c8_143 = arith.constant 8 : index
    %c0_144 = arith.constant 0 : index
    %c0_145 = arith.constant 0 : index
    %253 = vector.load %arg4[%c8_143, %c0_144, %c0_145] : memref<9x1x128xf32, #tpu.memory_space<vmem>>, vector<1x1x128xf32>
    %254 = vector.shape_cast %253 : vector<1x1x128xf32> to vector<1x128xf32>
    %255 = vector.broadcast %254 : vector<1x128xf32> to vector<32x128xf32>
    %256 = arith.mulf %252, %255 : vector<32x128xf32>
    %257 = tpu.concatenate %207, %214, %221, %228, %200, %235, %242, %249, %256 in 0 : vector<32x128xf32>, vector<32x128xf32>, vector<32x128xf32>, vector<32x128xf32>, vector<32x128xf32>, vector<32x128xf32>, vector<32x128xf32>, vector<32x128xf32>, vector<32x128xf32> -> vector<288x128xf32>
    %c3_146 = arith.constant 3 : index
    %c0_147 = arith.constant 0 : index
    %c0_148 = arith.constant 0 : index
    %258 = vector.load %arg2[%c3_146, %c0_147, %c0_148] : memref<7x32x288xf32, #tpu.memory_space<vmem>>, vector<1x32x288xf32>
    %259 = vector.shape_cast %258 : vector<1x32x288xf32> to vector<32x288xf32>
    %cst_149 = arith.constant dense<0.000000e+00> : vector<32x128xf32>
    %260 = tpu.matmul %259, %257, %cst_149 {dimension_numbers = #tpu.dot_dimension_numbers<[1], [0], [0], [1], [0, 0, 1, 1], [], []>} : vector<32x288xf32>, vector<288x128xf32>, vector<32x128xf32> -> vector<32x128xf32>
    %c3_150 = arith.constant 3 : index
    %c0_151 = arith.constant 0 : index
    %c0_152 = arith.constant 0 : index
    %261 = vector.load %arg3[%c3_150, %c0_151, %c0_152] : memref<7x32x1xf32, #tpu.memory_space<vmem>>, vector<1x32x1xf32>
    %262 = vector.shape_cast %261 : vector<1x32x1xf32> to vector<32x1xf32>
    %263 = vector.broadcast %262 : vector<32x1xf32> to vector<32x128xf32>
    %264 = arith.addf %260, %263 : vector<32x128xf32>
    %cst_153 = arith.constant 0.000000e+00 : f32
    %265 = vector.broadcast %cst_153 : f32 to vector<32x128xf32>
    %266 = arith.maximumf %264, %265 : vector<32x128xf32>
    %cst_154 = arith.constant 0.000000e+00 : f32
    %267 = vector.broadcast %cst_154 : f32 to vector<32x9xf32>
    %268 = vector.extract_strided_slice %266 {offsets = [0, 0], sizes = [32, 119], strides = [1, 1]} : vector<32x128xf32> to vector<32x119xf32>
    %269 = tpu.concatenate %267, %268 in 1 : vector<32x9xf32>, vector<32x119xf32> -> vector<32x128xf32>
    %c0_155 = arith.constant 0 : index
    %c0_156 = arith.constant 0 : index
    %c0_157 = arith.constant 0 : index
    %270 = vector.load %arg4[%c0_155, %c0_156, %c0_157] : memref<9x1x128xf32, #tpu.memory_space<vmem>>, vector<1x1x128xf32>
    %271 = vector.shape_cast %270 : vector<1x1x128xf32> to vector<1x128xf32>
    %272 = vector.broadcast %271 : vector<1x128xf32> to vector<32x128xf32>
    %273 = arith.mulf %269, %272 : vector<32x128xf32>
    %cst_158 = arith.constant 0.000000e+00 : f32
    %274 = vector.broadcast %cst_158 : f32 to vector<32x8xf32>
    %275 = vector.extract_strided_slice %266 {offsets = [0, 0], sizes = [32, 120], strides = [1, 1]} : vector<32x128xf32> to vector<32x120xf32>
    %276 = tpu.concatenate %274, %275 in 1 : vector<32x8xf32>, vector<32x120xf32> -> vector<32x128xf32>
    %c1_159 = arith.constant 1 : index
    %c0_160 = arith.constant 0 : index
    %c0_161 = arith.constant 0 : index
    %277 = vector.load %arg4[%c1_159, %c0_160, %c0_161] : memref<9x1x128xf32, #tpu.memory_space<vmem>>, vector<1x1x128xf32>
    %278 = vector.shape_cast %277 : vector<1x1x128xf32> to vector<1x128xf32>
    %279 = vector.broadcast %278 : vector<1x128xf32> to vector<32x128xf32>
    %280 = arith.mulf %276, %279 : vector<32x128xf32>
    %cst_162 = arith.constant 0.000000e+00 : f32
    %281 = vector.broadcast %cst_162 : f32 to vector<32x7xf32>
    %282 = vector.extract_strided_slice %266 {offsets = [0, 0], sizes = [32, 121], strides = [1, 1]} : vector<32x128xf32> to vector<32x121xf32>
    %283 = tpu.concatenate %281, %282 in 1 : vector<32x7xf32>, vector<32x121xf32> -> vector<32x128xf32>
    %c2_163 = arith.constant 2 : index
    %c0_164 = arith.constant 0 : index
    %c0_165 = arith.constant 0 : index
    %284 = vector.load %arg4[%c2_163, %c0_164, %c0_165] : memref<9x1x128xf32, #tpu.memory_space<vmem>>, vector<1x1x128xf32>
    %285 = vector.shape_cast %284 : vector<1x1x128xf32> to vector<1x128xf32>
    %286 = vector.broadcast %285 : vector<1x128xf32> to vector<32x128xf32>
    %287 = arith.mulf %283, %286 : vector<32x128xf32>
    %cst_166 = arith.constant 0.000000e+00 : f32
    %288 = vector.broadcast %cst_166 : f32 to vector<32x1xf32>
    %289 = vector.extract_strided_slice %266 {offsets = [0, 0], sizes = [32, 127], strides = [1, 1]} : vector<32x128xf32> to vector<32x127xf32>
    %290 = tpu.concatenate %288, %289 in 1 : vector<32x1xf32>, vector<32x127xf32> -> vector<32x128xf32>
    %c3_167 = arith.constant 3 : index
    %c0_168 = arith.constant 0 : index
    %c0_169 = arith.constant 0 : index
    %291 = vector.load %arg4[%c3_167, %c0_168, %c0_169] : memref<9x1x128xf32, #tpu.memory_space<vmem>>, vector<1x1x128xf32>
    %292 = vector.shape_cast %291 : vector<1x1x128xf32> to vector<1x128xf32>
    %293 = vector.broadcast %292 : vector<1x128xf32> to vector<32x128xf32>
    %294 = arith.mulf %290, %293 : vector<32x128xf32>
    %295 = vector.extract_strided_slice %266 {offsets = [0, 1], sizes = [32, 127], strides = [1, 1]} : vector<32x128xf32> to vector<32x127xf32>
    %cst_170 = arith.constant 0.000000e+00 : f32
    %296 = vector.broadcast %cst_170 : f32 to vector<32x1xf32>
    %297 = tpu.concatenate %295, %296 in 1 : vector<32x127xf32>, vector<32x1xf32> -> vector<32x128xf32>
    %c5_171 = arith.constant 5 : index
    %c0_172 = arith.constant 0 : index
    %c0_173 = arith.constant 0 : index
    %298 = vector.load %arg4[%c5_171, %c0_172, %c0_173] : memref<9x1x128xf32, #tpu.memory_space<vmem>>, vector<1x1x128xf32>
    %299 = vector.shape_cast %298 : vector<1x1x128xf32> to vector<1x128xf32>
    %300 = vector.broadcast %299 : vector<1x128xf32> to vector<32x128xf32>
    %301 = arith.mulf %297, %300 : vector<32x128xf32>
    %302 = vector.extract_strided_slice %266 {offsets = [0, 7], sizes = [32, 121], strides = [1, 1]} : vector<32x128xf32> to vector<32x121xf32>
    %cst_174 = arith.constant 0.000000e+00 : f32
    %303 = vector.broadcast %cst_174 : f32 to vector<32x7xf32>
    %304 = tpu.concatenate %302, %303 in 1 : vector<32x121xf32>, vector<32x7xf32> -> vector<32x128xf32>
    %c6_175 = arith.constant 6 : index
    %c0_176 = arith.constant 0 : index
    %c0_177 = arith.constant 0 : index
    %305 = vector.load %arg4[%c6_175, %c0_176, %c0_177] : memref<9x1x128xf32, #tpu.memory_space<vmem>>, vector<1x1x128xf32>
    %306 = vector.shape_cast %305 : vector<1x1x128xf32> to vector<1x128xf32>
    %307 = vector.broadcast %306 : vector<1x128xf32> to vector<32x128xf32>
    %308 = arith.mulf %304, %307 : vector<32x128xf32>
    %309 = vector.extract_strided_slice %266 {offsets = [0, 8], sizes = [32, 120], strides = [1, 1]} : vector<32x128xf32> to vector<32x120xf32>
    %cst_178 = arith.constant 0.000000e+00 : f32
    %310 = vector.broadcast %cst_178 : f32 to vector<32x8xf32>
    %311 = tpu.concatenate %309, %310 in 1 : vector<32x120xf32>, vector<32x8xf32> -> vector<32x128xf32>
    %c7_179 = arith.constant 7 : index
    %c0_180 = arith.constant 0 : index
    %c0_181 = arith.constant 0 : index
    %312 = vector.load %arg4[%c7_179, %c0_180, %c0_181] : memref<9x1x128xf32, #tpu.memory_space<vmem>>, vector<1x1x128xf32>
    %313 = vector.shape_cast %312 : vector<1x1x128xf32> to vector<1x128xf32>
    %314 = vector.broadcast %313 : vector<1x128xf32> to vector<32x128xf32>
    %315 = arith.mulf %311, %314 : vector<32x128xf32>
    %316 = vector.extract_strided_slice %266 {offsets = [0, 9], sizes = [32, 119], strides = [1, 1]} : vector<32x128xf32> to vector<32x119xf32>
    %cst_182 = arith.constant 0.000000e+00 : f32
    %317 = vector.broadcast %cst_182 : f32 to vector<32x9xf32>
    %318 = tpu.concatenate %316, %317 in 1 : vector<32x119xf32>, vector<32x9xf32> -> vector<32x128xf32>
    %c8_183 = arith.constant 8 : index
    %c0_184 = arith.constant 0 : index
    %c0_185 = arith.constant 0 : index
    %319 = vector.load %arg4[%c8_183, %c0_184, %c0_185] : memref<9x1x128xf32, #tpu.memory_space<vmem>>, vector<1x1x128xf32>
    %320 = vector.shape_cast %319 : vector<1x1x128xf32> to vector<1x128xf32>
    %321 = vector.broadcast %320 : vector<1x128xf32> to vector<32x128xf32>
    %322 = arith.mulf %318, %321 : vector<32x128xf32>
    %323 = tpu.concatenate %273, %280, %287, %294, %266, %301, %308, %315, %322 in 0 : vector<32x128xf32>, vector<32x128xf32>, vector<32x128xf32>, vector<32x128xf32>, vector<32x128xf32>, vector<32x128xf32>, vector<32x128xf32>, vector<32x128xf32>, vector<32x128xf32> -> vector<288x128xf32>
    %c4 = arith.constant 4 : index
    %c0_186 = arith.constant 0 : index
    %c0_187 = arith.constant 0 : index
    %324 = vector.load %arg2[%c4, %c0_186, %c0_187] : memref<7x32x288xf32, #tpu.memory_space<vmem>>, vector<1x32x288xf32>
    %325 = vector.shape_cast %324 : vector<1x32x288xf32> to vector<32x288xf32>
    %cst_188 = arith.constant dense<0.000000e+00> : vector<32x128xf32>
    %326 = tpu.matmul %325, %323, %cst_188 {dimension_numbers = #tpu.dot_dimension_numbers<[1], [0], [0], [1], [0, 0, 1, 1], [], []>} : vector<32x288xf32>, vector<288x128xf32>, vector<32x128xf32> -> vector<32x128xf32>
    %c4_189 = arith.constant 4 : index
    %c0_190 = arith.constant 0 : index
    %c0_191 = arith.constant 0 : index
    %327 = vector.load %arg3[%c4_189, %c0_190, %c0_191] : memref<7x32x1xf32, #tpu.memory_space<vmem>>, vector<1x32x1xf32>
    %328 = vector.shape_cast %327 : vector<1x32x1xf32> to vector<32x1xf32>
    %329 = vector.broadcast %328 : vector<32x1xf32> to vector<32x128xf32>
    %330 = arith.addf %326, %329 : vector<32x128xf32>
    %331 = arith.addf %330, %200 : vector<32x128xf32>
    %cst_192 = arith.constant 0.000000e+00 : f32
    %332 = vector.broadcast %cst_192 : f32 to vector<32x128xf32>
    %333 = arith.maximumf %331, %332 : vector<32x128xf32>
    %cst_193 = arith.constant 0.000000e+00 : f32
    %334 = vector.broadcast %cst_193 : f32 to vector<32x9xf32>
    %335 = vector.extract_strided_slice %333 {offsets = [0, 0], sizes = [32, 119], strides = [1, 1]} : vector<32x128xf32> to vector<32x119xf32>
    %336 = tpu.concatenate %334, %335 in 1 : vector<32x9xf32>, vector<32x119xf32> -> vector<32x128xf32>
    %c0_194 = arith.constant 0 : index
    %c0_195 = arith.constant 0 : index
    %c0_196 = arith.constant 0 : index
    %337 = vector.load %arg4[%c0_194, %c0_195, %c0_196] : memref<9x1x128xf32, #tpu.memory_space<vmem>>, vector<1x1x128xf32>
    %338 = vector.shape_cast %337 : vector<1x1x128xf32> to vector<1x128xf32>
    %339 = vector.broadcast %338 : vector<1x128xf32> to vector<32x128xf32>
    %340 = arith.mulf %336, %339 : vector<32x128xf32>
    %cst_197 = arith.constant 0.000000e+00 : f32
    %341 = vector.broadcast %cst_197 : f32 to vector<32x8xf32>
    %342 = vector.extract_strided_slice %333 {offsets = [0, 0], sizes = [32, 120], strides = [1, 1]} : vector<32x128xf32> to vector<32x120xf32>
    %343 = tpu.concatenate %341, %342 in 1 : vector<32x8xf32>, vector<32x120xf32> -> vector<32x128xf32>
    %c1_198 = arith.constant 1 : index
    %c0_199 = arith.constant 0 : index
    %c0_200 = arith.constant 0 : index
    %344 = vector.load %arg4[%c1_198, %c0_199, %c0_200] : memref<9x1x128xf32, #tpu.memory_space<vmem>>, vector<1x1x128xf32>
    %345 = vector.shape_cast %344 : vector<1x1x128xf32> to vector<1x128xf32>
    %346 = vector.broadcast %345 : vector<1x128xf32> to vector<32x128xf32>
    %347 = arith.mulf %343, %346 : vector<32x128xf32>
    %cst_201 = arith.constant 0.000000e+00 : f32
    %348 = vector.broadcast %cst_201 : f32 to vector<32x7xf32>
    %349 = vector.extract_strided_slice %333 {offsets = [0, 0], sizes = [32, 121], strides = [1, 1]} : vector<32x128xf32> to vector<32x121xf32>
    %350 = tpu.concatenate %348, %349 in 1 : vector<32x7xf32>, vector<32x121xf32> -> vector<32x128xf32>
    %c2_202 = arith.constant 2 : index
    %c0_203 = arith.constant 0 : index
    %c0_204 = arith.constant 0 : index
    %351 = vector.load %arg4[%c2_202, %c0_203, %c0_204] : memref<9x1x128xf32, #tpu.memory_space<vmem>>, vector<1x1x128xf32>
    %352 = vector.shape_cast %351 : vector<1x1x128xf32> to vector<1x128xf32>
    %353 = vector.broadcast %352 : vector<1x128xf32> to vector<32x128xf32>
    %354 = arith.mulf %350, %353 : vector<32x128xf32>
    %cst_205 = arith.constant 0.000000e+00 : f32
    %355 = vector.broadcast %cst_205 : f32 to vector<32x1xf32>
    %356 = vector.extract_strided_slice %333 {offsets = [0, 0], sizes = [32, 127], strides = [1, 1]} : vector<32x128xf32> to vector<32x127xf32>
    %357 = tpu.concatenate %355, %356 in 1 : vector<32x1xf32>, vector<32x127xf32> -> vector<32x128xf32>
    %c3_206 = arith.constant 3 : index
    %c0_207 = arith.constant 0 : index
    %c0_208 = arith.constant 0 : index
    %358 = vector.load %arg4[%c3_206, %c0_207, %c0_208] : memref<9x1x128xf32, #tpu.memory_space<vmem>>, vector<1x1x128xf32>
    %359 = vector.shape_cast %358 : vector<1x1x128xf32> to vector<1x128xf32>
    %360 = vector.broadcast %359 : vector<1x128xf32> to vector<32x128xf32>
    %361 = arith.mulf %357, %360 : vector<32x128xf32>
    %362 = vector.extract_strided_slice %333 {offsets = [0, 1], sizes = [32, 127], strides = [1, 1]} : vector<32x128xf32> to vector<32x127xf32>
    %cst_209 = arith.constant 0.000000e+00 : f32
    %363 = vector.broadcast %cst_209 : f32 to vector<32x1xf32>
    %364 = tpu.concatenate %362, %363 in 1 : vector<32x127xf32>, vector<32x1xf32> -> vector<32x128xf32>
    %c5_210 = arith.constant 5 : index
    %c0_211 = arith.constant 0 : index
    %c0_212 = arith.constant 0 : index
    %365 = vector.load %arg4[%c5_210, %c0_211, %c0_212] : memref<9x1x128xf32, #tpu.memory_space<vmem>>, vector<1x1x128xf32>
    %366 = vector.shape_cast %365 : vector<1x1x128xf32> to vector<1x128xf32>
    %367 = vector.broadcast %366 : vector<1x128xf32> to vector<32x128xf32>
    %368 = arith.mulf %364, %367 : vector<32x128xf32>
    %369 = vector.extract_strided_slice %333 {offsets = [0, 7], sizes = [32, 121], strides = [1, 1]} : vector<32x128xf32> to vector<32x121xf32>
    %cst_213 = arith.constant 0.000000e+00 : f32
    %370 = vector.broadcast %cst_213 : f32 to vector<32x7xf32>
    %371 = tpu.concatenate %369, %370 in 1 : vector<32x121xf32>, vector<32x7xf32> -> vector<32x128xf32>
    %c6_214 = arith.constant 6 : index
    %c0_215 = arith.constant 0 : index
    %c0_216 = arith.constant 0 : index
    %372 = vector.load %arg4[%c6_214, %c0_215, %c0_216] : memref<9x1x128xf32, #tpu.memory_space<vmem>>, vector<1x1x128xf32>
    %373 = vector.shape_cast %372 : vector<1x1x128xf32> to vector<1x128xf32>
    %374 = vector.broadcast %373 : vector<1x128xf32> to vector<32x128xf32>
    %375 = arith.mulf %371, %374 : vector<32x128xf32>
    %376 = vector.extract_strided_slice %333 {offsets = [0, 8], sizes = [32, 120], strides = [1, 1]} : vector<32x128xf32> to vector<32x120xf32>
    %cst_217 = arith.constant 0.000000e+00 : f32
    %377 = vector.broadcast %cst_217 : f32 to vector<32x8xf32>
    %378 = tpu.concatenate %376, %377 in 1 : vector<32x120xf32>, vector<32x8xf32> -> vector<32x128xf32>
    %c7_218 = arith.constant 7 : index
    %c0_219 = arith.constant 0 : index
    %c0_220 = arith.constant 0 : index
    %379 = vector.load %arg4[%c7_218, %c0_219, %c0_220] : memref<9x1x128xf32, #tpu.memory_space<vmem>>, vector<1x1x128xf32>
    %380 = vector.shape_cast %379 : vector<1x1x128xf32> to vector<1x128xf32>
    %381 = vector.broadcast %380 : vector<1x128xf32> to vector<32x128xf32>
    %382 = arith.mulf %378, %381 : vector<32x128xf32>
    %383 = vector.extract_strided_slice %333 {offsets = [0, 9], sizes = [32, 119], strides = [1, 1]} : vector<32x128xf32> to vector<32x119xf32>
    %cst_221 = arith.constant 0.000000e+00 : f32
    %384 = vector.broadcast %cst_221 : f32 to vector<32x9xf32>
    %385 = tpu.concatenate %383, %384 in 1 : vector<32x119xf32>, vector<32x9xf32> -> vector<32x128xf32>
    %c8_222 = arith.constant 8 : index
    %c0_223 = arith.constant 0 : index
    %c0_224 = arith.constant 0 : index
    %386 = vector.load %arg4[%c8_222, %c0_223, %c0_224] : memref<9x1x128xf32, #tpu.memory_space<vmem>>, vector<1x1x128xf32>
    %387 = vector.shape_cast %386 : vector<1x1x128xf32> to vector<1x128xf32>
    %388 = vector.broadcast %387 : vector<1x128xf32> to vector<32x128xf32>
    %389 = arith.mulf %385, %388 : vector<32x128xf32>
    %390 = tpu.concatenate %340, %347, %354, %361, %333, %368, %375, %382, %389 in 0 : vector<32x128xf32>, vector<32x128xf32>, vector<32x128xf32>, vector<32x128xf32>, vector<32x128xf32>, vector<32x128xf32>, vector<32x128xf32>, vector<32x128xf32>, vector<32x128xf32> -> vector<288x128xf32>
    %c5_225 = arith.constant 5 : index
    %c0_226 = arith.constant 0 : index
    %c0_227 = arith.constant 0 : index
    %391 = vector.load %arg2[%c5_225, %c0_226, %c0_227] : memref<7x32x288xf32, #tpu.memory_space<vmem>>, vector<1x32x288xf32>
    %392 = vector.shape_cast %391 : vector<1x32x288xf32> to vector<32x288xf32>
    %cst_228 = arith.constant dense<0.000000e+00> : vector<32x128xf32>
    %393 = tpu.matmul %392, %390, %cst_228 {dimension_numbers = #tpu.dot_dimension_numbers<[1], [0], [0], [1], [0, 0, 1, 1], [], []>} : vector<32x288xf32>, vector<288x128xf32>, vector<32x128xf32> -> vector<32x128xf32>
    %c5_229 = arith.constant 5 : index
    %c0_230 = arith.constant 0 : index
    %c0_231 = arith.constant 0 : index
    %394 = vector.load %arg3[%c5_229, %c0_230, %c0_231] : memref<7x32x1xf32, #tpu.memory_space<vmem>>, vector<1x32x1xf32>
    %395 = vector.shape_cast %394 : vector<1x32x1xf32> to vector<32x1xf32>
    %396 = vector.broadcast %395 : vector<32x1xf32> to vector<32x128xf32>
    %397 = arith.addf %393, %396 : vector<32x128xf32>
    %cst_232 = arith.constant 0.000000e+00 : f32
    %398 = vector.broadcast %cst_232 : f32 to vector<32x128xf32>
    %399 = arith.maximumf %397, %398 : vector<32x128xf32>
    %cst_233 = arith.constant 0.000000e+00 : f32
    %400 = vector.broadcast %cst_233 : f32 to vector<32x9xf32>
    %401 = vector.extract_strided_slice %399 {offsets = [0, 0], sizes = [32, 119], strides = [1, 1]} : vector<32x128xf32> to vector<32x119xf32>
    %402 = tpu.concatenate %400, %401 in 1 : vector<32x9xf32>, vector<32x119xf32> -> vector<32x128xf32>
    %c0_234 = arith.constant 0 : index
    %c0_235 = arith.constant 0 : index
    %c0_236 = arith.constant 0 : index
    %403 = vector.load %arg4[%c0_234, %c0_235, %c0_236] : memref<9x1x128xf32, #tpu.memory_space<vmem>>, vector<1x1x128xf32>
    %404 = vector.shape_cast %403 : vector<1x1x128xf32> to vector<1x128xf32>
    %405 = vector.broadcast %404 : vector<1x128xf32> to vector<32x128xf32>
    %406 = arith.mulf %402, %405 : vector<32x128xf32>
    %cst_237 = arith.constant 0.000000e+00 : f32
    %407 = vector.broadcast %cst_237 : f32 to vector<32x8xf32>
    %408 = vector.extract_strided_slice %399 {offsets = [0, 0], sizes = [32, 120], strides = [1, 1]} : vector<32x128xf32> to vector<32x120xf32>
    %409 = tpu.concatenate %407, %408 in 1 : vector<32x8xf32>, vector<32x120xf32> -> vector<32x128xf32>
    %c1_238 = arith.constant 1 : index
    %c0_239 = arith.constant 0 : index
    %c0_240 = arith.constant 0 : index
    %410 = vector.load %arg4[%c1_238, %c0_239, %c0_240] : memref<9x1x128xf32, #tpu.memory_space<vmem>>, vector<1x1x128xf32>
    %411 = vector.shape_cast %410 : vector<1x1x128xf32> to vector<1x128xf32>
    %412 = vector.broadcast %411 : vector<1x128xf32> to vector<32x128xf32>
    %413 = arith.mulf %409, %412 : vector<32x128xf32>
    %cst_241 = arith.constant 0.000000e+00 : f32
    %414 = vector.broadcast %cst_241 : f32 to vector<32x7xf32>
    %415 = vector.extract_strided_slice %399 {offsets = [0, 0], sizes = [32, 121], strides = [1, 1]} : vector<32x128xf32> to vector<32x121xf32>
    %416 = tpu.concatenate %414, %415 in 1 : vector<32x7xf32>, vector<32x121xf32> -> vector<32x128xf32>
    %c2_242 = arith.constant 2 : index
    %c0_243 = arith.constant 0 : index
    %c0_244 = arith.constant 0 : index
    %417 = vector.load %arg4[%c2_242, %c0_243, %c0_244] : memref<9x1x128xf32, #tpu.memory_space<vmem>>, vector<1x1x128xf32>
    %418 = vector.shape_cast %417 : vector<1x1x128xf32> to vector<1x128xf32>
    %419 = vector.broadcast %418 : vector<1x128xf32> to vector<32x128xf32>
    %420 = arith.mulf %416, %419 : vector<32x128xf32>
    %cst_245 = arith.constant 0.000000e+00 : f32
    %421 = vector.broadcast %cst_245 : f32 to vector<32x1xf32>
    %422 = vector.extract_strided_slice %399 {offsets = [0, 0], sizes = [32, 127], strides = [1, 1]} : vector<32x128xf32> to vector<32x127xf32>
    %423 = tpu.concatenate %421, %422 in 1 : vector<32x1xf32>, vector<32x127xf32> -> vector<32x128xf32>
    %c3_246 = arith.constant 3 : index
    %c0_247 = arith.constant 0 : index
    %c0_248 = arith.constant 0 : index
    %424 = vector.load %arg4[%c3_246, %c0_247, %c0_248] : memref<9x1x128xf32, #tpu.memory_space<vmem>>, vector<1x1x128xf32>
    %425 = vector.shape_cast %424 : vector<1x1x128xf32> to vector<1x128xf32>
    %426 = vector.broadcast %425 : vector<1x128xf32> to vector<32x128xf32>
    %427 = arith.mulf %423, %426 : vector<32x128xf32>
    %428 = vector.extract_strided_slice %399 {offsets = [0, 1], sizes = [32, 127], strides = [1, 1]} : vector<32x128xf32> to vector<32x127xf32>
    %cst_249 = arith.constant 0.000000e+00 : f32
    %429 = vector.broadcast %cst_249 : f32 to vector<32x1xf32>
    %430 = tpu.concatenate %428, %429 in 1 : vector<32x127xf32>, vector<32x1xf32> -> vector<32x128xf32>
    %c5_250 = arith.constant 5 : index
    %c0_251 = arith.constant 0 : index
    %c0_252 = arith.constant 0 : index
    %431 = vector.load %arg4[%c5_250, %c0_251, %c0_252] : memref<9x1x128xf32, #tpu.memory_space<vmem>>, vector<1x1x128xf32>
    %432 = vector.shape_cast %431 : vector<1x1x128xf32> to vector<1x128xf32>
    %433 = vector.broadcast %432 : vector<1x128xf32> to vector<32x128xf32>
    %434 = arith.mulf %430, %433 : vector<32x128xf32>
    %435 = vector.extract_strided_slice %399 {offsets = [0, 7], sizes = [32, 121], strides = [1, 1]} : vector<32x128xf32> to vector<32x121xf32>
    %cst_253 = arith.constant 0.000000e+00 : f32
    %436 = vector.broadcast %cst_253 : f32 to vector<32x7xf32>
    %437 = tpu.concatenate %435, %436 in 1 : vector<32x121xf32>, vector<32x7xf32> -> vector<32x128xf32>
    %c6_254 = arith.constant 6 : index
    %c0_255 = arith.constant 0 : index
    %c0_256 = arith.constant 0 : index
    %438 = vector.load %arg4[%c6_254, %c0_255, %c0_256] : memref<9x1x128xf32, #tpu.memory_space<vmem>>, vector<1x1x128xf32>
    %439 = vector.shape_cast %438 : vector<1x1x128xf32> to vector<1x128xf32>
    %440 = vector.broadcast %439 : vector<1x128xf32> to vector<32x128xf32>
    %441 = arith.mulf %437, %440 : vector<32x128xf32>
    %442 = vector.extract_strided_slice %399 {offsets = [0, 8], sizes = [32, 120], strides = [1, 1]} : vector<32x128xf32> to vector<32x120xf32>
    %cst_257 = arith.constant 0.000000e+00 : f32
    %443 = vector.broadcast %cst_257 : f32 to vector<32x8xf32>
    %444 = tpu.concatenate %442, %443 in 1 : vector<32x120xf32>, vector<32x8xf32> -> vector<32x128xf32>
    %c7_258 = arith.constant 7 : index
    %c0_259 = arith.constant 0 : index
    %c0_260 = arith.constant 0 : index
    %445 = vector.load %arg4[%c7_258, %c0_259, %c0_260] : memref<9x1x128xf32, #tpu.memory_space<vmem>>, vector<1x1x128xf32>
    %446 = vector.shape_cast %445 : vector<1x1x128xf32> to vector<1x128xf32>
    %447 = vector.broadcast %446 : vector<1x128xf32> to vector<32x128xf32>
    %448 = arith.mulf %444, %447 : vector<32x128xf32>
    %449 = vector.extract_strided_slice %399 {offsets = [0, 9], sizes = [32, 119], strides = [1, 1]} : vector<32x128xf32> to vector<32x119xf32>
    %cst_261 = arith.constant 0.000000e+00 : f32
    %450 = vector.broadcast %cst_261 : f32 to vector<32x9xf32>
    %451 = tpu.concatenate %449, %450 in 1 : vector<32x119xf32>, vector<32x9xf32> -> vector<32x128xf32>
    %c8_262 = arith.constant 8 : index
    %c0_263 = arith.constant 0 : index
    %c0_264 = arith.constant 0 : index
    %452 = vector.load %arg4[%c8_262, %c0_263, %c0_264] : memref<9x1x128xf32, #tpu.memory_space<vmem>>, vector<1x1x128xf32>
    %453 = vector.shape_cast %452 : vector<1x1x128xf32> to vector<1x128xf32>
    %454 = vector.broadcast %453 : vector<1x128xf32> to vector<32x128xf32>
    %455 = arith.mulf %451, %454 : vector<32x128xf32>
    %456 = tpu.concatenate %406, %413, %420, %427, %399, %434, %441, %448, %455 in 0 : vector<32x128xf32>, vector<32x128xf32>, vector<32x128xf32>, vector<32x128xf32>, vector<32x128xf32>, vector<32x128xf32>, vector<32x128xf32>, vector<32x128xf32>, vector<32x128xf32> -> vector<288x128xf32>
    %c6_265 = arith.constant 6 : index
    %c0_266 = arith.constant 0 : index
    %c0_267 = arith.constant 0 : index
    %457 = vector.load %arg2[%c6_265, %c0_266, %c0_267] : memref<7x32x288xf32, #tpu.memory_space<vmem>>, vector<1x32x288xf32>
    %458 = vector.shape_cast %457 : vector<1x32x288xf32> to vector<32x288xf32>
    %cst_268 = arith.constant dense<0.000000e+00> : vector<32x128xf32>
    %459 = tpu.matmul %458, %456, %cst_268 {dimension_numbers = #tpu.dot_dimension_numbers<[1], [0], [0], [1], [0, 0, 1, 1], [], []>} : vector<32x288xf32>, vector<288x128xf32>, vector<32x128xf32> -> vector<32x128xf32>
    %c6_269 = arith.constant 6 : index
    %c0_270 = arith.constant 0 : index
    %c0_271 = arith.constant 0 : index
    %460 = vector.load %arg3[%c6_269, %c0_270, %c0_271] : memref<7x32x1xf32, #tpu.memory_space<vmem>>, vector<1x32x1xf32>
    %461 = vector.shape_cast %460 : vector<1x32x1xf32> to vector<32x1xf32>
    %462 = vector.broadcast %461 : vector<32x1xf32> to vector<32x128xf32>
    %463 = arith.addf %459, %462 : vector<32x128xf32>
    %464 = arith.addf %463, %333 : vector<32x128xf32>
    %cst_272 = arith.constant 0.000000e+00 : f32
    %465 = vector.broadcast %cst_272 : f32 to vector<32x128xf32>
    %466 = arith.maximumf %464, %465 : vector<32x128xf32>
    %c0_273 = arith.constant 0 : index
    %c0_274 = arith.constant 0 : index
    %c0_275 = arith.constant 0 : index
    %467 = vector.load %arg5[%c0_273, %c0_274, %c0_275] : memref<1x32x128xf32, #tpu.memory_space<vmem>>, vector<1x32x128xf32>
    %468 = vector.shape_cast %467 : vector<1x32x128xf32> to vector<32x128xf32>
    %469 = vector.shape_cast %466 : vector<32x128xf32> to vector<1x32x128xf32>
    tpu.vector_store %arg5[%c0_273, %c0_274, %c0_275], %469 {strides = array<i32>} : memref<1x32x128xf32, #tpu.memory_space<vmem>>, vector<1x32x128xf32>,
    return
  }
  func.func @transform_0(%arg0: i32) -> (i32, i32, i32) {
    %c0_i32 = arith.constant 0 : i32
    %c0_i32_0 = arith.constant 0 : i32
    %c0_i32_1 = arith.constant 0 : i32
    return %arg0, %c0_i32, %c0_i32_0 : i32, i32, i32
  }
  func.func @transform_1(%arg0: i32) -> (i32, i32, i32) {
    %c0_i32 = arith.constant 0 : i32
    %c0_i32_0 = arith.constant 0 : i32
    %c0_i32_1 = arith.constant 0 : i32
    %c0_i32_2 = arith.constant 0 : i32
    return %c0_i32, %c0_i32_0, %c0_i32_1 : i32, i32, i32
  }
  func.func @transform_2(%arg0: i32) -> (i32, i32, i32) {
    %c0_i32 = arith.constant 0 : i32
    %c0_i32_0 = arith.constant 0 : i32
    %c0_i32_1 = arith.constant 0 : i32
    %c0_i32_2 = arith.constant 0 : i32
    return %c0_i32, %c0_i32_0, %c0_i32_1 : i32, i32, i32
  }
  func.func @transform_3(%arg0: i32) -> (i32, i32, i32) {
    %c0_i32 = arith.constant 0 : i32
    %c0_i32_0 = arith.constant 0 : i32
    %c0_i32_1 = arith.constant 0 : i32
    %c0_i32_2 = arith.constant 0 : i32
    return %c0_i32, %c0_i32_0, %c0_i32_1 : i32, i32, i32
  }
  func.func @transform_4(%arg0: i32) -> (i32, i32, i32) {
    %c0_i32 = arith.constant 0 : i32
    %c0_i32_0 = arith.constant 0 : i32
    %c0_i32_1 = arith.constant 0 : i32
    return %arg0, %c0_i32, %c0_i32_0 : i32, i32, i32
  }
}

</mosaic_0001>

<bundles_post_ra>
// kernel: tpu_custom_call.1
= control target key start
LH: loop header
LB: loop body
LE: loop exit
PB: predicated region body
PF: predicated region fallthrough
CT: control target
= control target key end

     0   :  { %9 = vsyncpa [#allocation3], 0  ;;  %s4887_s0 = inlined_call_operand.vmem [shape: f32[1,32,128], index: 0, kind: input, shape index: {}]   ;;  %s4888_s1 = inlined_call_operand.hbm [shape: f32[7,32,288], index: 1, kind: input, shape index: {}]   ;;  %s4889_s2 = inlined_call_operand.vmem [shape: f32[7,32,1], index: 2, kind: input, shape index: {}]   ;;  %s4890_s3 = inlined_call_operand.vmem [shape: f32[9,1,128], index: 3, kind: input, shape index: {}]   ;;  %s4891_s4 = inlined_call_operand.hbm [shape: f32[1,32,128], index: 4, kind: output, shape index: {}]  }
   0x1   :  { %10 = vsyncpa [#allocation4], 0  ;;  %s3744_s15 = smov [#allocation2]   ;;  %s3696_s19 = scalar_lea.hbm %s4888_s1, 10752 }
   0x2   :  { %s18_s16 = sshll.u32 %s3744_s15, 4  ;;  %p3697_p0 = scmp.ne.s32.totalorder %s4888_s1, %s3696_s19  ;;  %s19_s16 = int_to_ptr.vmem [resolvable:$true] %s18_s16 }
   0x3   :  { %p3700_p1 = scmp.lt.u32.totalorder %s3696_s19, %s4888_s1 }
   0x5   :  { %p3702_p2 = pnand %p3700_p1, %p3697_p0 }
   0x7   :  { %3705 = shalt.err (!%p3702_p2)
}
   0x8   :  { %s3706_s24 = scalar_lea.vmem %s19_s16, 10752  ;;  %p3711_p4 = scmp.lt.s32.totalorder %s19_s16, %s19_s16 }
   0x9   :  { %p3707_p3 = scmp.ne.s32.totalorder %s19_s16, %s3706_s24  ;;  %p3712_p5 = scmp.lt.s32.totalorder %s3706_s24, %s3706_s24 }
   0xb   :  { %p3713_p6 = por %p3712_p5, %p3711_p4 }
   0xd   :  { %p3714_p7 = pnand %p3713_p6, %p3707_p3 }
   0xf   :  { %3717 = shalt.err (!%p3714_p7)
}
  0x10   :  { %s3745_s25 = smov 384   ;;  %s3746_s26 = smov 24  }
  0x11   :  { %24 = dma.hbm_to_vmem [thread:$0]  %s4888_s1, 10752, %s19_s16, [#allocation3], %s3745_s25, %s3745_s25, %s3746_s26  }
  0x12   :  { %3740 = dma.done.wait [#allocation3], 10752  }
  0x13   :  { %3741 = vsyncadd [#allocation3], 4294956544  ;;  %v3798_v0 = vld [vmem:[%s4887_s0 + $0x10] sm:$0xff]  ;;  %v32_v1 = vld [vmem:[%s4887_s0] sm:$0xff]  ;;  %s3747_s9 = smov 9   ;;  %s3748_s11 = smov 127  }
  0x14   :  { %v3806_v2 = vld [vmem:[%s4887_s0 + $0x18] sm:$0xff]  ;;  %44 = vrot.lane.b32.xlu1 %v3798_v0, %s3747_s9  ;;  %40 = vrot.lane.b32.xlu0 %v32_v1, %s3747_s9  ;;  %v33_v3 = vld [vmem:[%s4887_s0 + $0x8] sm:$0xff]  ;;  %s3749_s12 = smov 8   ;;  %s3750_s0 = smov 121   ;;  %v3755_v9 = vmov 0   ;;  %vm52_vm0 = vcmask 72704  }
  0x15   :  { %v3388_v4 = vpack.c.bf16 %v3806_v2, %v3798_v0  ;;  %v3384_v5 = vpack.c.bf16 %v33_v3, %v32_v1  ;;  %s3751_s13 = smov 7   ;;  %s3752_s14 = smov 120   ;;  %v272_v6 = vld [vmem:[#allocation2 + $0x8] sm:$0xff]  ;;  %v283_v7 = vld [vmem:[%s4889_s2] sm:$0xff]  ;;  %3678 = vset.pattern.permute.xlu0 %v3755_v9  ;;  %3679 = vset.pattern.permute.xlu1 %v3755_v9  ;;  %v285_v10 = vld [vmem:[%s4889_s2 + $0x10] sm:$0xff]  ;;  %vm167_vm1 = vcmask 1039360  }
  0x16   :  { %s3753_s15 = smov 1   ;;  %384 = vmatprep.mubr.f32.mxu0 %v272_v6  ;;  %s3754_s16 = smov 119   ;;  %v284_v8 = vld [vmem:[%s4889_s2 + $0x8] sm:$0xff]  ;;  %v286_v11 = vld [vmem:[%s4889_s2 + $0x18] sm:$0xff]  ;;  %v3876_v14 = vld [vmem:[%s4890_s3] ss:$0 sm:$0xff] }
  0x17   :  { %3385 = vmatprep.subr.bf16.mxu0 %v3384_v5  ;;  %v3887_v23 = vld [vmem:[%s4890_s3 + $0x5] ss:$0 sm:$0xff]  ;;  %vm80_vm2 = vcmask 64512   ;;  %v3898_v33 = vld [vmem:[%s4890_s3 + $0x1] ss:$0 sm:$0xff]  ;;  %vm196_vm3 = vcmask 990208  }
  0x18   :  { %46 = vrot.lane.b32.xlu1 %v3806_v2, %s3747_s9  ;;  %42 = vrot.lane.b32.xlu0 %v33_v3, %s3747_s9  ;;  %v3918_v56 = vld [vmem:[%s4890_s3 + $0x6] ss:$0 sm:$0xff]  ;;  %vm109_vm4 = vcmask 56320   ;;  %vm225_vm5 = vcmask 982016   ;;  %vm138_vm6 = vcmask 7168   ;;  %vm254_vm7 = vcmask 973824  }
  0x19   :  { %vm307_vm8 = vcmask 261120  }
  0x1c   :  { %157 = vrot.lane.b32.xlu1 %v33_v3, %s3748_s11  ;;  %155 = vrot.lane.b32.xlu0 %v32_v1, %s3748_s11 }
  0x20   :  { %70 = vrot.lane.b32.xlu1 %v33_v3, %s3749_s12  ;;  %68 = vrot.lane.b32.xlu0 %v32_v1, %s3749_s12 }
  0x24   :  { %161 = vrot.lane.b32.xlu1 %v3806_v2, %s3748_s11  ;;  %159 = vrot.lane.b32.xlu0 %v3798_v0, %s3748_s11 }
  0x28   :  { %74 = vrot.lane.b32.xlu1 %v3806_v2, %s3749_s12  ;;  %72 = vrot.lane.b32.xlu0 %v3798_v0, %s3749_s12 }
  0x2c   :  { %186 = vrot.lane.b32.xlu1 %v33_v3, %s3750_s0  ;;  %184 = vrot.lane.b32.xlu0 %v32_v1, %s3750_s0 }
  0x30   :  { %99 = vrot.lane.b32.xlu1 %v33_v3, %s3751_s13  ;;  %97 = vrot.lane.b32.xlu0 %v32_v1, %s3751_s13 }
  0x34   :  { %190 = vrot.lane.b32.xlu1 %v3806_v2, %s3750_s0  ;;  %188 = vrot.lane.b32.xlu0 %v3798_v0, %s3750_s0 }
  0x38   :  { %103 = vrot.lane.b32.xlu1 %v3806_v2, %s3751_s13  ;;  %101 = vrot.lane.b32.xlu0 %v3798_v0, %s3751_s13 }
  0x3c   :  { %215 = vrot.lane.b32.xlu1 %v33_v3, %s3752_s14  ;;  %213 = vrot.lane.b32.xlu0 %v32_v1, %s3752_s14 }
  0x40   :  { %128 = vrot.lane.b32.xlu1 %v33_v3, %s3753_s15  ;;  %126 = vrot.lane.b32.xlu0 %v32_v1, %s3753_s15 }
  0x44   :  { %219 = vrot.lane.b32.xlu1 %v3806_v2, %s3752_s14  ;;  %217 = vrot.lane.b32.xlu0 %v3798_v0, %s3752_s14 }
  0x48   :  { %132 = vrot.lane.b32.xlu1 %v3806_v2, %s3753_s15  ;;  %130 = vrot.lane.b32.xlu0 %v3798_v0, %s3753_s15 }
  0x4c   :  { %244 = vrot.lane.b32.xlu1 %v33_v3, %s3754_s16  ;;  %242 = vrot.lane.b32.xlu0 %v32_v1, %s3754_s16 }
  0x50   :  { %248 = vrot.lane.b32.xlu1 %v3806_v2, %s3754_s16  ;;  %246 = vrot.lane.b32.xlu0 %v3798_v0, %s3754_s16  ;;  %v3927_v0 = vld [vmem:[%s4890_s3 + $0x2] ss:$0 sm:$0xff] }
  0x54   :  { %289 = vperm.xlu0 %3678, %v283_v7   ;;  %294 = vperm.xlu1 %3679, %v284_v8  }
  0x58   :  { %299 = vperm.xlu1 %3679, %v285_v10   ;;  %304 = vperm.xlu0 %3678, %v286_v11  }
  0x86   :  { %v45_v12 = vpop.permute.xlu1 %44  ;;  %v41_v13 = vpop.permute.xlu0 %40 }
  0x87   :  { %v53_v15 = vsel %vm52_vm0, 0.0, %v41_v13  ;;  %v55_v22 = vsel %vm52_vm0, 0.0, %v45_v12 }
  0x88   :  { %v64_v20 = vmul.f32 %v3876_v14, %v53_v15  ;;  %v66_v30 = vmul.f32 %v3876_v14, %v55_v22 }
  0x8a   :  { %v47_v16 = vpop.permute.xlu1 %46  ;;  %v43_v17 = vpop.permute.xlu0 %42 }
  0x8b   :  { %v56_v18 = vsel %vm52_vm0, 0.0, %v47_v16  ;;  %v54_v19 = vsel %vm52_vm0, 0.0, %v43_v17 }
  0x8c   :  { %v65_v21 = vmul.f32 %v3876_v14, %v54_v19  ;;  %v67_v24 = vmul.f32 %v3876_v14, %v56_v18 }
  0x8e   :  { %v158_v25 = vpop.permute.xlu1 %157  ;;  %v156_v26 = vpop.permute.xlu0 %155  ;;  %v3386_v27 = vpack.c.bf16 %v65_v21, %v64_v20  ;;  %v3390_v36 = vpack.c.bf16 %v67_v24, %v66_v30  ;;  %v3944_v24 = vld [vmem:[%s4890_s3 + $0x7] ss:$0 sm:$0xff] }
  0x8f   :  { %v169_v28 = vsel %vm167_vm1, %v158_v25, 0.0  ;;  %v168_v29 = vsel %vm167_vm1, %v156_v26, 0.0 }
  0x90   :  { %v181_v31 = vmul.f32 %v3887_v23, %v169_v28  ;;  %v180_v32 = vmul.f32 %v3887_v23, %v168_v29  ;;  %3387 = vmatpush3.bf16.msra.mxu0 %v3386_v27 }
  0x91   :  { %3389 = vmatprep.subr.bf16.mxu0 %v3388_v4 }
  0x92   :  { %v71_v34 = vpop.permute.xlu1 %70  ;;  %v69_v35 = vpop.permute.xlu0 %68  ;;  %v3392_v37 = vpack.c.bf16 %v181_v31, %v180_v32  ;;  %v3953_v32 = vld [vmem:[%s4890_s3 + $0x3] ss:$0 sm:$0xff] }
  0x93   :  { %v82_v38 = vsel %vm80_vm2, 0.0, %v71_v34  ;;  %v81_v39 = vsel %vm80_vm2, 0.0, %v69_v35 }
  0x94   :  { %v94_v40 = vmul.f32 %v3898_v33, %v82_v38  ;;  %v93_v41 = vmul.f32 %v3898_v33, %v81_v39  ;;  %3391 = vmatpush3.bf16.msra.mxu0 %v3390_v36 }
  0x95   :  { %3393 = vmatprep.subr.bf16.mxu0 %v3392_v37 }
  0x96   :  { %v162_v42 = vpop.permute.xlu1 %161  ;;  %v160_v43 = vpop.permute.xlu0 %159  ;;  %v3394_v44 = vpack.c.bf16 %v94_v40, %v93_v41 }
  0x97   :  { %v171_v45 = vsel %vm167_vm1, %v162_v42, 0.0  ;;  %v170_v46 = vsel %vm167_vm1, %v160_v43, 0.0 }
  0x98   :  { %v183_v47 = vmul.f32 %v3887_v23, %v171_v45  ;;  %v182_v48 = vmul.f32 %v3887_v23, %v170_v46  ;;  %3395 = vmatpush3.bf16.msra.mxu0 %v3394_v44 }
  0x9a   :  { %v75_v49 = vpop.permute.xlu1 %74  ;;  %v73_v50 = vpop.permute.xlu0 %72  ;;  %v3396_v51 = vpack.c.bf16 %v183_v47, %v182_v48 }
  0x9b   :  { %v84_v52 = vsel %vm80_vm2, 0.0, %v75_v49  ;;  %v83_v53 = vsel %vm80_vm2, 0.0, %v73_v50 }
  0x9c   :  { %v96_v54 = vmul.f32 %v3898_v33, %v84_v52  ;;  %v95_v55 = vmul.f32 %v3898_v33, %v83_v53  ;;  %3397 = vmatprep.subr.bf16.mxu0 %v3396_v51 }
  0x9e   :  { %v187_v57 = vpop.permute.xlu1 %186  ;;  %v185_v58 = vpop.permute.xlu0 %184  ;;  %v3398_v59 = vpack.c.bf16 %v96_v54, %v95_v55  ;;  %v3970_v55 = vld [vmem:[%s4890_s3 + $0x8] ss:$0 sm:$0xff] }
  0x9f   :  { %v198_v60 = vsel %vm196_vm3, %v187_v57, 0.0  ;;  %v197_v61 = vsel %vm196_vm3, %v185_v58, 0.0 }
  0xa0   :  { %v210_v62 = vmul.f32 %v3918_v56, %v198_v60  ;;  %v209_v63 = vmul.f32 %v3918_v56, %v197_v61  ;;  %3399 = vmatpush3.bf16.msra.mxu0 %v3398_v59 }
  0xa2   :  { %v100_v1 = vpop.permute.xlu1 %99  ;;  %v98_v2 = vpop.permute.xlu0 %97  ;;  %v3400_v3 = vpack.c.bf16 %v210_v62, %v209_v63  ;;  %v271_v62 = vld [vmem:[#allocation2] sm:$0xff] }
  0xa3   :  { %v111_v4 = vsel %vm109_vm4, 0.0, %v100_v1  ;;  %v110_v5 = vsel %vm109_vm4, 0.0, %v98_v2  ;;  %v275_v2 = vld [vmem:[#allocation2 + $0x20] sm:$0xff] }
  0xa4   :  { %v123_v6 = vmul.f32 %v3927_v0, %v111_v4  ;;  %v122_v7 = vmul.f32 %v3927_v0, %v110_v5  ;;  %3401 = vmatprep.subr.bf16.mxu0 %v3400_v3 }
  0xa6   :  { %v191_v8 = vpop.permute.xlu1 %190  ;;  %v189_v9 = vpop.permute.xlu0 %188  ;;  %v3402_v10 = vpack.c.bf16 %v123_v6, %v122_v7 }
  0xa7   :  { %v200_v11 = vsel %vm196_vm3, %v191_v8, 0.0  ;;  %v199_v12 = vsel %vm196_vm3, %v189_v9, 0.0  ;;  %v274_v8 = vld [vmem:[#allocation2 + $0x18] sm:$0xff] }
  0xa8   :  { %v212_v13 = vmul.f32 %v3918_v56, %v200_v11  ;;  %v211_v15 = vmul.f32 %v3918_v56, %v199_v12  ;;  %3403 = vmatpush3.bf16.msra.mxu0 %v3402_v10  ;;  %v278_v11 = vld [vmem:[#allocation2 + $0x38] sm:$0xff] }
  0xaa   :  { %v104_v16 = vpop.permute.xlu1 %103  ;;  %v102_v17 = vpop.permute.xlu0 %101  ;;  %v3404_v18 = vpack.c.bf16 %v212_v13, %v211_v15  ;;  %v277_v13 = vld [vmem:[#allocation2 + $0x30] sm:$0xff] }
  0xab   :  { %v113_v19 = vsel %vm109_vm4, 0.0, %v104_v16  ;;  %v112_v20 = vsel %vm109_vm4, 0.0, %v102_v17  ;;  %v281_v15 = vld [vmem:[#allocation2 + $0x50] sm:$0xff]  ;;  %v280_v16 = vld [vmem:[#allocation2 + $0x48] sm:$0xff] }
  0xac   :  { %v125_v21 = vmul.f32 %v3927_v0, %v113_v19  ;;  %v124_v22 = vmul.f32 %v3927_v0, %v112_v20  ;;  %3405 = vmatprep.subr.bf16.mxu0 %v3404_v18  ;;  %v273_v17 = vld [vmem:[#allocation2 + $0x10] sm:$0xff]  ;;  %v276_v18 = vld [vmem:[#allocation2 + $0x28] sm:$0xff]  ;;  %v279_v19 = vld [vmem:[#allocation2 + $0x40] sm:$0xff] }
  0xad   :  { %v282_v20 = vld [vmem:[#allocation2 + $0x58] sm:$0xff] }
  0xae   :  { %v216_v25 = vpop.permute.xlu1 %215  ;;  %v214_v26 = vpop.permute.xlu0 %213  ;;  %v3406_v27 = vpack.c.bf16 %v125_v21, %v124_v22 }
  0xaf   :  { %v227_v28 = vsel %vm225_vm5, %v216_v25, 0.0  ;;  %v226_v29 = vsel %vm225_vm5, %v214_v26, 0.0 }
  0xb0   :  { %v239_v30 = vmul.f32 %v3944_v24, %v227_v28  ;;  %v238_v31 = vmul.f32 %v3944_v24, %v226_v29  ;;  %3407 = vmatpush3.bf16.msra.mxu0 %v3406_v27 }
  0xb2   :  { %v129_v34 = vpop.permute.xlu1 %128  ;;  %v127_v35 = vpop.permute.xlu0 %126  ;;  %v3408_v36 = vpack.c.bf16 %v239_v30, %v238_v31 }
  0xb3   :  { %v140_v37 = vsel %vm138_vm6, 0.0, %v129_v34  ;;  %v139_v38 = vsel %vm138_vm6, 0.0, %v127_v35 }
  0xb4   :  { %v152_v39 = vmul.f32 %v3953_v32, %v140_v37  ;;  %v151_v40 = vmul.f32 %v3953_v32, %v139_v38  ;;  %3409 = vmatprep.subr.bf16.mxu0 %v3408_v36 }
  0xb6   :  { %v220_v41 = vpop.permute.xlu1 %219  ;;  %v218_v42 = vpop.permute.xlu0 %217  ;;  %v3410_v43 = vpack.c.bf16 %v152_v39, %v151_v40 }
  0xb7   :  { %v229_v44 = vsel %vm225_vm5, %v220_v41, 0.0  ;;  %v228_v45 = vsel %vm225_vm5, %v218_v42, 0.0 }
  0xb8   :  { %v241_v46 = vmul.f32 %v3944_v24, %v229_v44  ;;  %v240_v47 = vmul.f32 %v3944_v24, %v228_v45  ;;  %3411 = vmatpush3.bf16.msra.mxu0 %v3410_v43 }
  0xba   :  { %v133_v48 = vpop.permute.xlu1 %132  ;;  %v131_v49 = vpop.permute.xlu0 %130  ;;  %v3412_v50 = vpack.c.bf16 %v241_v46, %v240_v47 }
  0xbb   :  { %v142_v51 = vsel %vm138_vm6, 0.0, %v133_v48  ;;  %v141_v52 = vsel %vm138_vm6, 0.0, %v131_v49 }
  0xbc   :  { %v154_v53 = vmul.f32 %v3953_v32, %v142_v51  ;;  %v153_v54 = vmul.f32 %v3953_v32, %v141_v52  ;;  %3413 = vmatprep.subr.bf16.mxu0 %v3412_v50 }
  0xbe   :  { %v3414_v57 = vpack.c.bf16 %v154_v53, %v153_v54  ;;  %v245_v58 = vpop.permute.xlu1 %244  ;;  %v243_v59 = vpop.permute.xlu0 %242 }
  0xbf   :  { %v256_v60 = vsel %vm254_vm7, %v245_v58, 0.0  ;;  %v255_v61 = vsel %vm254_vm7, %v243_v59, 0.0 }
  0xc0   :  { %3415 = vmatpush3.bf16.msra.mxu0 %v3414_v57  ;;  %v268_v63 = vmul.f32 %v3970_v55, %v256_v60  ;;  %v267_v1 = vmul.f32 %v3970_v55, %v255_v61  ;;  %v660_v60 = vld [vmem:[#allocation2 + $0x68] sm:$0xff]  ;;  %v661_v61 = vld [vmem:[#allocation2 + $0x70] sm:$0xff] }
  0xc1   :  { %772 = vmatprep.mubr.f32.mxu1 %v660_v60 }
  0xc2   :  { %v249_v3 = vpop.permute.xlu1 %248  ;;  %v247_v4 = vpop.permute.xlu0 %246  ;;  %v3416_v5 = vpack.c.bf16 %v268_v63, %v267_v1  ;;  %v2874_v63 = vld [vmem:[%s4889_s2 + $0x20] sm:$0xff]  ;;  %v2877_v1 = vld [vmem:[%s4889_s2 + $0x38] sm:$0xff] }
  0xc3   :  { %385 = vmatmul.mubr.f32.vlgmr.msra.gmra.mrb[0].mxu0 %v271_v62  ;;  %v258_v6 = vsel %vm254_vm7, %v249_v3, 0.0  ;;  %v257_v7 = vsel %vm254_vm7, %v247_v4, 0.0  ;;  %v2875_v62 = vld [vmem:[%s4889_s2 + $0x28] sm:$0xff] }
  0xc4   :  { %389 = vmatprep.mubr.f32.mxu0 %v275_v2  ;;  %v270_v9 = vmul.f32 %v3970_v55, %v258_v6  ;;  %v269_v10 = vmul.f32 %v3970_v55, %v257_v7  ;;  %3417 = vmatprep.subr.bf16.mxu0 %v3416_v5  ;;  %v2876_v2 = vld [vmem:[%s4889_s2 + $0x30] sm:$0xff] }
  0xc5   :  { %3419 = vmatpush3.bf16.msra.mxu0 %v3416_v5 }
  0xc6   :  { %v3420_v12 = vpack.c.bf16 %v270_v9, %v269_v10 }
  0xc7   :  { %390 = vmatmul.mubr.f32.gmra.mrb[2].mxu0 %v274_v8 }
  0xc8   :  { %394 = vmatprep.mubr.f32.mxu0 %v278_v11  ;;  %3421 = vmatprep.subr.bf16.mxu0 %v3420_v12 }
  0xc9   :  { %3423 = vmatpush3.bf16.msra.mxu0 %v3420_v12 }
  0xcb   :  { %395 = vmatmul.mubr.f32.gmra.mrb[4].mxu0 %v277_v13 }
  0xcc   :  { %399 = vmatprep.mubr.f32.mxu0 %v281_v15 }
  0xcf   :  { %400 = vmatmul.mubr.f32.gmra.mrb[6].mxu0 %v280_v16 }
  0xd0   :  { %3294 = vmatprep.mubr.msk.f32.mxu0 %vm307_vm8, %v273_v17 }
  0xd3   :  { %3295 = vmatmul.mubr.msk.f32.vlgmr.msra.gmra.mrb[8].mxu0 %vm307_vm8, %v276_v18  ;;  %v295_v34 = vpop.permute.xlu1 %294  ;;  %v290_v35 = vpop.permute.xlu0 %289 }
  0xd4   :  { %3297 = vmatprep.mubr.msk.f32.mxu0 %vm307_vm8, %v279_v19 }
  0xd7   :  { %3298 = vmatmul.mubr.msk.f32.gmra.mrb[10].mxu0 %vm307_vm8, %v282_v20  ;;  %v305_v41 = vpop.permute.xlu0 %304  ;;  %v300_v43 = vpop.permute.xlu1 %299 }
  0xd8   :  { %3308 = vmatprep.mubr.msk.f32.mxu0 %vm307_vm8, %v661_v61 }
 0x196   :  { %v2954_v21 = vpop.f32.mrb[0].mxu0 }
 0x197   :  { %v2955_v22 = vpop.f32.mrb[1].mxu0 }
 0x198   :  { %v2956_v25 = vadd.f32 %v2955_v22, %v2954_v21 }
 0x19a   :  { %v2957_v26 = vpop.f32.mrb[2].mxu0  ;;  %v387_v40 = vadd.f32 %v2956_v25, %v290_v35 }
 0x19b   :  { %v2958_v27 = vpop.f32.mrb[3].mxu0 }
 0x19c   :  { %v2959_v28 = vadd.f32 %v2958_v27, %v2957_v26 }
 0x19e   :  { %v2960_v29 = vpop.f32.mrb[4].mxu0  ;;  %v392_v39 = vadd.f32 %v2959_v28, %v295_v34 }
 0x19f   :  { %v2961_v30 = vpop.f32.mrb[5].mxu0 }
 0x1a0   :  { %v2962_v31 = vadd.f32 %v2961_v30, %v2960_v29 }
 0x1a2   :  { %v2963_v36 = vpop.f32.mrb[6].mxu0  ;;  %v397_v49 = vadd.f32 %v2962_v31, %v300_v43 }
 0x1a3   :  { %v2964_v37 = vpop.f32.mrb[7].mxu0 }
 0x1a4   :  { %v2965_v38 = vadd.f32 %v2964_v37, %v2963_v36 }
 0x1a6   :  { %v3296_v42 = vpop.f32.mrb[8].mxu0  ;;  %v402_v47 = vadd.f32 %v2965_v38, %v305_v41 }
 0x1a7   :  { %v477_v44 = vadd.f32 %v3296_v42, %v392_v39  ;;  %v471_v45 = vpop.f32.mrb[9].mxu0 }
 0x1a8   :  { %v472_v46 = vadd.f32 %v471_v45, %v387_v40 }
 0x1a9   :  { %v3984_v48 = vmax.f32 %v477_v44, 0.0 }
 0x1aa   :  { %v3986_v50 = vmax.f32 %v472_v46, 0.0  ;;  %v3299_v51 = vpop.f32.mrb[10].mxu0 }
 0x1ab   :  { %v487_v52 = vadd.f32 %v3299_v51, %v402_v47  ;;  %v481_v53 = vpop.f32.mrb[11].mxu0  ;;  %500 = vrot.lane.b32.xlu0 %v3984_v48, %s3747_s9 }
 0x1ac   :  { %v482_v54 = vadd.f32 %v481_v53, %v397_v49  ;;  %498 = vrot.lane.b32.xlu1 %v3986_v50, %s3747_s9  ;;  %v3424_v57 = vpack.c.bf16 %v3984_v48, %v3986_v50 }
 0x1ad   :  { %v4018_v58 = vmax.f32 %v487_v52, 0.0 }
 0x1ae   :  { %3425 = vmatprep.subr.bf16.mxu1 %v3424_v57  ;;  %v4020_v59 = vmax.f32 %v482_v54, 0.0 }
 0x1af   :  { %580 = vrot.lane.b32.xlu0 %v3984_v48, %s3748_s11 }
 0x1b0   :  { %578 = vrot.lane.b32.xlu1 %v3986_v50, %s3748_s11  ;;  %v3428_v12 = vpack.c.bf16 %v4018_v58, %v4020_v59 }
 0x1b3   :  { %520 = vrot.lane.b32.xlu0 %v3984_v48, %s3749_s12 }
 0x1b4   :  { %518 = vrot.lane.b32.xlu1 %v3986_v50, %s3749_s12 }
 0x1b7   :  { %600 = vrot.lane.b32.xlu0 %v3984_v48, %s3750_s0 }
 0x1b8   :  { %598 = vrot.lane.b32.xlu1 %v3986_v50, %s3750_s0 }
 0x1bb   :  { %540 = vrot.lane.b32.xlu0 %v3984_v48, %s3751_s13 }
 0x1bc   :  { %538 = vrot.lane.b32.xlu1 %v3986_v50, %s3751_s13 }
 0x1bf   :  { %620 = vrot.lane.b32.xlu0 %v3984_v48, %s3752_s14 }
 0x1c0   :  { %618 = vrot.lane.b32.xlu1 %v3986_v50, %s3752_s14 }
 0x1c3   :  { %560 = vrot.lane.b32.xlu0 %v3984_v48, %s3753_s15 }
 0x1c4   :  { %558 = vrot.lane.b32.xlu1 %v3986_v50, %s3753_s15 }
 0x1c7   :  { %504 = vrot.lane.b32.xlu0 %v4018_v58, %s3747_s9 }
 0x1c8   :  { %502 = vrot.lane.b32.xlu1 %v4020_v59, %s3747_s9 }
 0x1cb   :  { %584 = vrot.lane.b32.xlu0 %v4018_v58, %s3748_s11 }
 0x1cc   :  { %582 = vrot.lane.b32.xlu1 %v4020_v59, %s3748_s11 }
 0x1cf   :  { %524 = vrot.lane.b32.xlu0 %v4018_v58, %s3749_s12 }
 0x1d0   :  { %522 = vrot.lane.b32.xlu1 %v4020_v59, %s3749_s12 }
 0x1d3   :  { %604 = vrot.lane.b32.xlu0 %v4018_v58, %s3750_s0 }
 0x1d4   :  { %602 = vrot.lane.b32.xlu1 %v4020_v59, %s3750_s0 }
 0x1d7   :  { %544 = vrot.lane.b32.xlu0 %v4018_v58, %s3751_s13 }
 0x1d8   :  { %542 = vrot.lane.b32.xlu1 %v4020_v59, %s3751_s13 }
 0x1db   :  { %624 = vrot.lane.b32.xlu0 %v4018_v58, %s3752_s14 }
 0x1dc   :  { %622 = vrot.lane.b32.xlu1 %v4020_v59, %s3752_s14 }
 0x1df   :  { %564 = vrot.lane.b32.xlu0 %v4018_v58, %s3753_s15 }
 0x1e0   :  { %562 = vrot.lane.b32.xlu1 %v4020_v59, %s3753_s15 }
 0x1e3   :  { %640 = vrot.lane.b32.xlu0 %v3984_v48, %s3754_s16 }
 0x1e4   :  { %638 = vrot.lane.b32.xlu1 %v3986_v50, %s3754_s16 }
 0x1e7   :  { %644 = vrot.lane.b32.xlu0 %v4018_v58, %s3754_s16 }
 0x1e8   :  { %642 = vrot.lane.b32.xlu1 %v4020_v59, %s3754_s16 }
 0x1eb   :  { %683 = vperm.xlu0 %3678, %v2875_v62  }
 0x1ec   :  { %678 = vperm.xlu1 %3679, %v2874_v63  }
 0x1ef   :  { %693 = vperm.xlu0 %3678, %v2877_v1  }
 0x1f0   :  { %688 = vperm.xlu1 %3679, %v2876_v2  }
 0x21d   :  { %v501_v3 = vpop.permute.xlu0 %500 }
 0x21e   :  { %v511_v4 = vsel %vm52_vm0, 0.0, %v501_v3  ;;  %v499_v5 = vpop.permute.xlu1 %498 }
 0x21f   :  { %v515_v6 = vmul.f32 %v3876_v14, %v511_v4  ;;  %v510_v7 = vsel %vm52_vm0, 0.0, %v499_v5 }
 0x220   :  { %v514_v8 = vmul.f32 %v3876_v14, %v510_v7 }
 0x221   :  { %v581_v9 = vpop.permute.xlu0 %580 }
 0x222   :  { %v579_v10 = vpop.permute.xlu1 %578  ;;  %v3426_v11 = vpack.c.bf16 %v515_v6, %v514_v8  ;;  %v591_v26 = vsel %vm167_vm1, %v581_v9, 0.0 }
 0x223   :  { %v590_v27 = vsel %vm167_vm1, %v579_v10, 0.0  ;;  %v595_v35 = vmul.f32 %v3887_v23, %v591_v26 }
 0x224   :  { %3427 = vmatpush3.bf16.msra.mxu1 %v3426_v11  ;;  %v594_v36 = vmul.f32 %v3887_v23, %v590_v27 }
 0x225   :  { %v521_v13 = vpop.permute.xlu0 %520  ;;  %3429 = vmatprep.subr.bf16.mxu1 %v3428_v12 }
 0x226   :  { %v519_v15 = vpop.permute.xlu1 %518  ;;  %v531_v29 = vsel %vm80_vm2, 0.0, %v521_v13  ;;  %v3432_v52 = vpack.c.bf16 %v595_v35, %v594_v36 }
 0x227   :  { %v530_v30 = vsel %vm80_vm2, 0.0, %v519_v15  ;;  %v535_v40 = vmul.f32 %v3898_v33, %v531_v29 }
 0x228   :  { %v534_v41 = vmul.f32 %v3898_v33, %v530_v30 }
 0x229   :  { %v601_v16 = vpop.permute.xlu0 %600 }
 0x22a   :  { %v599_v17 = vpop.permute.xlu1 %598  ;;  %v611_v43 = vsel %vm196_vm3, %v601_v16, 0.0  ;;  %v3434_v61 = vpack.c.bf16 %v535_v40, %v534_v41 }
 0x22b   :  { %v610_v44 = vsel %vm196_vm3, %v599_v17, 0.0  ;;  %v615_v54 = vmul.f32 %v3918_v56, %v611_v43 }
 0x22c   :  { %v614_v57 = vmul.f32 %v3918_v56, %v610_v44 }
 0x22d   :  { %v541_v18 = vpop.permute.xlu0 %540 }
 0x22e   :  { %v539_v19 = vpop.permute.xlu1 %538  ;;  %v551_v62 = vsel %vm109_vm4, 0.0, %v541_v18  ;;  %v3440_v13 = vpack.c.bf16 %v615_v54, %v614_v57 }
 0x22f   :  { %v550_v63 = vsel %vm109_vm4, 0.0, %v539_v19  ;;  %v555_v7 = vmul.f32 %v3927_v0, %v551_v62 }
 0x230   :  { %v554_v8 = vmul.f32 %v3927_v0, %v550_v63 }
 0x231   :  { %v621_v20 = vpop.permute.xlu0 %620 }
 0x232   :  { %v619_v21 = vpop.permute.xlu1 %618  ;;  %v631_v15 = vsel %vm225_vm5, %v621_v20, 0.0  ;;  %v3442_v27 = vpack.c.bf16 %v555_v7, %v554_v8 }
 0x233   :  { %v630_v16 = vsel %vm225_vm5, %v619_v21, 0.0 }
 0x234   :  { %v634_v29 = vmul.f32 %v3944_v24, %v630_v16 }
 0x235   :  { %v4077_v22 = vpop.permute.xlu0 %560 }
 0x236   :  { %v4079_v25 = vpop.permute.xlu1 %558  ;;  %v571_v21 = vsel %vm138_vm6, 0.0, %v4077_v22 }
 0x239   :  { %v505_v28 = vpop.permute.xlu0 %504 }
 0x23a   :  { %v513_v31 = vsel %vm52_vm0, 0.0, %v505_v28  ;;  %v503_v34 = vpop.permute.xlu1 %502  ;;  %v635_v28 = vmul.f32 %v3944_v24, %v631_v15  ;;  %v666_v15 = vld [vmem:[#allocation2 + $0x98] sm:$0xff] }
 0x23b   :  { %v517_v37 = vmul.f32 %v3876_v14, %v513_v31  ;;  %v512_v38 = vsel %vm52_vm0, 0.0, %v503_v34  ;;  %v570_v34 = vsel %vm138_vm6, 0.0, %v4079_v25 }
 0x23c   :  { %v516_v39 = vmul.f32 %v3876_v14, %v512_v38  ;;  %v574_v40 = vmul.f32 %v3953_v32, %v570_v34  ;;  %v3448_v44 = vpack.c.bf16 %v635_v28, %v634_v29  ;;  %v670_v28 = vld [vmem:[#allocation2 + $0xb8] sm:$0xff] }
 0x23d   :  { %v585_v42 = vpop.permute.xlu0 %584 }
 0x23e   :  { %v593_v45 = vsel %vm167_vm1, %v585_v42, 0.0  ;;  %v583_v46 = vpop.permute.xlu1 %582  ;;  %v3430_v47 = vpack.c.bf16 %v517_v37, %v516_v39  ;;  %v575_v39 = vmul.f32 %v3953_v32, %v571_v21 }
 0x23f   :  { %v597_v49 = vmul.f32 %v3887_v23, %v593_v45  ;;  %v592_v51 = vsel %vm167_vm1, %v583_v46, 0.0 }
 0x240   :  { %v596_v53 = vmul.f32 %v3887_v23, %v592_v51  ;;  %3431 = vmatpush3.bf16.msra.mxu1 %v3430_v47  ;;  %v3450_v51 = vpack.c.bf16 %v575_v39, %v574_v40 }
 0x241   :  { %v525_v60 = vpop.permute.xlu0 %524  ;;  %3433 = vmatprep.subr.bf16.mxu1 %v3432_v52 }
 0x242   :  { %v533_v1 = vsel %vm80_vm2, 0.0, %v525_v60  ;;  %v523_v2 = vpop.permute.xlu1 %522  ;;  %v3436_v3 = vpack.c.bf16 %v597_v49, %v596_v53 }
 0x243   :  { %v537_v4 = vmul.f32 %v3898_v33, %v533_v1  ;;  %v532_v5 = vsel %vm80_vm2, 0.0, %v523_v2 }
 0x244   :  { %v536_v6 = vmul.f32 %v3898_v33, %v532_v5  ;;  %3435 = vmatpush3.bf16.msra.mxu1 %v3434_v61 }
 0x245   :  { %v605_v9 = vpop.permute.xlu0 %604  ;;  %3437 = vmatprep.subr.bf16.mxu1 %v3436_v3 }
 0x246   :  { %v613_v10 = vsel %vm196_vm3, %v605_v9, 0.0  ;;  %v603_v11 = vpop.permute.xlu1 %602  ;;  %v3438_v12 = vpack.c.bf16 %v537_v4, %v536_v6  ;;  %v659_v4 = vld [vmem:[#allocation2 + $0x60] sm:$0xff] }
 0x247   :  { %v617_v17 = vmul.f32 %v3918_v56, %v613_v10  ;;  %v612_v18 = vsel %vm196_vm3, %v603_v11, 0.0  ;;  %v663_v6 = vld [vmem:[#allocation2 + $0x80] sm:$0xff] }
 0x248   :  { %v616_v19 = vmul.f32 %v3918_v56, %v612_v18  ;;  %3439 = vmatpush3.bf16.msra.mxu1 %v3438_v12  ;;  %v664_v18 = vld [vmem:[#allocation2 + $0x88] sm:$0xff] }
 0x249   :  { %v545_v26 = vpop.permute.xlu0 %544  ;;  %3441 = vmatprep.subr.bf16.mxu1 %v3440_v13  ;;  %v662_v13 = vld [vmem:[#allocation2 + $0x78] sm:$0xff] }
 0x24a   :  { %v553_v30 = vsel %vm109_vm4, 0.0, %v545_v26  ;;  %v543_v31 = vpop.permute.xlu1 %542  ;;  %v3444_v20 = vpack.c.bf16 %v617_v17, %v616_v19  ;;  %v665_v17 = vld [vmem:[#allocation2 + $0x90] sm:$0xff]  ;;  %v667_v26 = vld [vmem:[#allocation2 + $0xa0] sm:$0xff] }
 0x24b   :  { %v557_v35 = vmul.f32 %v3927_v0, %v553_v30  ;;  %v552_v36 = vsel %vm109_vm4, 0.0, %v543_v31  ;;  %v669_v19 = vld [vmem:[#allocation2 + $0xb0] sm:$0xff] }
 0x24c   :  { %v556_v37 = vmul.f32 %v3927_v0, %v552_v36  ;;  %3443 = vmatpush3.bf16.msra.mxu1 %v3442_v27  ;;  %v668_v27 = vld [vmem:[#allocation2 + $0xa8] sm:$0xff] }
 0x24d   :  { %v625_v38 = vpop.permute.xlu0 %624  ;;  %3445 = vmatprep.subr.bf16.mxu1 %v3444_v20 }
 0x24e   :  { %v633_v41 = vsel %vm225_vm5, %v625_v38, 0.0  ;;  %v623_v42 = vpop.permute.xlu1 %622  ;;  %v3446_v22 = vpack.c.bf16 %v557_v35, %v556_v37 }
 0x24f   :  { %v637_v43 = vmul.f32 %v3944_v24, %v633_v41  ;;  %v632_v25 = vsel %vm225_vm5, %v623_v42, 0.0 }
 0x250   :  { %v636_v45 = vmul.f32 %v3944_v24, %v632_v25  ;;  %3447 = vmatpush3.bf16.msra.mxu1 %v3446_v22 }
 0x251   :  { %v565_v46 = vpop.permute.xlu0 %564  ;;  %3449 = vmatprep.subr.bf16.mxu1 %v3448_v44 }
 0x252   :  { %v573_v47 = vsel %vm138_vm6, 0.0, %v565_v46  ;;  %v563_v49 = vpop.permute.xlu1 %562  ;;  %v3452_v52 = vpack.c.bf16 %v637_v43, %v636_v45 }
 0x253   :  { %v577_v53 = vmul.f32 %v3953_v32, %v573_v47  ;;  %v572_v54 = vsel %vm138_vm6, 0.0, %v563_v49 }
 0x254   :  { %v576_v57 = vmul.f32 %v3953_v32, %v572_v54  ;;  %3451 = vmatpush3.bf16.msra.mxu1 %v3450_v51 }
 0x255   :  { %v641_v60 = vpop.permute.xlu0 %640  ;;  %3453 = vmatprep.subr.bf16.mxu1 %v3452_v52 }
 0x256   :  { %v651_v61 = vsel %vm254_vm7, %v641_v60, 0.0  ;;  %v639_v62 = vpop.permute.xlu1 %638  ;;  %v3454_v63 = vpack.c.bf16 %v577_v53, %v576_v57 }
 0x257   :  { %v655_v1 = vmul.f32 %v3970_v55, %v651_v61  ;;  %v650_v2 = vsel %vm254_vm7, %v639_v62, 0.0 }
 0x258   :  { %v654_v3 = vmul.f32 %v3970_v55, %v650_v2  ;;  %3455 = vmatpush3.bf16.msra.mxu1 %v3454_v63 }
 0x259   :  { %v645_v5 = vpop.permute.xlu0 %644 }
 0x25a   :  { %v653_v7 = vsel %vm254_vm7, %v645_v5, 0.0  ;;  %v643_v8 = vpop.permute.xlu1 %642  ;;  %v3456_v9 = vpack.c.bf16 %v655_v1, %v654_v3  ;;  %v1049_v5 = vld [vmem:[#allocation2 + $0xd0] sm:$0xff] }
 0x25b   :  { %v657_v10 = vmul.f32 %v3970_v55, %v653_v7  ;;  %v652_v11 = vsel %vm254_vm7, %v643_v8, 0.0  ;;  %773 = vmatmul.mubr.f32.vlgmr.msra.gmra.mrb[0].mxu1 %v659_v4  ;;  %v1048_v4 = vld [vmem:[#allocation2 + $0xc8] sm:$0xff]  ;;  %v2882_v7 = vld [vmem:[%s4889_s2 + $0x40] sm:$0xff]  ;;  %v2885_v8 = vld [vmem:[%s4889_s2 + $0x58] sm:$0xff] }
 0x25c   :  { %v656_v12 = vmul.f32 %v3970_v55, %v652_v11  ;;  %3457 = vmatprep.subr.bf16.mxu0 %v3456_v9  ;;  %777 = vmatprep.mubr.f32.mxu1 %v663_v6  ;;  %v2883_v6 = vld [vmem:[%s4889_s2 + $0x48] sm:$0xff] }
 0x25d   :  { %3459 = vmatpush3.bf16.msra.mxu0 %v3456_v9  ;;  %v2884_v9 = vld [vmem:[%s4889_s2 + $0x50] sm:$0xff] }
 0x25e   :  { %v3460_v16 = vpack.c.bf16 %v657_v10, %v656_v12 }
 0x25f   :  { %778 = vmatmul.mubr.f32.gmra.mrb[2].mxu1 %v662_v13 }
 0x260   :  { %3461 = vmatprep.subr.bf16.mxu0 %v3460_v16  ;;  %782 = vmatprep.mubr.f32.mxu1 %v666_v15 }
 0x261   :  { %3463 = vmatpush3.bf16.msra.mxu0 %v3460_v16 }
 0x263   :  { %783 = vmatmul.mubr.f32.gmra.mrb[4].mxu1 %v665_v17 }
 0x264   :  { %3309 = vmatmul.mubr.msk.f32.vlgmr.msra.gmra.mrb[12].mxu0 %vm307_vm8, %v664_v18  ;;  %787 = vmatprep.mubr.f32.mxu1 %v669_v19 }
 0x265   :  { %3311 = vmatprep.mubr.msk.f32.mxu0 %vm307_vm8, %v667_v26 }
 0x267   :  { %788 = vmatmul.mubr.f32.gmra.mrb[6].mxu1 %v668_v27 }
 0x268   :  { %3312 = vmatmul.mubr.msk.f32.gmra.mrb[14].mxu0 %vm307_vm8, %v670_v28  ;;  %1160 = vmatprep.mubr.f32.mxu1 %v1048_v4 }
 0x269   :  { %3322 = vmatprep.mubr.msk.f32.mxu0 %vm307_vm8, %v1049_v5 }
 0x26a   :  { %v684_v36 = vpop.permute.xlu0 %683 }
 0x26b   :  { %v679_v21 = vpop.permute.xlu1 %678 }
 0x26e   :  { %v694_v57 = vpop.permute.xlu0 %693 }
 0x26f   :  { %v689_v25 = vpop.permute.xlu1 %688 }
 0x32e   :  { %v3006_v29 = vpop.f32.mrb[0].mxu1 }
 0x32f   :  { %v3007_v30 = vpop.f32.mrb[1].mxu1 }
 0x330   :  { %v3008_v31 = vadd.f32 %v3007_v30, %v3006_v29 }
 0x332   :  { %v3009_v20 = vpop.f32.mrb[2].mxu1  ;;  %v775_v41 = vadd.f32 %v3008_v31, %v679_v21 }
 0x333   :  { %v3010_v34 = vpop.f32.mrb[3].mxu1 }
 0x334   :  { %v3011_v35 = vadd.f32 %v3010_v34, %v3009_v20 }
 0x336   :  { %v3012_v37 = vpop.f32.mrb[4].mxu1  ;;  %v780_v38 = vadd.f32 %v3011_v35, %v684_v36 }
 0x337   :  { %v3013_v39 = vpop.f32.mrb[5].mxu1  ;;  %v3310_v40 = vpop.f32.mrb[12].mxu0 }
 0x338   :  { %v3014_v42 = vadd.f32 %v3013_v39, %v3012_v37  ;;  %v865_v22 = vadd.f32 %v3310_v40, %v780_v38  ;;  %v859_v43 = vpop.f32.mrb[13].mxu0 }
 0x339   :  { %v860_v44 = vadd.f32 %v859_v43, %v775_v41 }
 0x33a   :  { %v879_v45 = vmax.f32 %v865_v22, 0.0  ;;  %v3015_v46 = vpop.f32.mrb[6].mxu1  ;;  %v785_v47 = vadd.f32 %v3014_v42, %v689_v25 }
 0x33b   :  { %v878_v49 = vmax.f32 %v860_v44, 0.0  ;;  %v3016_v51 = vpop.f32.mrb[7].mxu1  ;;  %v3313_v52 = vpop.f32.mrb[14].mxu0 }
 0x33c   :  { %v3017_v53 = vadd.f32 %v3016_v51, %v3015_v46  ;;  %v869_v54 = vpop.f32.mrb[15].mxu0  ;;  %888 = vrot.lane.b32.xlu0 %v879_v45, %s3747_s9 }
 0x33d   :  { %v870_v60 = vadd.f32 %v869_v54, %v785_v47  ;;  %886 = vrot.lane.b32.xlu1 %v878_v49, %s3747_s9  ;;  %v3464_v61 = vpack.c.bf16 %v879_v45, %v878_v49 }
 0x33e   :  { %v790_v62 = vadd.f32 %v3017_v53, %v694_v57 }
 0x33f   :  { %3465 = vmatprep.subr.bf16.mxu1 %v3464_v61  ;;  %v880_v2 = vmax.f32 %v870_v60, 0.0 }
 0x340   :  { %v875_v63 = vadd.f32 %v3313_v52, %v790_v62  ;;  %968 = vrot.lane.b32.xlu0 %v879_v45, %s3748_s11 }
 0x341   :  { %966 = vrot.lane.b32.xlu1 %v878_v49, %s3748_s11 }
 0x342   :  { %v881_v1 = vmax.f32 %v875_v63, 0.0 }
 0x344   :  { %908 = vrot.lane.b32.xlu0 %v879_v45, %s3749_s12  ;;  %v3468_v3 = vpack.c.bf16 %v881_v1, %v880_v2 }
 0x345   :  { %906 = vrot.lane.b32.xlu1 %v878_v49, %s3749_s12 }
 0x348   :  { %988 = vrot.lane.b32.xlu0 %v879_v45, %s3750_s0 }
 0x349   :  { %986 = vrot.lane.b32.xlu1 %v878_v49, %s3750_s0 }
 0x34c   :  { %928 = vrot.lane.b32.xlu0 %v879_v45, %s3751_s13 }
 0x34d   :  { %926 = vrot.lane.b32.xlu1 %v878_v49, %s3751_s13 }
 0x350   :  { %1008 = vrot.lane.b32.xlu0 %v879_v45, %s3752_s14 }
 0x351   :  { %1006 = vrot.lane.b32.xlu1 %v878_v49, %s3752_s14 }
 0x354   :  { %948 = vrot.lane.b32.xlu0 %v879_v45, %s3753_s15 }
 0x355   :  { %946 = vrot.lane.b32.xlu1 %v878_v49, %s3753_s15 }
 0x358   :  { %892 = vrot.lane.b32.xlu0 %v881_v1, %s3747_s9 }
 0x359   :  { %890 = vrot.lane.b32.xlu1 %v880_v2, %s3747_s9 }
 0x35c   :  { %972 = vrot.lane.b32.xlu0 %v881_v1, %s3748_s11 }
 0x35d   :  { %970 = vrot.lane.b32.xlu1 %v880_v2, %s3748_s11 }
 0x360   :  { %912 = vrot.lane.b32.xlu0 %v881_v1, %s3749_s12 }
 0x361   :  { %910 = vrot.lane.b32.xlu1 %v880_v2, %s3749_s12 }
 0x364   :  { %992 = vrot.lane.b32.xlu0 %v881_v1, %s3750_s0 }
 0x365   :  { %990 = vrot.lane.b32.xlu1 %v880_v2, %s3750_s0 }
 0x368   :  { %932 = vrot.lane.b32.xlu0 %v881_v1, %s3751_s13 }
 0x369   :  { %930 = vrot.lane.b32.xlu1 %v880_v2, %s3751_s13 }
 0x36c   :  { %1012 = vrot.lane.b32.xlu0 %v881_v1, %s3752_s14 }
 0x36d   :  { %1010 = vrot.lane.b32.xlu1 %v880_v2, %s3752_s14 }
 0x370   :  { %952 = vrot.lane.b32.xlu0 %v881_v1, %s3753_s15 }
 0x371   :  { %950 = vrot.lane.b32.xlu1 %v880_v2, %s3753_s15 }
 0x374   :  { %1028 = vrot.lane.b32.xlu0 %v879_v45, %s3754_s16 }
 0x375   :  { %1026 = vrot.lane.b32.xlu1 %v878_v49, %s3754_s16 }
 0x378   :  { %1032 = vrot.lane.b32.xlu0 %v881_v1, %s3754_s16 }
 0x379   :  { %1030 = vrot.lane.b32.xlu1 %v880_v2, %s3754_s16 }
 0x37c   :  { %1071 = vperm.xlu0 %3678, %v2883_v6  }
 0x37d   :  { %1066 = vperm.xlu1 %3679, %v2882_v7  }
 0x380   :  { %1081 = vperm.xlu0 %3678, %v2885_v8  }
 0x381   :  { %1076 = vperm.xlu1 %3679, %v2884_v9  }
 0x3ae   :  { %v889_v10 = vpop.permute.xlu0 %888 }
 0x3af   :  { %v899_v11 = vsel %vm52_vm0, 0.0, %v889_v10  ;;  %v887_v12 = vpop.permute.xlu1 %886  ;;  %v4227_v10 = vld [vmem:[%s4890_s3 + $0x1] ss:$0 sm:$0xff] }
 0x3b0   :  { %v903_v13 = vmul.f32 %v3876_v14, %v899_v11  ;;  %v898_v15 = vsel %vm52_vm0, 0.0, %v887_v12 }
 0x3b1   :  { %v902_v16 = vmul.f32 %v3876_v14, %v898_v15 }
 0x3b2   :  { %v969_v17 = vpop.permute.xlu0 %968 }
 0x3b3   :  { %v3466_v18 = vpack.c.bf16 %v903_v13, %v902_v16  ;;  %v967_v19 = vpop.permute.xlu1 %966  ;;  %v979_v36 = vsel %vm167_vm1, %v969_v17, 0.0 }
 0x3b4   :  { %v978_v37 = vsel %vm167_vm1, %v967_v19, 0.0  ;;  %v983_v22 = vmul.f32 %v3887_v23, %v979_v36 }
 0x3b5   :  { %3467 = vmatpush3.bf16.msra.mxu1 %v3466_v18  ;;  %v982_v43 = vmul.f32 %v3887_v23, %v978_v37 }
 0x3b6   :  { %v909_v26 = vpop.permute.xlu0 %908  ;;  %3469 = vmatprep.subr.bf16.mxu1 %v3468_v3 }
 0x3b7   :  { %v907_v27 = vpop.permute.xlu1 %906  ;;  %v919_v39 = vsel %vm80_vm2, 0.0, %v909_v26  ;;  %v3472_v62 = vpack.c.bf16 %v983_v22, %v982_v43 }
 0x3b8   :  { %v918_v40 = vsel %vm80_vm2, 0.0, %v907_v27  ;;  %v923_v46 = vmul.f32 %v3898_v33, %v919_v39 }
 0x3b9   :  { %v922_v47 = vmul.f32 %v3898_v33, %v918_v40 }
 0x3ba   :  { %v989_v28 = vpop.permute.xlu0 %988 }
 0x3bb   :  { %v987_v29 = vpop.permute.xlu1 %986  ;;  %v999_v51 = vsel %vm196_vm3, %v989_v28, 0.0  ;;  %v3474_v63 = vpack.c.bf16 %v923_v46, %v922_v47 }
 0x3bc   :  { %v998_v52 = vsel %vm196_vm3, %v987_v29, 0.0  ;;  %v1003_v1 = vmul.f32 %v3918_v56, %v999_v51 }
 0x3bd   :  { %v1002_v2 = vmul.f32 %v3918_v56, %v998_v52 }
 0x3be   :  { %v929_v30 = vpop.permute.xlu0 %928 }
 0x3bf   :  { %v927_v31 = vpop.permute.xlu1 %926  ;;  %v939_v4 = vsel %vm109_vm4, 0.0, %v929_v30  ;;  %v3480_v18 = vpack.c.bf16 %v1003_v1, %v1002_v2 }
 0x3c0   :  { %v938_v5 = vsel %vm109_vm4, 0.0, %v927_v31  ;;  %v943_v12 = vmul.f32 %v3927_v0, %v939_v4  ;;  %v1047_v4 = vld [vmem:[#allocation2 + $0xc0] sm:$0xff] }
 0x3c1   :  { %v942_v13 = vmul.f32 %v3927_v0, %v938_v5 }
 0x3c2   :  { %v1009_v20 = vpop.permute.xlu0 %1008 }
 0x3c3   :  { %v1007_v21 = vpop.permute.xlu1 %1006  ;;  %v1019_v19 = vsel %vm225_vm5, %v1009_v20, 0.0  ;;  %v3482_v30 = vpack.c.bf16 %v943_v12, %v942_v13  ;;  %v1050_v12 = vld [vmem:[#allocation2 + $0xd8] sm:$0xff] }
 0x3c4   :  { %v1018_v26 = vsel %vm225_vm5, %v1007_v21, 0.0  ;;  %v1023_v36 = vmul.f32 %v3944_v24, %v1019_v19  ;;  %v1054_v13 = vld [vmem:[#allocation2 + $0xf8] sm:$0xff]  ;;  %v1056_v19 = vld [vmem:[#allocation2 + $0x108] sm:$0xff] }
 0x3c5   :  { %v1022_v37 = vmul.f32 %v3944_v24, %v1018_v26 }
 0x3c6   :  { %v4195_v34 = vpop.permute.xlu0 %948 }
 0x3c7   :  { %v4197_v35 = vpop.permute.xlu1 %946  ;;  %v959_v21 = vsel %vm138_vm6, 0.0, %v4195_v34  ;;  %v3488_v47 = vpack.c.bf16 %v1023_v36, %v1022_v37 }
 0x3c8   :  { %v958_v40 = vsel %vm138_vm6, 0.0, %v4197_v35  ;;  %v963_v43 = vmul.f32 %v3953_v32, %v959_v21 }
 0x3ca   :  { %v893_v38 = vpop.permute.xlu0 %892 }
 0x3cb   :  { %v901_v41 = vsel %vm52_vm0, 0.0, %v893_v38  ;;  %v891_v42 = vpop.permute.xlu1 %890 }
 0x3cc   :  { %v905_v25 = vmul.f32 %v3876_v14, %v901_v41  ;;  %v900_v44 = vsel %vm52_vm0, 0.0, %v891_v42 }
 0x3cd   :  { %v904_v45 = vmul.f32 %v3876_v14, %v900_v44 }
 0x3ce   :  { %v973_v49 = vpop.permute.xlu0 %972 }
 0x3cf   :  { %v3470_v53 = vpack.c.bf16 %v905_v25, %v904_v45  ;;  %v981_v54 = vsel %vm167_vm1, %v973_v49, 0.0  ;;  %v971_v57 = vpop.permute.xlu1 %970  ;;  %v962_v25 = vmul.f32 %v3953_v32, %v958_v40 }
 0x3d0   :  { %v985_v60 = vmul.f32 %v3887_v23, %v981_v54  ;;  %v980_v61 = vsel %vm167_vm1, %v971_v57, 0.0 }
 0x3d1   :  { %v984_v14 = vmul.f32 %v3887_v23, %v980_v61  ;;  %3471 = vmatpush3.bf16.msra.mxu1 %v3470_v53  ;;  %v3490_v51 = vpack.c.bf16 %v963_v43, %v962_v25 }
 0x3d2   :  { %v913_v3 = vpop.permute.xlu0 %912  ;;  %3473 = vmatprep.subr.bf16.mxu1 %v3472_v62 }
 0x3d3   :  { %v921_v6 = vsel %vm80_vm2, 0.0, %v913_v3  ;;  %v911_v7 = vpop.permute.xlu1 %910  ;;  %v3476_v8 = vpack.c.bf16 %v985_v60, %v984_v14 }
 0x3d4   :  { %v925_v9 = vmul.f32 %v3898_v33, %v921_v6  ;;  %v920_v23 = vsel %vm80_vm2, 0.0, %v911_v7  ;;  %v1051_v6 = vld [vmem:[#allocation2 + $0xe0] sm:$0xff] }
 0x3d5   :  { %v924_v11 = vmul.f32 %v4227_v10, %v920_v23  ;;  %3475 = vmatpush3.bf16.msra.mxu1 %v3474_v63 }
 0x3d6   :  { %v993_v15 = vpop.permute.xlu0 %992  ;;  %3477 = vmatprep.subr.bf16.mxu1 %v3476_v8 }
 0x3d7   :  { %v3478_v16 = vpack.c.bf16 %v925_v9, %v924_v11  ;;  %v1001_v17 = vsel %vm196_vm3, %v993_v15, 0.0  ;;  %v991_v33 = vpop.permute.xlu1 %990 }
 0x3d8   :  { %v1005_v27 = vmul.f32 %v3918_v56, %v1001_v17  ;;  %v1000_v28 = vsel %vm196_vm3, %v991_v33, 0.0  ;;  %v1052_v17 = vld [vmem:[#allocation2 + $0xe8] sm:$0xff]  ;;  %v1057_v33 = vld [vmem:[#allocation2 + $0x110] sm:$0xff] }
 0x3d9   :  { %v1004_v29 = vmul.f32 %v3918_v56, %v1000_v28  ;;  %3479 = vmatpush3.bf16.msra.mxu1 %v3478_v16  ;;  %v1053_v16 = vld [vmem:[#allocation2 + $0xf0] sm:$0xff] }
 0x3da   :  { %v933_v31 = vpop.permute.xlu0 %932  ;;  %3481 = vmatprep.subr.bf16.mxu1 %v3480_v18  ;;  %v1055_v18 = vld [vmem:[#allocation2 + $0x100] sm:$0xff] }
 0x3db   :  { %v941_v38 = vsel %vm109_vm4, 0.0, %v933_v31  ;;  %v931_v39 = vpop.permute.xlu1 %930  ;;  %v3484_v20 = vpack.c.bf16 %v1005_v27, %v1004_v29 }
 0x3dc   :  { %v945_v56 = vmul.f32 %v3927_v0, %v941_v38  ;;  %v940_v41 = vsel %vm109_vm4, 0.0, %v931_v39 }
 0x3dd   :  { %v944_v42 = vmul.f32 %v3927_v0, %v940_v41  ;;  %3483 = vmatpush3.bf16.msra.mxu1 %v3482_v30 }
 0x3de   :  { %v1013_v22 = vpop.permute.xlu0 %1012  ;;  %3485 = vmatprep.subr.bf16.mxu1 %v3484_v20 }
 0x3df   :  { %v3486_v44 = vpack.c.bf16 %v945_v56, %v944_v42  ;;  %v1021_v45 = vsel %vm225_vm5, %v1013_v22, 0.0  ;;  %v1011_v34 = vpop.permute.xlu1 %1010 }
 0x3e0   :  { %v1025_v46 = vmul.f32 %v3944_v24, %v1021_v45  ;;  %v1020_v35 = vsel %vm225_vm5, %v1011_v34, 0.0 }
 0x3e1   :  { %v1024_v49 = vmul.f32 %v3944_v24, %v1020_v35  ;;  %3487 = vmatpush3.bf16.msra.mxu1 %v3486_v44 }
 0x3e2   :  { %v953_v0 = vpop.permute.xlu0 %952  ;;  %3489 = vmatprep.subr.bf16.mxu1 %v3488_v47 }
 0x3e3   :  { %v961_v52 = vsel %vm138_vm6, 0.0, %v953_v0  ;;  %v951_v53 = vpop.permute.xlu1 %950  ;;  %v3492_v54 = vpack.c.bf16 %v1025_v46, %v1024_v49 }
 0x3e4   :  { %v965_v57 = vmul.f32 %v3953_v32, %v961_v52  ;;  %v960_v60 = vsel %vm138_vm6, 0.0, %v951_v53 }
 0x3e5   :  { %v964_v61 = vmul.f32 %v3953_v32, %v960_v60  ;;  %3491 = vmatpush3.bf16.msra.mxu1 %v3490_v51 }
 0x3e6   :  { %v1029_v62 = vpop.permute.xlu0 %1028  ;;  %3493 = vmatprep.subr.bf16.mxu1 %v3492_v54 }
 0x3e7   :  { %v3494_v14 = vpack.c.bf16 %v965_v57, %v964_v61  ;;  %v1039_v24 = vsel %vm254_vm7, %v1029_v62, 0.0  ;;  %v1027_v63 = vpop.permute.xlu1 %1026 }
 0x3e8   :  { %v1043_v1 = vmul.f32 %v3970_v55, %v1039_v24  ;;  %v1038_v2 = vsel %vm254_vm7, %v1027_v63, 0.0  ;;  %v2890_v24 = vld [vmem:[%s4889_s2 + $0x60] sm:$0xff]  ;;  %v2893_v63 = vld [vmem:[%s4889_s2 + $0x78] sm:$0xff] }
 0x3e9   :  { %v1042_v3 = vmul.f32 %v3970_v55, %v1038_v2  ;;  %3495 = vmatpush3.bf16.msra.mxu1 %v3494_v14  ;;  %v2891_v14 = vld [vmem:[%s4889_s2 + $0x68] sm:$0xff] }
 0x3ea   :  { %v1033_v5 = vpop.permute.xlu0 %1032 }
 0x3eb   :  { %v1041_v7 = vsel %vm254_vm7, %v1033_v5, 0.0  ;;  %v1031_v32 = vpop.permute.xlu1 %1030  ;;  %v3496_v8 = vpack.c.bf16 %v1043_v1, %v1042_v3  ;;  %v2892_v1 = vld [vmem:[%s4889_s2 + $0x70] sm:$0xff]  ;;  %v4364_v5 = vld [vmem:[%s4890_s3] ss:$0 sm:$0xff] }
 0x3ec   :  { %v1045_v9 = vmul.f32 %v3970_v55, %v1041_v7  ;;  %v1040_v23 = vsel %vm254_vm7, %v1031_v32, 0.0  ;;  %1161 = vmatmul.mubr.f32.vlgmr.msra.gmra.mrb[8].mxu1 %v1047_v4 }
 0x3ed   :  { %v1044_v11 = vmul.f32 %v3970_v55, %v1040_v23  ;;  %3497 = vmatprep.subr.bf16.mxu0 %v3496_v8  ;;  %1165 = vmatprep.mubr.f32.mxu1 %v1051_v6  ;;  %v1058_v55 = vld [vmem:[#allocation2 + $0x118] sm:$0xff] }
 0x3ee   :  { %3499 = vmatpush3.bf16.msra.mxu0 %v3496_v8 }
 0x3ef   :  { %v3500_v15 = vpack.c.bf16 %v1045_v9, %v1044_v11 }
 0x3f0   :  { %1166 = vmatmul.mubr.f32.gmra.mrb[10].mxu1 %v1050_v12 }
 0x3f1   :  { %3501 = vmatprep.subr.bf16.mxu0 %v3500_v15  ;;  %1170 = vmatprep.mubr.f32.mxu1 %v1054_v13 }
 0x3f2   :  { %3503 = vmatpush3.bf16.msra.mxu0 %v3500_v15 }
 0x3f4   :  { %1171 = vmatmul.mubr.f32.gmra.mrb[12].mxu1 %v1053_v16 }
 0x3f5   :  { %3323 = vmatmul.mubr.msk.f32.vlgmr.msra.gmra.mrb[16].mxu0 %vm307_vm8, %v1052_v17  ;;  %1175 = vmatprep.mubr.f32.mxu1 %v1057_v33 }
 0x3f6   :  { %3325 = vmatprep.mubr.msk.f32.mxu0 %vm307_vm8, %v1055_v18 }
 0x3f8   :  { %1176 = vmatmul.mubr.f32.gmra.mrb[14].mxu1 %v1056_v19 }
 0x3f9   :  { %3326 = vmatmul.mubr.msk.f32.gmra.mrb[18].mxu0 %vm307_vm8, %v1058_v55 }
 0x3fb   :  { %v1072_v37 = vpop.permute.xlu0 %1071 }
 0x3fc   :  { %v1067_v30 = vpop.permute.xlu1 %1066 }
 0x3ff   :  { %v1082_v51 = vpop.permute.xlu0 %1081 }
 0x400   :  { %v1077_v22 = vpop.permute.xlu1 %1076 }
 0x4bf   :  { %v3058_v26 = vpop.f32.mrb[8].mxu1 }
 0x4c0   :  { %v3059_v27 = vpop.f32.mrb[9].mxu1 }
 0x4c1   :  { %v3060_v28 = vadd.f32 %v3059_v27, %v3058_v26 }
 0x4c3   :  { %v3061_v29 = vpop.f32.mrb[10].mxu1  ;;  %v1163_v40 = vadd.f32 %v3060_v28, %v1067_v30 }
 0x4c4   :  { %v3062_v31 = vpop.f32.mrb[11].mxu1 }
 0x4c5   :  { %v3063_v36 = vadd.f32 %v3062_v31, %v3061_v29 }
 0x4c7   :  { %v3064_v38 = vpop.f32.mrb[12].mxu1  ;;  %v1168_v39 = vadd.f32 %v3063_v36, %v1072_v37 }
 0x4c8   :  { %v3065_v20 = vpop.f32.mrb[13].mxu1  ;;  %v3324_v21 = vpop.f32.mrb[16].mxu0 }
 0x4c9   :  { %v3066_v56 = vadd.f32 %v3065_v20, %v3064_v38  ;;  %v1253_v41 = vadd.f32 %v3324_v21, %v1168_v39  ;;  %v1247_v42 = vpop.f32.mrb[17].mxu0  ;;  %v4383_v38 = vld [vmem:[%s4890_s3 + $0x5] ss:$0 sm:$0xff] }
 0x4ca   :  { %v1248_v43 = vadd.f32 %v1247_v42, %v1163_v40 }
 0x4cb   :  { %v1267_v25 = vadd.f32 %v1253_v41, %v3984_v48  ;;  %v3067_v44 = vpop.f32.mrb[14].mxu1  ;;  %v1173_v45 = vadd.f32 %v3066_v56, %v1077_v22 }
 0x4cc   :  { %v1266_v34 = vadd.f32 %v1248_v43, %v3986_v50  ;;  %v3068_v46 = vpop.f32.mrb[15].mxu1  ;;  %v3327_v35 = vpop.f32.mrb[18].mxu0 }
 0x4cd   :  { %v4271_v47 = vmax.f32 %v1267_v25, 0.0  ;;  %v3069_v49 = vadd.f32 %v3068_v46, %v3067_v44  ;;  %v1257_v0 = vpop.f32.mrb[19].mxu0 }
 0x4ce   :  { %v4273_v52 = vmax.f32 %v1266_v34, 0.0  ;;  %v1258_v53 = vadd.f32 %v1257_v0, %v1173_v45 }
 0x4cf   :  { %v1178_v54 = vadd.f32 %v3069_v49, %v1082_v51  ;;  %1280 = vrot.lane.b32.xlu0 %v4271_v47, %s3747_s9 }
 0x4d0   :  { %1278 = vrot.lane.b32.xlu1 %v4273_v52, %s3747_s9  ;;  %v3504_v48 = vpack.c.bf16 %v4271_v47, %v4273_v52  ;;  %v1268_v60 = vadd.f32 %v1258_v53, %v4020_v59  ;;  %v1441_v59 = vld [vmem:[#allocation2 + $0x130] sm:$0xff]  ;;  %v4401_v53 = vld [vmem:[%s4890_s3 + $0x6] ss:$0 sm:$0xff] }
 0x4d1   :  { %v1263_v50 = vadd.f32 %v3327_v35, %v1178_v54  ;;  %3336 = vmatprep.mubr.msk.f32.mxu1 %vm307_vm8, %v1441_v59 }
 0x4d2   :  { %3505 = vmatprep.subr.bf16.mxu0 %v3504_v48  ;;  %v4309_v62 = vmax.f32 %v1268_v60, 0.0 }
 0x4d3   :  { %1360 = vrot.lane.b32.xlu0 %v4271_v47, %s3748_s11  ;;  %v1269_v57 = vadd.f32 %v1263_v50, %v4018_v58  ;;  %v1440_v58 = vld [vmem:[#allocation2 + $0x128] sm:$0xff] }
 0x4d4   :  { %1358 = vrot.lane.b32.xlu1 %v4273_v52, %s3748_s11  ;;  %1552 = vmatprep.mubr.f32.mxu0 %v1440_v58 }
 0x4d5   :  { %v4307_v61 = vmax.f32 %v1269_v57, 0.0 }
 0x4d7   :  { %1300 = vrot.lane.b32.xlu0 %v4271_v47, %s3749_s12  ;;  %v3508_v11 = vpack.c.bf16 %v4307_v61, %v4309_v62 }
 0x4d8   :  { %1298 = vrot.lane.b32.xlu1 %v4273_v52, %s3749_s12 }
 0x4db   :  { %1380 = vrot.lane.b32.xlu0 %v4271_v47, %s3750_s0 }
 0x4dc   :  { %1378 = vrot.lane.b32.xlu1 %v4273_v52, %s3750_s0 }
 0x4df   :  { %1320 = vrot.lane.b32.xlu0 %v4271_v47, %s3751_s13 }
 0x4e0   :  { %1318 = vrot.lane.b32.xlu1 %v4273_v52, %s3751_s13 }
 0x4e3   :  { %1400 = vrot.lane.b32.xlu0 %v4271_v47, %s3752_s14 }
 0x4e4   :  { %1398 = vrot.lane.b32.xlu1 %v4273_v52, %s3752_s14 }
 0x4e7   :  { %1340 = vrot.lane.b32.xlu0 %v4271_v47, %s3753_s15 }
 0x4e8   :  { %1338 = vrot.lane.b32.xlu1 %v4273_v52, %s3753_s15 }
 0x4eb   :  { %1284 = vrot.lane.b32.xlu0 %v4307_v61, %s3747_s9 }
 0x4ec   :  { %1282 = vrot.lane.b32.xlu1 %v4309_v62, %s3747_s9 }
 0x4ef   :  { %1364 = vrot.lane.b32.xlu0 %v4307_v61, %s3748_s11 }
 0x4f0   :  { %1362 = vrot.lane.b32.xlu1 %v4309_v62, %s3748_s11 }
 0x4f3   :  { %1304 = vrot.lane.b32.xlu0 %v4307_v61, %s3749_s12 }
 0x4f4   :  { %1302 = vrot.lane.b32.xlu1 %v4309_v62, %s3749_s12 }
 0x4f7   :  { %1384 = vrot.lane.b32.xlu0 %v4307_v61, %s3750_s0 }
 0x4f8   :  { %1382 = vrot.lane.b32.xlu1 %v4309_v62, %s3750_s0 }
 0x4fb   :  { %1324 = vrot.lane.b32.xlu0 %v4307_v61, %s3751_s13 }
 0x4fc   :  { %1322 = vrot.lane.b32.xlu1 %v4309_v62, %s3751_s13 }
 0x4ff   :  { %1404 = vrot.lane.b32.xlu0 %v4307_v61, %s3752_s14 }
 0x500   :  { %1402 = vrot.lane.b32.xlu1 %v4309_v62, %s3752_s14 }
 0x503   :  { %1344 = vrot.lane.b32.xlu0 %v4307_v61, %s3753_s15 }
 0x504   :  { %1342 = vrot.lane.b32.xlu1 %v4309_v62, %s3753_s15 }
 0x507   :  { %1420 = vrot.lane.b32.xlu0 %v4271_v47, %s3754_s16 }
 0x508   :  { %1418 = vrot.lane.b32.xlu1 %v4273_v52, %s3754_s16 }
 0x50b   :  { %1424 = vrot.lane.b32.xlu0 %v4307_v61, %s3754_s16 }
 0x50c   :  { %1422 = vrot.lane.b32.xlu1 %v4309_v62, %s3754_s16 }
 0x50f   :  { %1463 = vperm.xlu0 %3678, %v2891_v14  }
 0x510   :  { %1458 = vperm.xlu1 %3679, %v2890_v24  }
 0x513   :  { %1473 = vperm.xlu0 %3678, %v2893_v63  }
 0x514   :  { %1468 = vperm.xlu1 %3679, %v2892_v1  }
 0x541   :  { %v1281_v2 = vpop.permute.xlu0 %1280 }
 0x542   :  { %v1291_v3 = vsel %vm52_vm0, 0.0, %v1281_v2  ;;  %v1279_v4 = vpop.permute.xlu1 %1278  ;;  %v4414_v2 = vld [vmem:[%s4890_s3 + $0x2] ss:$0 sm:$0xff] }
 0x543   :  { %v1295_v6 = vmul.f32 %v4364_v5, %v1291_v3  ;;  %v1290_v7 = vsel %vm52_vm0, 0.0, %v1279_v4 }
 0x544   :  { %v1294_v32 = vmul.f32 %v4364_v5, %v1290_v7 }
 0x545   :  { %v1361_v8 = vpop.permute.xlu0 %1360 }
 0x546   :  { %v3506_v9 = vpack.c.bf16 %v1295_v6, %v1294_v32  ;;  %v1359_v23 = vpop.permute.xlu1 %1358  ;;  %v1371_v27 = vsel %vm167_vm1, %v1361_v8, 0.0 }
 0x547   :  { %v1370_v28 = vsel %vm167_vm1, %v1359_v23, 0.0  ;;  %v1375_v39 = vmul.f32 %v4383_v38, %v1371_v27 }
 0x548   :  { %3507 = vmatpush3.bf16.msra.mxu0 %v3506_v9  ;;  %v1374_v20 = vmul.f32 %v4383_v38, %v1370_v28 }
 0x549   :  { %v1301_v12 = vpop.permute.xlu0 %1300  ;;  %3509 = vmatprep.subr.bf16.mxu0 %v3508_v11 }
 0x54a   :  { %v1299_v13 = vpop.permute.xlu1 %1298  ;;  %v1311_v30 = vsel %vm80_vm2, 0.0, %v1301_v12  ;;  %v3512_v49 = vpack.c.bf16 %v1375_v39, %v1374_v20 }
 0x54b   :  { %v1310_v31 = vsel %vm80_vm2, 0.0, %v1299_v13  ;;  %v1315_v41 = vmul.f32 %v4227_v10, %v1311_v30 }
 0x54c   :  { %v1314_v42 = vmul.f32 %v4227_v10, %v1310_v31 }
 0x54d   :  { %v1381_v15 = vpop.permute.xlu0 %1380 }
 0x54e   :  { %v1379_v16 = vpop.permute.xlu1 %1378  ;;  %v1391_v43 = vsel %vm196_vm3, %v1381_v15, 0.0  ;;  %v3514_v51 = vpack.c.bf16 %v1315_v41, %v1314_v42 }
 0x54f   :  { %v1390_v25 = vsel %vm196_vm3, %v1379_v16, 0.0  ;;  %v1395_v54 = vmul.f32 %v4401_v53, %v1391_v43 }
 0x550   :  { %v1394_v48 = vmul.f32 %v4401_v53, %v1390_v25 }
 0x551   :  { %v1321_v17 = vpop.permute.xlu0 %1320 }
 0x552   :  { %v1319_v33 = vpop.permute.xlu1 %1318  ;;  %v1331_v57 = vsel %vm109_vm4, 0.0, %v1321_v17  ;;  %v3520_v9 = vpack.c.bf16 %v1395_v54, %v1394_v48 }
 0x553   :  { %v1330_v60 = vsel %vm109_vm4, 0.0, %v1319_v33  ;;  %v1335_v3 = vmul.f32 %v4414_v2, %v1331_v57  ;;  %v4427_v33 = vld [vmem:[%s4890_s3 + $0x7] ss:$0 sm:$0xff] }
 0x554   :  { %v1334_v4 = vmul.f32 %v4414_v2, %v1330_v60  ;;  %v4458_v60 = vld [vmem:[%s4890_s3 + $0x8] ss:$0 sm:$0xff] }
 0x555   :  { %v1401_v18 = vpop.permute.xlu0 %1400 }
 0x556   :  { %v1399_v19 = vpop.permute.xlu1 %1398  ;;  %v1411_v23 = vsel %vm225_vm5, %v1401_v18, 0.0  ;;  %v3522_v16 = vpack.c.bf16 %v1335_v3, %v1334_v4 }
 0x557   :  { %v1410_v11 = vsel %vm225_vm5, %v1399_v19, 0.0  ;;  %v1415_v27 = vmul.f32 %v4427_v33, %v1411_v23  ;;  %v1446_v23 = vld [vmem:[#allocation2 + $0x158] sm:$0xff] }
 0x558   :  { %v1414_v18 = vmul.f32 %v4427_v33, %v1410_v11 }
 0x559   :  { %v4371_v55 = vpop.permute.xlu0 %1340 }
 0x55a   :  { %v4373_v26 = vpop.permute.xlu1 %1338  ;;  %v1351_v30 = vsel %vm138_vm6, 0.0, %v4371_v55  ;;  %v3528_v43 = vpack.c.bf16 %v1415_v27, %v1414_v18  ;;  %v1450_v27 = vld [vmem:[#allocation2 + $0x178] sm:$0xff] }
 0x55b   :  { %v1350_v31 = vsel %vm138_vm6, 0.0, %v4373_v26 }
 0x55d   :  { %v1285_v29 = vpop.permute.xlu0 %1284 }
 0x55e   :  { %v1293_v36 = vsel %vm52_vm0, 0.0, %v1285_v29  ;;  %v1283_v37 = vpop.permute.xlu1 %1282 }
 0x55f   :  { %v1297_v21 = vmul.f32 %v4364_v5, %v1293_v36  ;;  %v1292_v40 = vsel %vm52_vm0, 0.0, %v1283_v37 }
 0x560   :  { %v1296_v56 = vmul.f32 %v4364_v5, %v1292_v40 }
 0x561   :  { %v1365_v22 = vpop.permute.xlu0 %1364 }
 0x562   :  { %v3510_v44 = vpack.c.bf16 %v1297_v21, %v1296_v56  ;;  %v1373_v45 = vsel %vm167_vm1, %v1365_v22, 0.0  ;;  %v1363_v34 = vpop.permute.xlu1 %1362  ;;  %v4442_v21 = vld [vmem:[%s4890_s3 + $0x3] ss:$0 sm:$0xff] }
 0x563   :  { %v1377_v46 = vmul.f32 %v4383_v38, %v1373_v45  ;;  %v1372_v35 = vsel %vm167_vm1, %v1363_v34, 0.0  ;;  %v1355_v40 = vmul.f32 %v4442_v21, %v1351_v30  ;;  %v1354_v55 = vmul.f32 %v4442_v21, %v1350_v31 }
 0x564   :  { %v1376_v0 = vmul.f32 %v4383_v38, %v1372_v35  ;;  %3511 = vmatpush3.bf16.msra.mxu0 %v3510_v44 }
 0x565   :  { %v1305_v50 = vpop.permute.xlu0 %1304  ;;  %3513 = vmatprep.subr.bf16.mxu0 %v3512_v49  ;;  %v3530_v45 = vpack.c.bf16 %v1355_v40, %v1354_v55 }
 0x566   :  { %v1313_v58 = vsel %vm80_vm2, 0.0, %v1305_v50  ;;  %v1303_v59 = vpop.permute.xlu1 %1302  ;;  %v3516_v14 = vpack.c.bf16 %v1377_v46, %v1376_v0 }
 0x567   :  { %v1317_v24 = vmul.f32 %v4227_v10, %v1313_v58  ;;  %v1312_v63 = vsel %vm80_vm2, 0.0, %v1303_v59 }
 0x568   :  { %v1316_v1 = vmul.f32 %v4227_v10, %v1312_v63  ;;  %3515 = vmatpush3.bf16.msra.mxu0 %v3514_v51 }
 0x569   :  { %v1385_v6 = vpop.permute.xlu0 %1384  ;;  %3517 = vmatprep.subr.bf16.mxu0 %v3516_v14 }
 0x56a   :  { %v3518_v7 = vpack.c.bf16 %v1317_v24, %v1316_v1  ;;  %v1393_v32 = vsel %vm196_vm3, %v1385_v6, 0.0  ;;  %v1383_v8 = vpop.permute.xlu1 %1382  ;;  %v1439_v24 = vld [vmem:[#allocation2 + $0x120] sm:$0xff] }
 0x56b   :  { %v1397_v12 = vmul.f32 %v4401_v53, %v1393_v32  ;;  %v1392_v13 = vsel %vm196_vm3, %v1383_v8, 0.0  ;;  %v1443_v1 = vld [vmem:[#allocation2 + $0x140] sm:$0xff] }
 0x56c   :  { %v1396_v15 = vmul.f32 %v4401_v53, %v1392_v13  ;;  %3519 = vmatpush3.bf16.msra.mxu0 %v3518_v7  ;;  %v1444_v13 = vld [vmem:[#allocation2 + $0x148] sm:$0xff] }
 0x56d   :  { %v1325_v17 = vpop.permute.xlu0 %1324  ;;  %3521 = vmatprep.subr.bf16.mxu0 %v3520_v9  ;;  %v1442_v9 = vld [vmem:[#allocation2 + $0x138] sm:$0xff] }
 0x56e   :  { %v1333_v19 = vsel %vm109_vm4, 0.0, %v1325_v17  ;;  %v1323_v28 = vpop.permute.xlu1 %1322  ;;  %v3524_v29 = vpack.c.bf16 %v1397_v12, %v1396_v15  ;;  %v1445_v12 = vld [vmem:[#allocation2 + $0x150] sm:$0xff]  ;;  %v1448_v17 = vld [vmem:[#allocation2 + $0x168] sm:$0xff] }
 0x56f   :  { %v1337_v36 = vmul.f32 %v4414_v2, %v1333_v19  ;;  %v1332_v37 = vsel %vm109_vm4, 0.0, %v1323_v28  ;;  %v1449_v15 = vld [vmem:[#allocation2 + $0x170] sm:$0xff] }
 0x570   :  { %v1336_v39 = vmul.f32 %v4414_v2, %v1332_v37  ;;  %3523 = vmatpush3.bf16.msra.mxu0 %v3522_v16  ;;  %v1447_v16 = vld [vmem:[#allocation2 + $0x160] sm:$0xff] }
 0x571   :  { %v1405_v20 = vpop.permute.xlu0 %1404  ;;  %3525 = vmatprep.subr.bf16.mxu0 %v3524_v29 }
 0x572   :  { %v3526_v56 = vpack.c.bf16 %v1337_v36, %v1336_v39  ;;  %v1413_v26 = vsel %vm225_vm5, %v1405_v20, 0.0  ;;  %v1403_v41 = vpop.permute.xlu1 %1402 }
 0x573   :  { %v1417_v42 = vmul.f32 %v4427_v33, %v1413_v26  ;;  %v1412_v22 = vsel %vm225_vm5, %v1403_v41, 0.0 }
 0x574   :  { %v1416_v25 = vmul.f32 %v4427_v33, %v1412_v22  ;;  %3527 = vmatpush3.bf16.msra.mxu0 %v3526_v56 }
 0x575   :  { %v1345_v44 = vpop.permute.xlu0 %1344  ;;  %3529 = vmatprep.subr.bf16.mxu0 %v3528_v43 }
 0x576   :  { %v1353_v34 = vsel %vm138_vm6, 0.0, %v1345_v44  ;;  %v1343_v46 = vpop.permute.xlu1 %1342  ;;  %v3532_v35 = vpack.c.bf16 %v1417_v42, %v1416_v25 }
 0x577   :  { %v1357_v49 = vmul.f32 %v4442_v21, %v1353_v34  ;;  %v1352_v0 = vsel %vm138_vm6, 0.0, %v1343_v46 }
 0x578   :  { %v1356_v51 = vmul.f32 %v4442_v21, %v1352_v0  ;;  %3531 = vmatpush3.bf16.msra.mxu0 %v3530_v45 }
 0x579   :  { %v1421_v54 = vpop.permute.xlu0 %1420  ;;  %3533 = vmatprep.subr.bf16.mxu0 %v3532_v35 }
 0x57a   :  { %v3534_v48 = vpack.c.bf16 %v1357_v49, %v1356_v51  ;;  %v1431_v50 = vsel %vm254_vm7, %v1421_v54, 0.0  ;;  %v1419_v57 = vpop.permute.xlu1 %1418 }
 0x57b   :  { %v1435_v58 = vmul.f32 %v4458_v60, %v1431_v50  ;;  %v1430_v59 = vsel %vm254_vm7, %v1419_v57, 0.0 }
 0x57c   :  { %v1434_v14 = vmul.f32 %v4458_v60, %v1430_v59  ;;  %3535 = vmatpush3.bf16.msra.mxu0 %v3534_v48 }
 0x57d   :  { %v1425_v63 = vpop.permute.xlu0 %1424 }
 0x57e   :  { %v1433_v3 = vsel %vm254_vm7, %v1425_v63, 0.0  ;;  %v1423_v4 = vpop.permute.xlu1 %1422  ;;  %v3536_v6 = vpack.c.bf16 %v1435_v58, %v1434_v14  ;;  %v1829_v63 = vld [vmem:[#allocation2 + $0x190] sm:$0xff] }
 0x57f   :  { %v1437_v7 = vmul.f32 %v4458_v60, %v1433_v3  ;;  %v1432_v32 = vsel %vm254_vm7, %v1423_v4, 0.0  ;;  %1553 = vmatmul.mubr.f32.vlgmr.msra.gmra.mrb[20].mxu0 %v1439_v24  ;;  %v1828_v24 = vld [vmem:[#allocation2 + $0x188] sm:$0xff]  ;;  %v2898_v3 = vld [vmem:[%s4889_s2 + $0x80] sm:$0xff]  ;;  %v2901_v4 = vld [vmem:[%s4889_s2 + $0x98] sm:$0xff] }
 0x580   :  { %v1436_v8 = vmul.f32 %v4458_v60, %v1432_v32  ;;  %3537 = vmatprep.subr.bf16.mxu1 %v3536_v6  ;;  %1557 = vmatprep.mubr.f32.mxu0 %v1443_v1  ;;  %v2899_v1 = vld [vmem:[%s4889_s2 + $0x88] sm:$0xff] }
 0x581   :  { %3539 = vmatpush3.bf16.msra.mxu1 %v3536_v6  ;;  %v2900_v6 = vld [vmem:[%s4889_s2 + $0x90] sm:$0xff] }
 0x582   :  { %v3540_v11 = vpack.c.bf16 %v1437_v7, %v1436_v8 }
 0x583   :  { %1558 = vmatmul.mubr.f32.gmra.mrb[22].mxu0 %v1442_v9 }
 0x584   :  { %3541 = vmatprep.subr.bf16.mxu1 %v3540_v11  ;;  %1562 = vmatprep.mubr.f32.mxu0 %v1446_v23 }
 0x585   :  { %3543 = vmatpush3.bf16.msra.mxu1 %v3540_v11 }
 0x587   :  { %1563 = vmatmul.mubr.f32.gmra.mrb[24].mxu0 %v1445_v12 }
 0x588   :  { %3337 = vmatmul.mubr.msk.f32.vlgmr.msra.gmra.mrb[16].mxu1 %vm307_vm8, %v1444_v13  ;;  %1567 = vmatprep.mubr.f32.mxu0 %v1449_v15 }
 0x589   :  { %3339 = vmatprep.mubr.msk.f32.mxu1 %vm307_vm8, %v1447_v16 }
 0x58b   :  { %1568 = vmatmul.mubr.f32.gmra.mrb[26].mxu0 %v1448_v17 }
 0x58c   :  { %3340 = vmatmul.mubr.msk.f32.gmra.mrb[18].mxu1 %vm307_vm8, %v1450_v27  ;;  %1940 = vmatprep.mubr.f32.mxu0 %v1828_v24 }
 0x58d   :  { %3350 = vmatprep.mubr.msk.f32.mxu1 %vm307_vm8, %v1829_v63 }
 0x58e   :  { %v1464_v37 = vpop.permute.xlu0 %1463 }
 0x58f   :  { %v1459_v30 = vpop.permute.xlu1 %1458 }
 0x592   :  { %v1474_v51 = vpop.permute.xlu0 %1473 }
 0x593   :  { %v1469_v22 = vpop.permute.xlu1 %1468 }
 0x652   :  { %v3110_v18 = vpop.f32.mrb[20].mxu0 }
 0x653   :  { %v3111_v19 = vpop.f32.mrb[21].mxu0 }
 0x654   :  { %v3112_v28 = vadd.f32 %v3111_v19, %v3110_v18 }
 0x656   :  { %v3113_v29 = vpop.f32.mrb[22].mxu0  ;;  %v1555_v56 = vadd.f32 %v3112_v28, %v1459_v30 }
 0x657   :  { %v3114_v31 = vpop.f32.mrb[23].mxu0 }
 0x658   :  { %v3115_v36 = vadd.f32 %v3114_v31, %v3113_v29 }
 0x65a   :  { %v3116_v39 = vpop.f32.mrb[24].mxu0  ;;  %v1560_v20 = vadd.f32 %v3115_v36, %v1464_v37 }
 0x65b   :  { %v3117_v40 = vpop.f32.mrb[25].mxu0  ;;  %v3338_v55 = vpop.f32.mrb[16].mxu1 }
 0x65c   :  { %v3118_v26 = vadd.f32 %v3117_v40, %v3116_v39  ;;  %v1645_v41 = vadd.f32 %v3338_v55, %v1560_v20  ;;  %v1639_v42 = vpop.f32.mrb[17].mxu1 }
 0x65d   :  { %v1640_v43 = vadd.f32 %v1639_v42, %v1555_v56 }
 0x65e   :  { %v1659_v25 = vmax.f32 %v1645_v41, 0.0  ;;  %v3119_v44 = vpop.f32.mrb[26].mxu0  ;;  %v1565_v45 = vadd.f32 %v3118_v26, %v1469_v22 }
 0x65f   :  { %v1658_v34 = vmax.f32 %v1640_v43, 0.0  ;;  %v3120_v46 = vpop.f32.mrb[27].mxu0  ;;  %v3341_v35 = vpop.f32.mrb[18].mxu1 }
 0x660   :  { %v3121_v49 = vadd.f32 %v3120_v46, %v3119_v44  ;;  %v1649_v0 = vpop.f32.mrb[19].mxu1  ;;  %1668 = vrot.lane.b32.xlu0 %v1659_v25, %s3747_s9 }
 0x661   :  { %v1650_v54 = vadd.f32 %v1649_v0, %v1565_v45  ;;  %1666 = vrot.lane.b32.xlu1 %v1658_v34, %s3747_s9  ;;  %v3544_v48 = vpack.c.bf16 %v1659_v25, %v1658_v34 }
 0x662   :  { %v1570_v50 = vadd.f32 %v3121_v49, %v1474_v51 }
 0x663   :  { %3545 = vmatprep.subr.bf16.mxu0 %v3544_v48  ;;  %v1660_v59 = vmax.f32 %v1650_v54, 0.0 }
 0x664   :  { %v1655_v57 = vadd.f32 %v3341_v35, %v1570_v50  ;;  %1748 = vrot.lane.b32.xlu0 %v1659_v25, %s3748_s11 }
 0x665   :  { %1746 = vrot.lane.b32.xlu1 %v1658_v34, %s3748_s11 }
 0x666   :  { %v1661_v58 = vmax.f32 %v1655_v57, 0.0 }
 0x668   :  { %1688 = vrot.lane.b32.xlu0 %v1659_v25, %s3749_s12  ;;  %v3548_v14 = vpack.c.bf16 %v1661_v58, %v1660_v59 }
 0x669   :  { %1686 = vrot.lane.b32.xlu1 %v1658_v34, %s3749_s12 }
 0x66c   :  { %1768 = vrot.lane.b32.xlu0 %v1659_v25, %s3750_s0 }
 0x66d   :  { %1766 = vrot.lane.b32.xlu1 %v1658_v34, %s3750_s0 }
 0x670   :  { %1708 = vrot.lane.b32.xlu0 %v1659_v25, %s3751_s13 }
 0x671   :  { %1706 = vrot.lane.b32.xlu1 %v1658_v34, %s3751_s13 }
 0x674   :  { %1788 = vrot.lane.b32.xlu0 %v1659_v25, %s3752_s14 }
 0x675   :  { %1786 = vrot.lane.b32.xlu1 %v1658_v34, %s3752_s14 }
 0x678   :  { %1728 = vrot.lane.b32.xlu0 %v1659_v25, %s3753_s15 }
 0x679   :  { %1726 = vrot.lane.b32.xlu1 %v1658_v34, %s3753_s15 }
 0x67c   :  { %1672 = vrot.lane.b32.xlu0 %v1661_v58, %s3747_s9 }
 0x67d   :  { %1670 = vrot.lane.b32.xlu1 %v1660_v59, %s3747_s9 }
 0x680   :  { %1752 = vrot.lane.b32.xlu0 %v1661_v58, %s3748_s11 }
 0x681   :  { %1750 = vrot.lane.b32.xlu1 %v1660_v59, %s3748_s11 }
 0x684   :  { %1692 = vrot.lane.b32.xlu0 %v1661_v58, %s3749_s12 }
 0x685   :  { %1690 = vrot.lane.b32.xlu1 %v1660_v59, %s3749_s12 }
 0x688   :  { %1772 = vrot.lane.b32.xlu0 %v1661_v58, %s3750_s0 }
 0x689   :  { %1770 = vrot.lane.b32.xlu1 %v1660_v59, %s3750_s0 }
 0x68c   :  { %1712 = vrot.lane.b32.xlu0 %v1661_v58, %s3751_s13 }
 0x68d   :  { %1710 = vrot.lane.b32.xlu1 %v1660_v59, %s3751_s13 }
 0x690   :  { %1792 = vrot.lane.b32.xlu0 %v1661_v58, %s3752_s14 }
 0x691   :  { %1790 = vrot.lane.b32.xlu1 %v1660_v59, %s3752_s14 }
 0x694   :  { %1732 = vrot.lane.b32.xlu0 %v1661_v58, %s3753_s15 }
 0x695   :  { %1730 = vrot.lane.b32.xlu1 %v1660_v59, %s3753_s15 }
 0x698   :  { %1808 = vrot.lane.b32.xlu0 %v1659_v25, %s3754_s16 }
 0x699   :  { %1806 = vrot.lane.b32.xlu1 %v1658_v34, %s3754_s16 }
 0x69c   :  { %1812 = vrot.lane.b32.xlu0 %v1661_v58, %s3754_s16 }
 0x69d   :  { %1810 = vrot.lane.b32.xlu1 %v1660_v59, %s3754_s16 }
 0x6a0   :  { %1851 = vperm.xlu0 %3678, %v2899_v1  }
 0x6a1   :  { %1846 = vperm.xlu1 %3679, %v2898_v3  }
 0x6a4   :  { %1861 = vperm.xlu0 %3678, %v2901_v4  }
 0x6a5   :  { %1856 = vperm.xlu1 %3679, %v2900_v6  }
 0x6d2   :  { %v1669_v7 = vpop.permute.xlu0 %1668 }
 0x6d3   :  { %v1679_v32 = vsel %vm52_vm0, 0.0, %v1669_v7  ;;  %v1667_v8 = vpop.permute.xlu1 %1666 }
 0x6d4   :  { %v1683_v9 = vmul.f32 %v4364_v5, %v1679_v32  ;;  %v1678_v23 = vsel %vm52_vm0, 0.0, %v1667_v8 }
 0x6d5   :  { %v1682_v11 = vmul.f32 %v4364_v5, %v1678_v23 }
 0x6d6   :  { %v1749_v12 = vpop.permute.xlu0 %1748 }
 0x6d7   :  { %v3546_v13 = vpack.c.bf16 %v1683_v9, %v1682_v11  ;;  %v1747_v15 = vpop.permute.xlu1 %1746  ;;  %v1759_v37 = vsel %vm167_vm1, %v1749_v12, 0.0 }
 0x6d8   :  { %v1758_v39 = vsel %vm167_vm1, %v1747_v15, 0.0  ;;  %v1763_v41 = vmul.f32 %v4383_v38, %v1759_v37 }
 0x6d9   :  { %3547 = vmatpush3.bf16.msra.mxu0 %v3546_v13  ;;  %v1762_v42 = vmul.f32 %v4383_v38, %v1758_v39 }
 0x6da   :  { %v1689_v16 = vpop.permute.xlu0 %1688  ;;  %3549 = vmatprep.subr.bf16.mxu0 %v3548_v14 }
 0x6db   :  { %v1687_v17 = vpop.permute.xlu1 %1686  ;;  %v1699_v40 = vsel %vm80_vm2, 0.0, %v1689_v16  ;;  %v3552_v50 = vpack.c.bf16 %v1763_v41, %v1762_v42 }
 0x6dc   :  { %v1698_v55 = vsel %vm80_vm2, 0.0, %v1687_v17  ;;  %v1703_v44 = vmul.f32 %v4227_v10, %v1699_v40 }
 0x6dd   :  { %v1702_v45 = vmul.f32 %v4227_v10, %v1698_v55 }
 0x6de   :  { %v1769_v27 = vpop.permute.xlu0 %1768 }
 0x6df   :  { %v1767_v18 = vpop.permute.xlu1 %1766  ;;  %v1779_v46 = vsel %vm196_vm3, %v1769_v27, 0.0  ;;  %v3554_v58 = vpack.c.bf16 %v1703_v44, %v1702_v45 }
 0x6e0   :  { %v1778_v35 = vsel %vm196_vm3, %v1767_v18, 0.0  ;;  %v1783_v59 = vmul.f32 %v4401_v53, %v1779_v46 }
 0x6e1   :  { %v1782_v14 = vmul.f32 %v4401_v53, %v1778_v35 }
 0x6e2   :  { %v1709_v19 = vpop.permute.xlu0 %1708 }
 0x6e3   :  { %v1707_v28 = vpop.permute.xlu1 %1706  ;;  %v1719_v63 = vsel %vm109_vm4, 0.0, %v1709_v19  ;;  %v3560_v16 = vpack.c.bf16 %v1783_v59, %v1782_v14 }
 0x6e4   :  { %v1718_v1 = vsel %vm109_vm4, 0.0, %v1707_v28  ;;  %v1723_v9 = vmul.f32 %v4414_v2, %v1719_v63 }
 0x6e5   :  { %v1722_v23 = vmul.f32 %v4414_v2, %v1718_v1 }
 0x6e6   :  { %v1789_v29 = vpop.permute.xlu0 %1788 }
 0x6e7   :  { %v1787_v30 = vpop.permute.xlu1 %1786  ;;  %v1799_v17 = vsel %vm225_vm5, %v1789_v29, 0.0  ;;  %v3562_v28 = vpack.c.bf16 %v1723_v9, %v1722_v23 }
 0x6e8   :  { %v1798_v27 = vsel %vm225_vm5, %v1787_v30, 0.0  ;;  %v1803_v39 = vmul.f32 %v4427_v33, %v1799_v17 }
 0x6ea   :  { %v4519_v31 = vpop.permute.xlu0 %1728 }
 0x6eb   :  { %v4521_v36 = vpop.permute.xlu1 %1726  ;;  %v1739_v30 = vsel %vm138_vm6, 0.0, %v4519_v31 }
 0x6ee   :  { %v1673_v20 = vpop.permute.xlu0 %1672 }
 0x6ef   :  { %v1681_v56 = vsel %vm52_vm0, 0.0, %v1673_v20  ;;  %v1671_v26 = vpop.permute.xlu1 %1670  ;;  %v1802_v20 = vmul.f32 %v4427_v33, %v1798_v27  ;;  %v1833_v27 = vld [vmem:[#allocation2 + $0x1b0] sm:$0xff] }
 0x6f0   :  { %v1685_v22 = vmul.f32 %v4364_v5, %v1681_v56  ;;  %v1680_v43 = vsel %vm52_vm0, 0.0, %v1671_v26  ;;  %v1738_v56 = vsel %vm138_vm6, 0.0, %v4521_v36 }
 0x6f1   :  { %v1684_v25 = vmul.f32 %v4364_v5, %v1680_v43  ;;  %v1743_v43 = vmul.f32 %v4442_v21, %v1739_v30 }
 0x6f2   :  { %v1753_v34 = vpop.permute.xlu0 %1752 }
 0x6f3   :  { %v3550_v49 = vpack.c.bf16 %v1685_v22, %v1684_v25  ;;  %v1761_v0 = vsel %vm167_vm1, %v1753_v34, 0.0  ;;  %v1751_v51 = vpop.permute.xlu1 %1750  ;;  %v1742_v25 = vmul.f32 %v4442_v21, %v1738_v56  ;;  %v3568_v34 = vpack.c.bf16 %v1803_v39, %v1802_v20 }
 0x6f4   :  { %v1765_v54 = vmul.f32 %v4383_v38, %v1761_v0  ;;  %v1760_v48 = vsel %vm167_vm1, %v1751_v51, 0.0 }
 0x6f5   :  { %v1764_v57 = vmul.f32 %v4383_v38, %v1760_v48  ;;  %3551 = vmatpush3.bf16.msra.mxu0 %v3550_v49  ;;  %v3570_v0 = vpack.c.bf16 %v1743_v43, %v1742_v25 }
 0x6f6   :  { %v1693_v24 = vpop.permute.xlu0 %1692  ;;  %3553 = vmatprep.subr.bf16.mxu0 %v3552_v50 }
 0x6f7   :  { %v3556_v3 = vpack.c.bf16 %v1765_v54, %v1764_v57  ;;  %v1701_v4 = vsel %vm80_vm2, 0.0, %v1693_v24  ;;  %v1691_v6 = vpop.permute.xlu1 %1690 }
 0x6f8   :  { %v1705_v7 = vmul.f32 %v4227_v10, %v1701_v4  ;;  %v1700_v32 = vsel %vm80_vm2, 0.0, %v1691_v6  ;;  %v1827_v6 = vld [vmem:[#allocation2 + $0x180] sm:$0xff] }
 0x6f9   :  { %v1704_v8 = vmul.f32 %v4227_v10, %v1700_v32  ;;  %3555 = vmatpush3.bf16.msra.mxu0 %v3554_v58  ;;  %v1831_v32 = vld [vmem:[#allocation2 + $0x1a0] sm:$0xff] }
 0x6fa   :  { %v1773_v11 = vpop.permute.xlu0 %1772  ;;  %3557 = vmatprep.subr.bf16.mxu0 %v3556_v3 }
 0x6fb   :  { %v3558_v12 = vpack.c.bf16 %v1705_v7, %v1704_v8  ;;  %v1781_v13 = vsel %vm196_vm3, %v1773_v11, 0.0  ;;  %v1771_v15 = vpop.permute.xlu1 %1770 }
 0x6fc   :  { %v1785_v18 = vmul.f32 %v4401_v53, %v1781_v13  ;;  %v1780_v10 = vsel %vm196_vm3, %v1771_v15, 0.0  ;;  %v1830_v15 = vld [vmem:[#allocation2 + $0x198] sm:$0xff] }
 0x6fd   :  { %v1784_v19 = vmul.f32 %v4401_v53, %v1780_v10  ;;  %3559 = vmatpush3.bf16.msra.mxu0 %v3558_v12  ;;  %v1837_v10 = vld [vmem:[#allocation2 + $0x1d0] sm:$0xff] }
 0x6fe   :  { %v1713_v37 = vpop.permute.xlu0 %1712  ;;  %3561 = vmatprep.subr.bf16.mxu0 %v3560_v16  ;;  %v1834_v16 = vld [vmem:[#allocation2 + $0x1b8] sm:$0xff] }
 0x6ff   :  { %v3564_v40 = vpack.c.bf16 %v1785_v18, %v1784_v19  ;;  %v1721_v55 = vsel %vm109_vm4, 0.0, %v1713_v37  ;;  %v1711_v29 = vpop.permute.xlu1 %1710  ;;  %v1832_v18 = vld [vmem:[#allocation2 + $0x1a8] sm:$0xff]  ;;  %v1835_v19 = vld [vmem:[#allocation2 + $0x1c0] sm:$0xff]  ;;  %v1838_v37 = vld [vmem:[#allocation2 + $0x1d8] sm:$0xff] }
 0x700   :  { %v1725_v26 = vmul.f32 %v4414_v2, %v1721_v55  ;;  %v1720_v41 = vsel %vm109_vm4, 0.0, %v1711_v29 }
 0x701   :  { %v1724_v42 = vmul.f32 %v4414_v2, %v1720_v41  ;;  %3563 = vmatpush3.bf16.msra.mxu0 %v3562_v28  ;;  %v1836_v28 = vld [vmem:[#allocation2 + $0x1c8] sm:$0xff] }
 0x702   :  { %v1793_v22 = vpop.permute.xlu0 %1792  ;;  %3565 = vmatprep.subr.bf16.mxu0 %v3564_v40 }
 0x703   :  { %v3566_v44 = vpack.c.bf16 %v1725_v26, %v1724_v42  ;;  %v1801_v45 = vsel %vm225_vm5, %v1793_v22, 0.0  ;;  %v1791_v31 = vpop.permute.xlu1 %1790 }
 0x704   :  { %v1805_v36 = vmul.f32 %v4427_v33, %v1801_v45  ;;  %v1800_v46 = vsel %vm225_vm5, %v1791_v31, 0.0 }
 0x705   :  { %v1804_v35 = vmul.f32 %v4427_v33, %v1800_v46  ;;  %3567 = vmatpush3.bf16.msra.mxu0 %v3566_v44 }
 0x706   :  { %v1733_v49 = vpop.permute.xlu0 %1732  ;;  %3569 = vmatprep.subr.bf16.mxu0 %v3568_v34 }
 0x707   :  { %v3572_v51 = vpack.c.bf16 %v1805_v36, %v1804_v35  ;;  %v1741_v54 = vsel %vm138_vm6, 0.0, %v1733_v49  ;;  %v1731_v48 = vpop.permute.xlu1 %1730 }
 0x708   :  { %v1745_v50 = vmul.f32 %v4442_v21, %v1741_v54  ;;  %v1740_v57 = vsel %vm138_vm6, 0.0, %v1731_v48 }
 0x709   :  { %v1744_v58 = vmul.f32 %v4442_v21, %v1740_v57  ;;  %3571 = vmatpush3.bf16.msra.mxu0 %v3570_v0 }
 0x70a   :  { %v1809_v59 = vpop.permute.xlu0 %1808  ;;  %3573 = vmatprep.subr.bf16.mxu0 %v3572_v51 }
 0x70b   :  { %v3574_v14 = vpack.c.bf16 %v1745_v50, %v1744_v58  ;;  %v1819_v24 = vsel %vm254_vm7, %v1809_v59, 0.0  ;;  %v1807_v63 = vpop.permute.xlu1 %1806 }
 0x70c   :  { %v1823_v1 = vmul.f32 %v4458_v60, %v1819_v24  ;;  %v1818_v3 = vsel %vm254_vm7, %v1807_v63, 0.0 }
 0x70d   :  { %v1822_v4 = vmul.f32 %v4458_v60, %v1818_v3  ;;  %3575 = vmatpush3.bf16.msra.mxu0 %v3574_v14 }
 0x70e   :  { %v1813_v7 = vpop.permute.xlu0 %1812 }
 0x70f   :  { %v3576_v8 = vpack.c.bf16 %v1823_v1, %v1822_v4  ;;  %v1821_v9 = vsel %vm254_vm7, %v1813_v7, 0.0  ;;  %v1811_v23 = vpop.permute.xlu1 %1810  ;;  %v2906_v7 = vld [vmem:[%s4889_s2 + $0xa0] sm:$0xff] }
 0x710   :  { %v1825_v11 = vmul.f32 %v4458_v60, %v1821_v9  ;;  %v1820_v12 = vsel %vm254_vm7, %v1811_v23, 0.0  ;;  %1941 = vmatmul.mubr.f32.vlgmr.msra.gmra.mrb[28].mxu0 %v1827_v6  ;;  %v2907_v6 = vld [vmem:[%s4889_s2 + $0xa8] sm:$0xff] }
 0x711   :  { %v1824_v13 = vmul.f32 %v4458_v60, %v1820_v12  ;;  %3577 = vmatprep.subr.bf16.mxu1 %v3576_v8  ;;  %1945 = vmatprep.mubr.f32.mxu0 %v1831_v32  ;;  %v2909_v32 = vld [vmem:[%s4889_s2 + $0xb8] sm:$0xff] }
 0x712   :  { %3579 = vmatpush3.bf16.msra.mxu1 %v3576_v8  ;;  %v2908_v8 = vld [vmem:[%s4889_s2 + $0xb0] sm:$0xff] }
 0x713   :  { %v3580_v17 = vpack.c.bf16 %v1825_v11, %v1824_v13 }
 0x714   :  { %1946 = vmatmul.mubr.f32.gmra.mrb[30].mxu0 %v1830_v15 }
 0x715   :  { %3581 = vmatprep.subr.bf16.mxu1 %v3580_v17  ;;  %1950 = vmatprep.mubr.f32.mxu0 %v1834_v16 }
 0x716   :  { %3583 = vmatpush3.bf16.msra.mxu1 %v3580_v17 }
 0x718   :  { %1951 = vmatmul.mubr.f32.gmra.mrb[32].mxu0 %v1833_v27 }
 0x719   :  { %3351 = vmatmul.mubr.msk.f32.vlgmr.msra.gmra.mrb[20].mxu1 %vm307_vm8, %v1832_v18  ;;  %1955 = vmatprep.mubr.f32.mxu0 %v1837_v10 }
 0x71a   :  { %3353 = vmatprep.mubr.msk.f32.mxu1 %vm307_vm8, %v1835_v19 }
 0x71c   :  { %1956 = vmatmul.mubr.f32.gmra.mrb[34].mxu0 %v1836_v28 }
 0x71d   :  { %3354 = vmatmul.mubr.msk.f32.gmra.mrb[22].mxu1 %vm307_vm8, %v1838_v37 }
 0x71f   :  { %v1852_v26 = vpop.permute.xlu0 %1851 }
 0x720   :  { %v1847_v29 = vpop.permute.xlu1 %1846 }
 0x723   :  { %v1862_v58 = vpop.permute.xlu0 %1861 }
 0x724   :  { %v1857_v34 = vpop.permute.xlu1 %1856 }
 0x7e3   :  { %v3162_v39 = vpop.f32.mrb[28].mxu0 }
 0x7e4   :  { %v3163_v20 = vpop.f32.mrb[29].mxu0 }
 0x7e5   :  { %v3164_v40 = vadd.f32 %v3163_v20, %v3162_v39 }
 0x7e7   :  { %v3165_v55 = vpop.f32.mrb[30].mxu0  ;;  %v1943_v25 = vadd.f32 %v3164_v40, %v1847_v29 }
 0x7e8   :  { %v3166_v30 = vpop.f32.mrb[31].mxu0 }
 0x7e9   :  { %v3167_v56 = vadd.f32 %v3166_v30, %v3165_v55 }
 0x7eb   :  { %v3168_v41 = vpop.f32.mrb[32].mxu0  ;;  %v1948_v42 = vadd.f32 %v3167_v56, %v1852_v26 }
 0x7ec   :  { %v3169_v22 = vpop.f32.mrb[33].mxu0  ;;  %v3352_v43 = vpop.f32.mrb[20].mxu1 }
 0x7ed   :  { %v3170_v44 = vadd.f32 %v3169_v22, %v3168_v41  ;;  %v2033_v45 = vadd.f32 %v3352_v43, %v1948_v42  ;;  %v2027_v31 = vpop.f32.mrb[21].mxu1 }
 0x7ee   :  { %v2028_v36 = vadd.f32 %v2027_v31, %v1943_v25 }
 0x7ef   :  { %v2047_v46 = vadd.f32 %v2033_v45, %v4271_v47  ;;  %v3171_v35 = vpop.f32.mrb[34].mxu0  ;;  %v1953_v49 = vadd.f32 %v3170_v44, %v1857_v34 }
 0x7f0   :  { %v2046_v0 = vadd.f32 %v2028_v36, %v4273_v52  ;;  %v3172_v51 = vpop.f32.mrb[35].mxu0  ;;  %v3355_v54 = vpop.f32.mrb[22].mxu1 }
 0x7f1   :  { %v4590_v48 = vmax.f32 %v2047_v46, 0.0  ;;  %v3173_v50 = vadd.f32 %v3172_v51, %v3171_v35  ;;  %v2037_v57 = vpop.f32.mrb[23].mxu1  ;;  %v4702_v46 = vld [vmem:[%s4890_s3 + $0x1] ss:$0 sm:$0xff] }
 0x7f2   :  { %v4592_v59 = vmax.f32 %v2046_v0, 0.0  ;;  %v2038_v14 = vadd.f32 %v2037_v57, %v1953_v49 }
 0x7f3   :  { %v1958_v24 = vadd.f32 %v3173_v50, %v1862_v58  ;;  %2060 = vrot.lane.b32.xlu0 %v4590_v48, %s3747_s9 }
 0x7f4   :  { %2058 = vrot.lane.b32.xlu1 %v4592_v59, %s3747_s9  ;;  %v3584_v47 = vpack.c.bf16 %v4590_v48, %v4592_v59  ;;  %v2048_v1 = vadd.f32 %v2038_v14, %v4309_v62  ;;  %v2221_v62 = vld [vmem:[#allocation2 + $0x1f0] sm:$0xff] }
 0x7f5   :  { %v2043_v52 = vadd.f32 %v3355_v54, %v1958_v24  ;;  %3364 = vmatprep.mubr.msk.f32.mxu0 %vm307_vm8, %v2221_v62 }
 0x7f6   :  { %3585 = vmatprep.subr.bf16.mxu1 %v3584_v47  ;;  %v4628_v4 = vmax.f32 %v2048_v1, 0.0 }
 0x7f7   :  { %2140 = vrot.lane.b32.xlu0 %v4590_v48, %s3748_s11  ;;  %v2049_v63 = vadd.f32 %v2043_v52, %v4307_v61  ;;  %v2220_v61 = vld [vmem:[#allocation2 + $0x1e8] sm:$0xff] }
 0x7f8   :  { %2138 = vrot.lane.b32.xlu1 %v4592_v59, %s3748_s11  ;;  %2332 = vmatprep.mubr.f32.mxu1 %v2220_v61 }
 0x7f9   :  { %v4626_v3 = vmax.f32 %v2049_v63, 0.0 }
 0x7fb   :  { %2080 = vrot.lane.b32.xlu0 %v4590_v48, %s3749_s12  ;;  %v3588_v18 = vpack.c.bf16 %v4626_v3, %v4628_v4 }
 0x7fc   :  { %2078 = vrot.lane.b32.xlu1 %v4592_v59, %s3749_s12 }
 0x7ff   :  { %2160 = vrot.lane.b32.xlu0 %v4590_v48, %s3750_s0 }
 0x800   :  { %2158 = vrot.lane.b32.xlu1 %v4592_v59, %s3750_s0 }
 0x803   :  { %2100 = vrot.lane.b32.xlu0 %v4590_v48, %s3751_s13 }
 0x804   :  { %2098 = vrot.lane.b32.xlu1 %v4592_v59, %s3751_s13 }
 0x807   :  { %2180 = vrot.lane.b32.xlu0 %v4590_v48, %s3752_s14 }
 0x808   :  { %2178 = vrot.lane.b32.xlu1 %v4592_v59, %s3752_s14 }
 0x80b   :  { %2120 = vrot.lane.b32.xlu0 %v4590_v48, %s3753_s15 }
 0x80c   :  { %2118 = vrot.lane.b32.xlu1 %v4592_v59, %s3753_s15 }
 0x80f   :  { %2064 = vrot.lane.b32.xlu0 %v4626_v3, %s3747_s9 }
 0x810   :  { %2062 = vrot.lane.b32.xlu1 %v4628_v4, %s3747_s9 }
 0x813   :  { %2144 = vrot.lane.b32.xlu0 %v4626_v3, %s3748_s11 }
 0x814   :  { %2142 = vrot.lane.b32.xlu1 %v4628_v4, %s3748_s11 }
 0x817   :  { %2084 = vrot.lane.b32.xlu0 %v4626_v3, %s3749_s12 }
 0x818   :  { %2082 = vrot.lane.b32.xlu1 %v4628_v4, %s3749_s12 }
 0x81b   :  { %2164 = vrot.lane.b32.xlu0 %v4626_v3, %s3750_s0 }
 0x81c   :  { %2162 = vrot.lane.b32.xlu1 %v4628_v4, %s3750_s0 }
 0x81f   :  { %2104 = vrot.lane.b32.xlu0 %v4626_v3, %s3751_s13 }
 0x820   :  { %2102 = vrot.lane.b32.xlu1 %v4628_v4, %s3751_s13 }
 0x823   :  { %2184 = vrot.lane.b32.xlu0 %v4626_v3, %s3752_s14 }
 0x824   :  { %2182 = vrot.lane.b32.xlu1 %v4628_v4, %s3752_s14 }
 0x827   :  { %2124 = vrot.lane.b32.xlu0 %v4626_v3, %s3753_s15 }
 0x828   :  { %2122 = vrot.lane.b32.xlu1 %v4628_v4, %s3753_s15 }
 0x82b   :  { %2200 = vrot.lane.b32.xlu0 %v4590_v48, %s3754_s16 }
 0x82c   :  { %2198 = vrot.lane.b32.xlu1 %v4592_v59, %s3754_s16 }
 0x82f   :  { %2204 = vrot.lane.b32.xlu0 %v4626_v3, %s3754_s16 }
 0x830   :  { %2202 = vrot.lane.b32.xlu1 %v4628_v4, %s3754_s16 }
 0x833   :  { %2243 = vperm.xlu0 %3678, %v2907_v6  }
 0x834   :  { %2238 = vperm.xlu1 %3679, %v2906_v7  }
 0x837   :  { %2253 = vperm.xlu0 %3678, %v2909_v32  }
 0x838   :  { %2248 = vperm.xlu1 %3679, %v2908_v8  }
 0x865   :  { %v2061_v9 = vpop.permute.xlu0 %2060 }
 0x866   :  { %v2071_v23 = vsel %vm52_vm0, 0.0, %v2061_v9  ;;  %v2059_v11 = vpop.permute.xlu1 %2058 }
 0x867   :  { %v2075_v12 = vmul.f32 %v4364_v5, %v2071_v23  ;;  %v2070_v13 = vsel %vm52_vm0, 0.0, %v2059_v11 }
 0x868   :  { %v2074_v15 = vmul.f32 %v4364_v5, %v2070_v13 }
 0x869   :  { %v2141_v16 = vpop.permute.xlu0 %2140 }
 0x86a   :  { %v3586_v17 = vpack.c.bf16 %v2075_v12, %v2074_v15  ;;  %v2139_v27 = vpop.permute.xlu1 %2138  ;;  %v2151_v56 = vsel %vm167_vm1, %v2141_v16, 0.0 }
 0x86b   :  { %v2150_v26 = vsel %vm167_vm1, %v2139_v27, 0.0  ;;  %v2155_v44 = vmul.f32 %v4383_v38, %v2151_v56 }
 0x86c   :  { %3587 = vmatpush3.bf16.msra.mxu1 %v3586_v17  ;;  %v2154_v45 = vmul.f32 %v4383_v38, %v2150_v26 }
 0x86d   :  { %v2081_v10 = vpop.permute.xlu0 %2080  ;;  %3589 = vmatprep.subr.bf16.mxu1 %v3588_v18 }
 0x86e   :  { %v2079_v19 = vpop.permute.xlu1 %2078  ;;  %v2091_v42 = vsel %vm80_vm2, 0.0, %v2081_v10  ;;  %v3592_v14 = vpack.c.bf16 %v2155_v44, %v2154_v45 }
 0x86f   :  { %v2090_v22 = vsel %vm80_vm2, 0.0, %v2079_v19  ;;  %v2095_v35 = vmul.f32 %v4702_v46, %v2091_v42 }
 0x870   :  { %v2094_v49 = vmul.f32 %v4702_v46, %v2090_v22 }
 0x871   :  { %v2161_v28 = vpop.permute.xlu0 %2160 }
 0x872   :  { %v2159_v37 = vpop.permute.xlu1 %2158  ;;  %v2171_v51 = vsel %vm196_vm3, %v2161_v28, 0.0  ;;  %v3594_v52 = vpack.c.bf16 %v2095_v35, %v2094_v49 }
 0x873   :  { %v2170_v54 = vsel %vm196_vm3, %v2159_v37, 0.0  ;;  %v2175_v63 = vmul.f32 %v4401_v53, %v2171_v51 }
 0x874   :  { %v2174_v1 = vmul.f32 %v4401_v53, %v2170_v54 }
 0x875   :  { %v2101_v39 = vpop.permute.xlu0 %2100 }
 0x876   :  { %v2099_v20 = vpop.permute.xlu1 %2098  ;;  %v2111_v62 = vsel %vm109_vm4, 0.0, %v2101_v39  ;;  %v3600_v15 = vpack.c.bf16 %v2175_v63, %v2174_v1 }
 0x877   :  { %v2110_v6 = vsel %vm109_vm4, 0.0, %v2099_v20  ;;  %v2115_v11 = vmul.f32 %v4414_v2, %v2111_v62  ;;  %v2219_v62 = vld [vmem:[#allocation2 + $0x1e0] sm:$0xff] }
 0x878   :  { %v2114_v12 = vmul.f32 %v4414_v2, %v2110_v6 }
 0x879   :  { %v2181_v40 = vpop.permute.xlu0 %2180 }
 0x87a   :  { %v2179_v55 = vpop.permute.xlu1 %2178  ;;  %v2191_v18 = vsel %vm225_vm5, %v2181_v40, 0.0  ;;  %v3602_v39 = vpack.c.bf16 %v2115_v11, %v2114_v12  ;;  %v2222_v11 = vld [vmem:[#allocation2 + $0x1f8] sm:$0xff] }
 0x87b   :  { %v2190_v10 = vsel %vm225_vm5, %v2179_v55, 0.0  ;;  %v2195_v56 = vmul.f32 %v4427_v33, %v2191_v18  ;;  %v2226_v12 = vld [vmem:[#allocation2 + $0x218] sm:$0xff]  ;;  %v2228_v18 = vld [vmem:[#allocation2 + $0x228] sm:$0xff] }
 0x87c   :  { %v2194_v26 = vmul.f32 %v4427_v33, %v2190_v10 }
 0x87d   :  { %v4685_v29 = vpop.permute.xlu0 %2120 }
 0x87e   :  { %v4687_v30 = vpop.permute.xlu1 %2118  ;;  %v2131_v55 = vsel %vm138_vm6, 0.0, %v4685_v29  ;;  %v3608_v35 = vpack.c.bf16 %v2195_v56, %v2194_v26 }
 0x87f   :  { %v2130_v22 = vsel %vm138_vm6, 0.0, %v4687_v30  ;;  %v2135_v45 = vmul.f32 %v4442_v21, %v2131_v55 }
 0x881   :  { %v2065_v41 = vpop.permute.xlu0 %2064 }
 0x882   :  { %v2073_v43 = vsel %vm52_vm0, 0.0, %v2065_v41  ;;  %v2063_v25 = vpop.permute.xlu1 %2062 }
 0x883   :  { %v2077_v31 = vmul.f32 %v4364_v5, %v2073_v43  ;;  %v2072_v34 = vsel %vm52_vm0, 0.0, %v2063_v25 }
 0x884   :  { %v2076_v36 = vmul.f32 %v4364_v5, %v2072_v34 }
 0x885   :  { %v2145_v0 = vpop.permute.xlu0 %2144 }
 0x886   :  { %v3590_v50 = vpack.c.bf16 %v2077_v31, %v2076_v36  ;;  %v2153_v57 = vsel %vm167_vm1, %v2145_v0, 0.0  ;;  %v2143_v58 = vpop.permute.xlu1 %2142  ;;  %v2134_v31 = vmul.f32 %v4442_v21, %v2130_v22 }
 0x887   :  { %v2157_v5 = vmul.f32 %v4383_v38, %v2153_v57  ;;  %v2152_v24 = vsel %vm167_vm1, %v2143_v58, 0.0 }
 0x888   :  { %v2156_v47 = vmul.f32 %v4383_v38, %v2152_v24  ;;  %3591 = vmatpush3.bf16.msra.mxu1 %v3590_v50  ;;  %v3610_v51 = vpack.c.bf16 %v2135_v45, %v2134_v31 }
 0x889   :  { %v2085_v61 = vpop.permute.xlu0 %2084  ;;  %3593 = vmatprep.subr.bf16.mxu1 %v3592_v14 }
 0x88a   :  { %v3596_v7 = vpack.c.bf16 %v2157_v5, %v2156_v47  ;;  %v2093_v32 = vsel %vm80_vm2, 0.0, %v2085_v61  ;;  %v2083_v8 = vpop.permute.xlu1 %2082 }
 0x88b   :  { %v2097_v9 = vmul.f32 %v4702_v46, %v2093_v32  ;;  %v2092_v38 = vsel %vm80_vm2, 0.0, %v2083_v8 }
 0x88c   :  { %v2096_v23 = vmul.f32 %v4702_v46, %v2092_v38  ;;  %3595 = vmatpush3.bf16.msra.mxu1 %v3594_v52 }
 0x88d   :  { %v2165_v13 = vpop.permute.xlu0 %2164  ;;  %3597 = vmatprep.subr.bf16.mxu1 %v3596_v7  ;;  %v2223_v7 = vld [vmem:[#allocation2 + $0x200] sm:$0xff] }
 0x88e   :  { %v3598_v16 = vpack.c.bf16 %v2097_v9, %v2096_v23  ;;  %v2173_v17 = vsel %vm196_vm3, %v2165_v13, 0.0  ;;  %v2163_v27 = vpop.permute.xlu1 %2162 }
 0x88f   :  { %v2177_v19 = vmul.f32 %v4401_v53, %v2173_v17  ;;  %v2172_v28 = vsel %vm196_vm3, %v2163_v27, 0.0  ;;  %v2229_v17 = vld [vmem:[#allocation2 + $0x230] sm:$0xff]  ;;  %v2227_v27 = vld [vmem:[#allocation2 + $0x220] sm:$0xff] }
 0x890   :  { %v2176_v37 = vmul.f32 %v4401_v53, %v2172_v28  ;;  %3599 = vmatpush3.bf16.msra.mxu1 %v3598_v16  ;;  %v2224_v16 = vld [vmem:[#allocation2 + $0x208] sm:$0xff] }
 0x891   :  { %v2105_v20 = vpop.permute.xlu0 %2104  ;;  %3601 = vmatprep.subr.bf16.mxu1 %v3600_v15  ;;  %v2225_v15 = vld [vmem:[#allocation2 + $0x210] sm:$0xff] }
 0x892   :  { %v3604_v41 = vpack.c.bf16 %v2177_v19, %v2176_v37  ;;  %v2113_v42 = vsel %vm109_vm4, 0.0, %v2105_v20  ;;  %v2103_v40 = vpop.permute.xlu1 %2102 }
 0x893   :  { %v2117_v53 = vmul.f32 %v4414_v2, %v2113_v42  ;;  %v2112_v43 = vsel %vm109_vm4, 0.0, %v2103_v40 }
 0x894   :  { %v2116_v25 = vmul.f32 %v4414_v2, %v2112_v43  ;;  %3603 = vmatpush3.bf16.msra.mxu1 %v3602_v39 }
 0x895   :  { %v2185_v44 = vpop.permute.xlu0 %2184  ;;  %3605 = vmatprep.subr.bf16.mxu1 %v3604_v41 }
 0x896   :  { %v3606_v34 = vpack.c.bf16 %v2117_v53, %v2116_v25  ;;  %v2193_v36 = vsel %vm225_vm5, %v2185_v44, 0.0  ;;  %v2183_v29 = vpop.permute.xlu1 %2182 }
 0x897   :  { %v2197_v30 = vmul.f32 %v4427_v33, %v2193_v36  ;;  %v2192_v49 = vsel %vm225_vm5, %v2183_v29, 0.0 }
 0x898   :  { %v2196_v0 = vmul.f32 %v4427_v33, %v2192_v49  ;;  %3607 = vmatpush3.bf16.msra.mxu1 %v3606_v34 }
 0x899   :  { %v2125_v2 = vpop.permute.xlu0 %2124  ;;  %3609 = vmatprep.subr.bf16.mxu1 %v3608_v35 }
 0x89a   :  { %v3612_v54 = vpack.c.bf16 %v2197_v30, %v2196_v0  ;;  %v2133_v50 = vsel %vm138_vm6, 0.0, %v2125_v2  ;;  %v2123_v57 = vpop.permute.xlu1 %2122 }
 0x89b   :  { %v2137_v58 = vmul.f32 %v4442_v21, %v2133_v50  ;;  %v2132_v14 = vsel %vm138_vm6, 0.0, %v2123_v57 }
 0x89c   :  { %v2136_v5 = vmul.f32 %v4442_v21, %v2132_v14  ;;  %3611 = vmatpush3.bf16.msra.mxu1 %v3610_v51 }
 0x89d   :  { %v2201_v24 = vpop.permute.xlu0 %2200  ;;  %3613 = vmatprep.subr.bf16.mxu1 %v3612_v54 }
 0x89e   :  { %v3614_v47 = vpack.c.bf16 %v2137_v58, %v2136_v5  ;;  %v2211_v33 = vsel %vm254_vm7, %v2201_v24, 0.0  ;;  %v2199_v52 = vpop.permute.xlu1 %2198  ;;  %v2608_v24 = vld [vmem:[#allocation2 + $0x248] sm:$0xff] }
 0x89f   :  { %v2215_v63 = vmul.f32 %v4458_v60, %v2211_v33  ;;  %v2210_v1 = vsel %vm254_vm7, %v2199_v52, 0.0  ;;  %v2915_v33 = vld [vmem:[%s4889_s2 + $0xc8] sm:$0xff]  ;;  %v2914_v52 = vld [vmem:[%s4889_s2 + $0xc0] sm:$0xff] }
 0x8a0   :  { %v2214_v61 = vmul.f32 %v4458_v60, %v2210_v1  ;;  %3615 = vmatpush3.bf16.msra.mxu1 %v3614_v47  ;;  %v2609_v47 = vld [vmem:[#allocation2 + $0x250] sm:$0xff] }
 0x8a1   :  { %v2205_v6 = vpop.permute.xlu0 %2204  ;;  %v2916_v1 = vld [vmem:[%s4889_s2 + $0xd0] sm:$0xff] }
 0x8a2   :  { %v3616_v32 = vpack.c.bf16 %v2215_v63, %v2214_v61  ;;  %v2213_v21 = vsel %vm254_vm7, %v2205_v6, 0.0  ;;  %v2203_v8 = vpop.permute.xlu1 %2202  ;;  %v2917_v63 = vld [vmem:[%s4889_s2 + $0xd8] sm:$0xff] }
 0x8a3   :  { %v2217_v9 = vmul.f32 %v4458_v60, %v2213_v21  ;;  %v2212_v38 = vsel %vm254_vm7, %v2203_v8, 0.0  ;;  %2333 = vmatmul.mubr.f32.vlgmr.msra.gmra.mrb[24].mxu1 %v2219_v62 }
 0x8a4   :  { %v2216_v23 = vmul.f32 %v4458_v60, %v2212_v38  ;;  %3617 = vmatprep.subr.bf16.mxu0 %v3616_v32  ;;  %2337 = vmatprep.mubr.f32.mxu1 %v2223_v7  ;;  %v2230_v60 = vld [vmem:[#allocation2 + $0x238] sm:$0xff]  ;;  %v3689_v7 = vld [vmem:[%s4890_s3] ss:$0 sm:$0xff] }
 0x8a5   :  { %3619 = vmatpush3.bf16.msra.mxu0 %v3616_v32 }
 0x8a6   :  { %v3620_v13 = vpack.c.bf16 %v2217_v9, %v2216_v23 }
 0x8a7   :  { %2338 = vmatmul.mubr.f32.gmra.mrb[26].mxu1 %v2222_v11 }
 0x8a8   :  { %3621 = vmatprep.subr.bf16.mxu0 %v3620_v13  ;;  %2342 = vmatprep.mubr.f32.mxu1 %v2226_v12 }
 0x8a9   :  { %3623 = vmatpush3.bf16.msra.mxu0 %v3620_v13 }
 0x8ab   :  { %2343 = vmatmul.mubr.f32.gmra.mrb[28].mxu1 %v2225_v15 }
 0x8ac   :  { %3365 = vmatmul.mubr.msk.f32.vlgmr.msra.gmra.mrb[36].mxu0 %vm307_vm8, %v2224_v16  ;;  %2347 = vmatprep.mubr.f32.mxu1 %v2229_v17 }
 0x8ad   :  { %3367 = vmatprep.mubr.msk.f32.mxu0 %vm307_vm8, %v2227_v27 }
 0x8af   :  { %2348 = vmatmul.mubr.f32.gmra.mrb[30].mxu1 %v2228_v18 }
 0x8b0   :  { %3368 = vmatmul.mubr.msk.f32.gmra.mrb[38].mxu0 %vm307_vm8, %v2230_v60  ;;  %2720 = vmatprep.mubr.f32.mxu1 %v2608_v24 }
 0x8b1   :  { %3378 = vmatprep.mubr.msk.f32.mxu0 %vm307_vm8, %v2609_v47 }
 0x8b2   :  { %v2244_v26 = vpop.permute.xlu0 %2243 }
 0x8b3   :  { %v2239_v39 = vpop.permute.xlu1 %2238 }
 0x8b6   :  { %v2254_v2 = vpop.permute.xlu0 %2253 }
 0x8b7   :  { %v2249_v44 = vpop.permute.xlu1 %2248 }
 0x976   :  { %v3214_v10 = vpop.f32.mrb[24].mxu1 }
 0x977   :  { %v3215_v19 = vpop.f32.mrb[25].mxu1 }
 0x978   :  { %v3216_v28 = vadd.f32 %v3215_v19, %v3214_v10 }
 0x97a   :  { %v3217_v37 = vpop.f32.mrb[26].mxu1  ;;  %v2335_v22 = vadd.f32 %v3216_v28, %v2239_v39 }
 0x97b   :  { %v3218_v20 = vpop.f32.mrb[27].mxu1 }
 0x97c   :  { %v3219_v56 = vadd.f32 %v3218_v20, %v3217_v37 }
 0x97e   :  { %v3220_v41 = vpop.f32.mrb[28].mxu1  ;;  %v2340_v42 = vadd.f32 %v3219_v56, %v2244_v26 }
 0x97f   :  { %v3221_v40 = vpop.f32.mrb[29].mxu1  ;;  %v3366_v55 = vpop.f32.mrb[36].mxu0 }
 0x980   :  { %v3222_v53 = vadd.f32 %v3221_v40, %v3220_v41  ;;  %v2425_v43 = vadd.f32 %v3366_v55, %v2340_v42  ;;  %v2419_v25 = vpop.f32.mrb[37].mxu0  ;;  %v3690_v41 = vld [vmem:[%s4890_s3 + $0x5] ss:$0 sm:$0xff] }
 0x981   :  { %v2420_v45 = vadd.f32 %v2419_v25, %v2335_v22 }
 0x982   :  { %v2439_v31 = vmax.f32 %v2425_v43, 0.0  ;;  %v3223_v34 = vpop.f32.mrb[30].mxu1  ;;  %v2345_v36 = vadd.f32 %v3222_v53, %v2249_v44 }
 0x983   :  { %v2438_v29 = vmax.f32 %v2420_v45, 0.0  ;;  %v3224_v35 = vpop.f32.mrb[31].mxu1  ;;  %v3369_v30 = vpop.f32.mrb[38].mxu0 }
 0x984   :  { %v3225_v49 = vadd.f32 %v3224_v35, %v3223_v34  ;;  %v2429_v0 = vpop.f32.mrb[39].mxu0  ;;  %2448 = vrot.lane.b32.xlu0 %v2439_v31, %s3747_s9 }
 0x985   :  { %v2430_v51 = vadd.f32 %v2429_v0, %v2345_v36  ;;  %2446 = vrot.lane.b32.xlu1 %v2438_v29, %s3747_s9  ;;  %v3624_v54 = vpack.c.bf16 %v2439_v31, %v2438_v29 }
 0x986   :  { %v2350_v50 = vadd.f32 %v3225_v49, %v2254_v2 }
 0x987   :  { %3625 = vmatprep.subr.bf16.mxu1 %v3624_v54  ;;  %v2440_v14 = vmax.f32 %v2430_v51, 0.0  ;;  %v3691_v51 = vld [vmem:[%s4890_s3 + $0x6] ss:$0 sm:$0xff] }
 0x988   :  { %v2435_v57 = vadd.f32 %v3369_v30, %v2350_v50  ;;  %2528 = vrot.lane.b32.xlu0 %v2439_v31, %s3748_s11 }
 0x989   :  { %2526 = vrot.lane.b32.xlu1 %v2438_v29, %s3748_s11 }
 0x98a   :  { %v2441_v58 = vmax.f32 %v2435_v57, 0.0 }
 0x98c   :  { %2468 = vrot.lane.b32.xlu0 %v2439_v31, %s3749_s12  ;;  %v3628_v5 = vpack.c.bf16 %v2441_v58, %v2440_v14 }
 0x98d   :  { %2466 = vrot.lane.b32.xlu1 %v2438_v29, %s3749_s12 }
 0x990   :  { %2548 = vrot.lane.b32.xlu0 %v2439_v31, %s3750_s0 }
 0x991   :  { %2546 = vrot.lane.b32.xlu1 %v2438_v29, %s3750_s0 }
 0x994   :  { %2488 = vrot.lane.b32.xlu0 %v2439_v31, %s3751_s13 }
 0x995   :  { %2486 = vrot.lane.b32.xlu1 %v2438_v29, %s3751_s13 }
 0x998   :  { %2568 = vrot.lane.b32.xlu0 %v2439_v31, %s3752_s14 }
 0x999   :  { %2566 = vrot.lane.b32.xlu1 %v2438_v29, %s3752_s14 }
 0x99c   :  { %2508 = vrot.lane.b32.xlu0 %v2439_v31, %s3753_s15 }
 0x99d   :  { %2506 = vrot.lane.b32.xlu1 %v2438_v29, %s3753_s15 }
 0x9a0   :  { %2452 = vrot.lane.b32.xlu0 %v2441_v58, %s3747_s9 }
 0x9a1   :  { %2450 = vrot.lane.b32.xlu1 %v2440_v14, %s3747_s9 }
 0x9a4   :  { %2532 = vrot.lane.b32.xlu0 %v2441_v58, %s3748_s11 }
 0x9a5   :  { %2530 = vrot.lane.b32.xlu1 %v2440_v14, %s3748_s11 }
 0x9a8   :  { %2472 = vrot.lane.b32.xlu0 %v2441_v58, %s3749_s12 }
 0x9a9   :  { %2470 = vrot.lane.b32.xlu1 %v2440_v14, %s3749_s12 }
 0x9ac   :  { %2552 = vrot.lane.b32.xlu0 %v2441_v58, %s3750_s0 }
 0x9ad   :  { %2550 = vrot.lane.b32.xlu1 %v2440_v14, %s3750_s0 }
 0x9b0   :  { %2492 = vrot.lane.b32.xlu0 %v2441_v58, %s3751_s13 }
 0x9b1   :  { %2490 = vrot.lane.b32.xlu1 %v2440_v14, %s3751_s13 }
 0x9b4   :  { %2572 = vrot.lane.b32.xlu0 %v2441_v58, %s3752_s14 }
 0x9b5   :  { %2570 = vrot.lane.b32.xlu1 %v2440_v14, %s3752_s14 }
 0x9b8   :  { %2512 = vrot.lane.b32.xlu0 %v2441_v58, %s3753_s15 }
 0x9b9   :  { %2510 = vrot.lane.b32.xlu1 %v2440_v14, %s3753_s15 }
 0x9bc   :  { %2588 = vrot.lane.b32.xlu0 %v2439_v31, %s3754_s16 }
 0x9bd   :  { %2586 = vrot.lane.b32.xlu1 %v2438_v29, %s3754_s16 }
 0x9c0   :  { %2592 = vrot.lane.b32.xlu0 %v2441_v58, %s3754_s16 }
 0x9c1   :  { %2590 = vrot.lane.b32.xlu1 %v2440_v14, %s3754_s16 }
 0x9c4   :  { %2631 = vperm.xlu0 %3678, %v2915_v33  }
 0x9c5   :  { %2626 = vperm.xlu1 %3679, %v2914_v52  }
 0x9c8   :  { %2641 = vperm.xlu0 %3678, %v2917_v63  }
 0x9c9   :  { %2636 = vperm.xlu1 %3679, %v2916_v1   ;;  %v3692_v1 = vld [vmem:[%s4890_s3 + $0x2] ss:$0 sm:$0xff] }
 0x9f6   :  { %v2449_v61 = vpop.permute.xlu0 %2448 }
 0x9f7   :  { %v2459_v62 = vsel %vm52_vm0, 0.0, %v2449_v61  ;;  %v2447_v6 = vpop.permute.xlu1 %2446 }
 0x9f8   :  { %v2463_v32 = vmul.f32 %v3689_v7, %v2459_v62  ;;  %v2458_v21 = vsel %vm52_vm0, 0.0, %v2447_v6 }
 0x9f9   :  { %v2462_v8 = vmul.f32 %v3689_v7, %v2458_v21 }
 0x9fa   :  { %v2529_v9 = vpop.permute.xlu0 %2528 }
 0x9fb   :  { %v3626_v38 = vpack.c.bf16 %v2463_v32, %v2462_v8  ;;  %v2527_v23 = vpop.permute.xlu1 %2526  ;;  %v2539_v19 = vsel %vm167_vm1, %v2529_v9, 0.0 }
 0x9fc   :  { %v2538_v28 = vsel %vm167_vm1, %v2527_v23, 0.0  ;;  %v2543_v42 = vmul.f32 %v3690_v41, %v2539_v19 }
 0x9fd   :  { %3627 = vmatpush3.bf16.msra.mxu1 %v3626_v38  ;;  %v2542_v40 = vmul.f32 %v3690_v41, %v2538_v28 }
 0x9fe   :  { %v2469_v11 = vpop.permute.xlu0 %2468  ;;  %3629 = vmatprep.subr.bf16.mxu1 %v3628_v5 }
 0x9ff   :  { %v2467_v12 = vpop.permute.xlu1 %2466  ;;  %v2479_v39 = vsel %vm80_vm2, 0.0, %v2469_v11  ;;  %v3632_v35 = vpack.c.bf16 %v2543_v42, %v2542_v40 }
 0xa00   :  { %v2478_v20 = vsel %vm80_vm2, 0.0, %v2467_v12  ;;  %v2483_v43 = vmul.f32 %v4702_v46, %v2479_v39 }
 0xa01   :  { %v2482_v25 = vmul.f32 %v4702_v46, %v2478_v20 }
 0xa02   :  { %v2549_v13 = vpop.permute.xlu0 %2548 }
 0xa03   :  { %v2547_v15 = vpop.permute.xlu1 %2546  ;;  %v2559_v45 = vsel %vm196_vm3, %v2549_v13, 0.0  ;;  %v3634_v2 = vpack.c.bf16 %v2483_v43, %v2482_v25 }
 0xa04   :  { %v2558_v31 = vsel %vm196_vm3, %v2547_v15, 0.0  ;;  %v2563_v54 = vmul.f32 %v3691_v51, %v2559_v45  ;;  %v3693_v15 = vld [vmem:[%s4890_s3 + $0x7] ss:$0 sm:$0xff] }
 0xa05   :  { %v2562_v50 = vmul.f32 %v3691_v51, %v2558_v31 }
 0xa06   :  { %v2489_v16 = vpop.permute.xlu0 %2488 }
 0xa07   :  { %v2487_v17 = vpop.permute.xlu1 %2486  ;;  %v2499_v58 = vsel %vm109_vm4, 0.0, %v2489_v16 }
 0xa08   :  { %v2498_v14 = vsel %vm109_vm4, 0.0, %v2487_v17  ;;  %v2503_v61 = vmul.f32 %v3692_v1, %v2499_v58 }
 0xa09   :  { %v2502_v62 = vmul.f32 %v3692_v1, %v2498_v14  ;;  %v2607_v14 = vld [vmem:[#allocation2 + $0x240] sm:$0xff] }
 0xa0a   :  { %v2569_v27 = vpop.permute.xlu0 %2568 }
 0xa0b   :  { %v2567_v18 = vpop.permute.xlu1 %2566  ;;  %v2579_v9 = vsel %vm225_vm5, %v2569_v27, 0.0  ;;  %v3642_v12 = vpack.c.bf16 %v2503_v61, %v2502_v62  ;;  %v2610_v62 = vld [vmem:[#allocation2 + $0x258] sm:$0xff] }
 0xa0c   :  { %v2578_v38 = vsel %vm225_vm5, %v2567_v18, 0.0  ;;  %v2583_v16 = vmul.f32 %v3693_v15, %v2579_v9  ;;  %v2615_v9 = vld [vmem:[#allocation2 + $0x280] sm:$0xff] }
 0xa0d   :  { %v2582_v17 = vmul.f32 %v3693_v15, %v2578_v38  ;;  %v2616_v38 = vld [vmem:[#allocation2 + $0x288] sm:$0xff] }
 0xa0e   :  { %v4809_v60 = vpop.permute.xlu0 %2508 }
 0xa0f   :  { %v4811_v10 = vpop.permute.xlu1 %2506  ;;  %v2519_v18 = vsel %vm138_vm6, 0.0, %v4809_v60 }
 0xa12   :  { %v2453_v37 = vpop.permute.xlu0 %2452 }
 0xa13   :  { %v2461_v56 = vsel %vm52_vm0, 0.0, %v2453_v37  ;;  %v2451_v26 = vpop.permute.xlu1 %2450  ;;  %v2518_v37 = vsel %vm138_vm6, 0.0, %v4811_v10 }
 0xa14   :  { %v2465_v55 = vmul.f32 %v3689_v7, %v2461_v56  ;;  %v2460_v22 = vsel %vm52_vm0, 0.0, %v2451_v26 }
 0xa15   :  { %v2464_v53 = vmul.f32 %v3689_v7, %v2460_v22  ;;  %v3640_v7 = vpack.c.bf16 %v2563_v54, %v2562_v50  ;;  %v3695_v54 = vld [vmem:[%s4890_s3 + $0x8] ss:$0 sm:$0xff] }
 0xa16   :  { %v2533_v44 = vpop.permute.xlu0 %2532 }
 0xa17   :  { %v3630_v34 = vpack.c.bf16 %v2465_v55, %v2464_v53  ;;  %v2541_v36 = vsel %vm167_vm1, %v2533_v44, 0.0  ;;  %v2531_v29 = vpop.permute.xlu1 %2530  ;;  %v3648_v53 = vpack.c.bf16 %v2583_v16, %v2582_v17 }
 0xa18   :  { %v2545_v30 = vmul.f32 %v3690_v41, %v2541_v36  ;;  %v2540_v49 = vsel %vm167_vm1, %v2531_v29, 0.0 }
 0xa19   :  { %v2544_v0 = vmul.f32 %v3690_v41, %v2540_v49  ;;  %3631 = vmatpush3.bf16.msra.mxu1 %v3630_v34  ;;  %v3694_v41 = vld [vmem:[%s4890_s3 + $0x3] ss:$0 sm:$0xff]  ;;  %s3756_s3 = smov [#allocation5]  }
 0xa1a   :  { %v2473_v57 = vpop.permute.xlu0 %2472  ;;  %3633 = vmatprep.subr.bf16.mxu1 %v3632_v35  ;;  %v2523_v42 = vmul.f32 %v3694_v41, %v2519_v18  ;;  %v2522_v40 = vmul.f32 %v3694_v41, %v2518_v37  ;;  %s2843_s7 = sshll.u32 %s3756_s3, 4  ;;  %s2844_s7 = int_to_ptr.vmem [resolvable:$true] %s2843_s7 }
 0xa1b   :  { %v3636_v5 = vpack.c.bf16 %v2545_v30, %v2544_v0  ;;  %v2481_v24 = vsel %vm80_vm2, 0.0, %v2473_v57  ;;  %v2471_v47 = vpop.permute.xlu1 %2470  ;;  %s3718_s8 = scalar_lea.vmem %s2844_s7, 512  ;;  %p3723_p9 = scmp.lt.s32.totalorder %s2844_s7, %s2844_s7 }
 0xa1c   :  { %v2485_v33 = vmul.f32 %v4702_v46, %v2481_v24  ;;  %v2480_v52 = vsel %vm80_vm2, 0.0, %v2471_v47  ;;  %v3650_v45 = vpack.c.bf16 %v2523_v42, %v2522_v40  ;;  %v2611_v24 = vld [vmem:[#allocation2 + $0x260] sm:$0xff]  ;;  %p3719_p8 = scmp.ne.s32.totalorder %s2844_s7, %s3718_s8  ;;  %p3724_p10 = scmp.lt.s32.totalorder %s3718_s8, %s3718_s8 }
 0xa1d   :  { %v2484_v63 = vmul.f32 %v4702_v46, %v2480_v52  ;;  %3635 = vmatpush3.bf16.msra.mxu1 %v3634_v2 }
 0xa1e   :  { %v2553_v6 = vpop.permute.xlu0 %2552  ;;  %3637 = vmatprep.subr.bf16.mxu1 %v3636_v5  ;;  %p3725_p11 = por %p3724_p10, %p3723_p9 }
 0xa1f   :  { %v3638_v32 = vpack.c.bf16 %v2485_v33, %v2484_v63  ;;  %v2561_v21 = vsel %vm196_vm3, %v2553_v6, 0.0  ;;  %v2551_v8 = vpop.permute.xlu1 %2550  ;;  %v2614_v6 = vld [vmem:[#allocation2 + $0x278] sm:$0xff] }
 0xa20   :  { %v2565_v23 = vmul.f32 %v3691_v51, %v2561_v21  ;;  %v2560_v46 = vsel %vm196_vm3, %v2551_v8, 0.0  ;;  %v2612_v21 = vld [vmem:[#allocation2 + $0x268] sm:$0xff]  ;;  %v2617_v8 = vld [vmem:[#allocation2 + $0x290] sm:$0xff]  ;;  %p3726_p12 = pnand %p3725_p11, %p3719_p8 }
 0xa21   :  { %v2564_v11 = vmul.f32 %v3691_v51, %v2560_v46  ;;  %3639 = vmatpush3.bf16.msra.mxu1 %v3638_v32  ;;  %v2613_v32 = vld [vmem:[#allocation2 + $0x270] sm:$0xff] }
 0xa22   :  { %v2493_v13 = vpop.permute.xlu0 %2492  ;;  %3641 = vmatprep.subr.bf16.mxu1 %v3640_v7 }
 0xa23   :  { %v3644_v19 = vpack.c.bf16 %v2565_v23, %v2564_v11  ;;  %v2501_v28 = vsel %vm109_vm4, 0.0, %v2493_v13  ;;  %v2491_v27 = vpop.permute.xlu1 %2490  ;;  %v2618_v23 = vld [vmem:[#allocation2 + $0x298] sm:$0xff] }
 0xa24   :  { %v2505_v39 = vmul.f32 %v3692_v1, %v2501_v28  ;;  %v2500_v20 = vsel %vm109_vm4, 0.0, %v2491_v27 }
 0xa25   :  { %v2504_v56 = vmul.f32 %v3692_v1, %v2500_v20  ;;  %3643 = vmatpush3.bf16.msra.mxu1 %v3642_v12 }
 0xa26   :  { %v2573_v26 = vpop.permute.xlu0 %2572  ;;  %3645 = vmatprep.subr.bf16.mxu1 %v3644_v19 }
 0xa27   :  { %v3646_v55 = vpack.c.bf16 %v2505_v39, %v2504_v56  ;;  %v2581_v22 = vsel %vm225_vm5, %v2573_v26, 0.0  ;;  %v2571_v60 = vpop.permute.xlu1 %2570 }
 0xa28   :  { %v2585_v43 = vmul.f32 %v3693_v15, %v2581_v22  ;;  %v2580_v10 = vsel %vm225_vm5, %v2571_v60, 0.0 }
 0xa29   :  { %v2584_v25 = vmul.f32 %v3693_v15, %v2580_v10  ;;  %3647 = vmatpush3.bf16.msra.mxu1 %v3646_v55 }
 0xa2a   :  { %v2513_v44 = vpop.permute.xlu0 %2512  ;;  %3649 = vmatprep.subr.bf16.mxu1 %v3648_v53 }
 0xa2b   :  { %v3652_v31 = vpack.c.bf16 %v2585_v43, %v2584_v25  ;;  %v2521_v34 = vsel %vm138_vm6, 0.0, %v2513_v44  ;;  %v2511_v36 = vpop.permute.xlu1 %2510 }
 0xa2c   :  { %v2525_v29 = vmul.f32 %v3694_v41, %v2521_v34  ;;  %v2520_v35 = vsel %vm138_vm6, 0.0, %v2511_v36 }
 0xa2d   :  { %v2524_v30 = vmul.f32 %v3694_v41, %v2520_v35  ;;  %3651 = vmatpush3.bf16.msra.mxu1 %v3650_v45 }
 0xa2e   :  { %v2589_v49 = vpop.permute.xlu0 %2588  ;;  %3653 = vmatprep.subr.bf16.mxu1 %v3652_v31 }
 0xa2f   :  { %v3654_v0 = vpack.c.bf16 %v2525_v29, %v2524_v30  ;;  %v2599_v2 = vsel %vm254_vm7, %v2589_v49, 0.0  ;;  %v2587_v51 = vpop.permute.xlu1 %2586 }
 0xa30   :  { %v2603_v50 = vmul.f32 %v3695_v54, %v2599_v2  ;;  %v2598_v57 = vsel %vm254_vm7, %v2587_v51, 0.0 }
 0xa31   :  { %v2602_v58 = vmul.f32 %v3695_v54, %v2598_v57  ;;  %3655 = vmatpush3.bf16.msra.mxu1 %v3654_v0 }
 0xa32   :  { %v2593_v5 = vpop.permute.xlu0 %2592 }
 0xa33   :  { %v3656_v47 = vpack.c.bf16 %v2603_v50, %v2602_v58  ;;  %v2601_v33 = vsel %vm254_vm7, %v2593_v5, 0.0  ;;  %v2591_v52 = vpop.permute.xlu1 %2590 }
 0xa34   :  { %v2605_v63 = vmul.f32 %v3695_v54, %v2601_v33  ;;  %v2600_v1 = vsel %vm254_vm7, %v2591_v52, 0.0  ;;  %2721 = vmatmul.mubr.f32.vlgmr.msra.gmra.mrb[32].mxu1 %v2607_v14 }
 0xa35   :  { %v2604_v61 = vmul.f32 %v3695_v54, %v2600_v1  ;;  %3657 = vmatprep.subr.bf16.mxu0 %v3656_v47  ;;  %2725 = vmatprep.mubr.f32.mxu1 %v2611_v24 }
 0xa36   :  { %3659 = vmatpush3.bf16.msra.mxu0 %v3656_v47 }
 0xa37   :  { %v3660_v7 = vpack.c.bf16 %v2605_v63, %v2604_v61 }
 0xa38   :  { %2726 = vmatmul.mubr.f32.gmra.mrb[34].mxu1 %v2610_v62 }
 0xa39   :  { %3661 = vmatprep.subr.bf16.mxu0 %v3660_v7  ;;  %2730 = vmatprep.mubr.f32.mxu1 %v2614_v6 }
 0xa3a   :  { %3663 = vmatpush3.bf16.msra.mxu0 %v3660_v7 }
 0xa3c   :  { %2731 = vmatmul.mubr.f32.gmra.mrb[36].mxu1 %v2613_v32 }
 0xa3d   :  { %3379 = vmatmul.mubr.msk.f32.vlgmr.msra.gmra.mrb[40].mxu0 %vm307_vm8, %v2612_v21  ;;  %2735 = vmatprep.mubr.f32.mxu1 %v2617_v8 }
 0xa3e   :  { %3381 = vmatprep.mubr.msk.f32.mxu0 %vm307_vm8, %v2615_v9 }
 0xa40   :  { %2736 = vmatmul.mubr.f32.gmra.mrb[38].mxu1 %v2616_v38 }
 0xa41   :  { %3382 = vmatmul.mubr.msk.f32.gmra.mrb[42].mxu0 %vm307_vm8, %v2618_v23 }
 0xa43   :  { %v2632_v19 = vpop.permute.xlu0 %2631 }
 0xa44   :  { %v2627_v15 = vpop.permute.xlu1 %2626 }
 0xa47   :  { %v2642_v45 = vpop.permute.xlu0 %2641 }
 0xa48   :  { %v2637_v41 = vpop.permute.xlu1 %2636 }
 0xb07   :  { %v3266_v46 = vpop.f32.mrb[32].mxu1 }
 0xb08   :  { %v3267_v11 = vpop.f32.mrb[33].mxu1 }
 0xb09   :  { %v3268_v12 = vadd.f32 %v3267_v11, %v3266_v46 }
 0xb0b   :  { %v3269_v13 = vpop.f32.mrb[34].mxu1  ;;  %v2723_v39 = vadd.f32 %v3268_v12, %v2627_v15 }
 0xb0c   :  { %v3270_v16 = vpop.f32.mrb[35].mxu1 }
 0xb0d   :  { %v3271_v17 = vadd.f32 %v3270_v16, %v3269_v13 }
 0xb0f   :  { %v3272_v28 = vpop.f32.mrb[36].mxu1  ;;  %v2728_v27 = vadd.f32 %v3271_v17, %v2632_v19 }
 0xb10   :  { %v3273_v18 = vpop.f32.mrb[37].mxu1  ;;  %v3380_v37 = vpop.f32.mrb[40].mxu0 }
 0xb11   :  { %v3274_v20 = vadd.f32 %v3273_v18, %v3272_v28  ;;  %v2813_v56 = vadd.f32 %v3380_v37, %v2728_v27  ;;  %v2807_v26 = vpop.f32.mrb[41].mxu0 }
 0xb12   :  { %v2808_v42 = vadd.f32 %v2807_v26, %v2723_v39 }
 0xb13   :  { %v2827_v40 = vadd.f32 %v2813_v56, %v4590_v48  ;;  %v3275_v55 = vpop.f32.mrb[38].mxu1  ;;  %v2733_v22 = vadd.f32 %v3274_v20, %v2637_v41 }
 0xb14   :  { %v2826_v60 = vadd.f32 %v2808_v42, %v4592_v59  ;;  %v3276_v53 = vpop.f32.mrb[39].mxu1  ;;  %v3383_v43 = vpop.f32.mrb[42].mxu0 }
 0xb15   :  { %v2831_v10 = vmax.f32 %v2827_v40, 0.0  ;;  %v3277_v25 = vadd.f32 %v3276_v53, %v3275_v55  ;;  %v2817_v44 = vpop.f32.mrb[43].mxu0 }
 0xb16   :  { %v2830_v31 = vmax.f32 %v2826_v60, 0.0  ;;  %v2818_v34 = vadd.f32 %v2817_v44, %v2733_v22 }
 0xb17   :  { %2835 = vst [vmem:[#allocation5 + $0x8] sm:$0xff] %v2831_v10  ;;  %v2738_v36 = vadd.f32 %v3277_v25, %v2642_v45 }
 0xb18   :  { %2834 = vst [vmem:[#allocation5] sm:$0xff] %v2830_v31  ;;  %v2828_v29 = vadd.f32 %v2818_v34, %v4628_v4 }
 0xb19   :  { %v2823_v35 = vadd.f32 %v3383_v43, %v2738_v36 }
 0xb1a   :  { %v2832_v30 = vmax.f32 %v2828_v29, 0.0 }
 0xb1b   :  { %v2829_v48 = vadd.f32 %v2823_v35, %v4626_v3 }
 0xb1c   :  { %2836 = vst [vmem:[#allocation5 + $0x10] sm:$0xff] %v2832_v30 }
 0xb1d   :  { %v2833_v59 = vmax.f32 %v2829_v48, 0.0 }
 0xb1f   :  { %2837 = vst [vmem:[#allocation5 + $0x18] sm:$0xff] %v2833_v59 }
 0xb20   :  { %3729 = shalt.err (!%p3726_p12)
}
 0xb21   :  { %s3730_s17 = scalar_lea.hbm %s4891_s4, 512 }
 0xb22   :  { %p3731_p13 = scmp.ne.s32.totalorder %s4891_s4, %s3730_s17  ;;  %p3734_p0 = scmp.lt.u32.totalorder %s3730_s17, %s4891_s4 }
 0xb24   :  { %p3736_p1 = pnand %p3734_p0, %p3731_p13 }
 0xb26   :  { %3739 = shalt.err (!%p3736_p1)
}
 0xb27   :  { %s3757_s13 = smov 128  }
 0xb28   :  { %2849 = dma.vmem_to_hbm [thread:$0]  %s2844_s7, 512, %s4891_s4, [#allocation4], %s3757_s13, %s3757_s13, %s3749_s12  }
 0xb29   :  { %3742 = dma.done.wait [#allocation4], 512  }
 0xb2a   :  { %3743 = vsyncadd [#allocation4], 4294966784 }
 0xb2b   :  { %2853 = vsyncpa [#allocation3], 1 }
 0xb2c   :  { %2854 = vsyncpa [#allocation4], 1 }

</bundles_post_ra>
